<compile_context>
chip_gen: v6e
topology: v6e:2x2x1
jax: 0.10.0
libtpu: 0.0.40
codegen_flags: <defaults>
</compile_context>

<pallas_src>
import jax
import jax.numpy as jnp
from jax.experimental import pallas as pl
from jax.experimental.pallas import tpu as pltpu

INPUT_DIM = 1024
DIMS = [INPUT_DIM, 128, 64, 32, 16, 2]  # fc1..fc5


def mlp_kernel(x_ref,
               w1, b1, w2, b2, w3, b3, w4, b4, w5, b5,
               o_ref):
    """Fused fc1..fc5 (+ReLU) + 2-class softmax for one batch tile."""

    def layer(h, w, b):
        # MXU matmul in bf16 with f32 accumulation; bias-add / ReLU in f32,
        # then cast back to bf16 for the next MXU pass.
        y = jnp.dot(h, w[...], preferred_element_type=jnp.float32) + b[...]
        return jnp.maximum(y, 0.0).astype(jnp.bfloat16)

    h = layer(x_ref[...], w1, b1)           # (tile, 128)
    h = layer(h, w2, b2)                    # (tile, 64)
    h = layer(h, w3, b3)                    # (tile, 32)
    h = layer(h, w4, b4)                    # (tile, 16)
    # TODO(synk): nn.Dropout(p=0.5) is identity here (eval/inference
    # semantics); training-mode stochastic dropout (pltpu.prng_*) not added.

    logits = (jnp.dot(h, w5[...], preferred_element_type=jnp.float32)
              + b5[...])                    # (tile, 2), f32

    # 2-class softmax == sigmoid(l1 - l0): avoids 2-wide XLU max/sum reduces;
    # exp and approx reciprocal both run on the otherwise-idle EUP slot.
    d = jnp.clip(logits[:, 0:1] - logits[:, 1:2], -30.0, 30.0)   # l0 - l1
    p1 = pl.reciprocal(1.0 + jnp.exp(d), approx=True)            # (tile, 1)
    lane = jax.lax.broadcasted_iota(jnp.int32, logits.shape, 1)  # (tile, 2)
    probs = jnp.where(lane == 0, 1.0 - p1, p1)                   # (tile, 2)

    # NOTE: narrow (tile, 2) store is masked but negligible (~0.2% of HBM
    # traffic), so no transposed lane-dense output path is used.
    o_ref[...] = probs.astype(o_ref.dtype)


def _pick_batch_tile(B):
    """Rows per grid step.

    Prefer multiples of 256 (full fill of the 2x256x256 MXU on v6e/v7x and 2x
    the 128-row MXU on v5e), keep >=2 grid steps whenever possible (so v7x's
    two TensorCores both get work with dimension_semantics=("parallel",)), and
    cap at 1024 rows so a bf16 (tile, 1024) x block double-buffers in ~4 MiB of
    VMEM on every generation (well under v7x's 32 MiB default scoped limit).
    """
    half = max(8, B // 2)
    for t in (1024, 512, 256):
        if t <= half:
            return t
    # Small batches: multiple of 16 (bf16 sublane tile) with >=2 steps if possible.
    return max(16, min(half - half % 16, 128))


def imagebind_mlp(x, params, *, batch_tile=None):
    """x: (B, INPUT_DIM). params: list of (W_t, b_row) with W_t (in,out), b_row (1,out)."""
    B, D = x.shape
    assert D == INPUT_DIM
    if batch_tile is None:
        batch_tile = _pick_batch_tile(B)
    assert batch_tile % 8 == 0

    # Pad batch to a multiple of the tile (padded rows sliced off afterwards).
    Bp = -(-B // batch_tile) * batch_tile
    if Bp != B:
        x = jnp.pad(x, ((0, Bp - B), (0, 0)))

    # bf16 matmul inputs (f32 accumulation happens inside the kernel).
    x_bf = x.astype(jnp.bfloat16)

    flat_params = []
    in_specs = [pl.BlockSpec((batch_tile, D), lambda i: (i, 0))]
    for (w, b) in params:
        flat_params += [w.astype(jnp.bfloat16), b.astype(jnp.float32)]
        # Whole weight / bias resident in VMEM; constant index -> no re-DMA.
        in_specs.append(pl.BlockSpec(w.shape, lambda i: (0, 0)))
        in_specs.append(pl.BlockSpec(b.shape, lambda i: (0, 0)))

    out_dim = DIMS[-1]
    out = pl.pallas_call(
        mlp_kernel,
        out_shape=jax.ShapeDtypeStruct((Bp, out_dim), jnp.float32),
        grid_spec=pltpu.PrefetchScalarGridSpec(
            num_scalar_prefetch=0,
            grid=(Bp // batch_tile,),
            in_specs=in_specs,
            out_specs=pl.BlockSpec((batch_tile, out_dim), lambda i: (i, 0)),
        ),
        compiler_params=pltpu.CompilerParams(
            dimension_semantics=("parallel",)),
    )(x_bf, *flat_params)

    return out[:B] if Bp != B else out


def init_params(key):
    """Deterministic init matching nn.Linear shapes (stored transposed)."""
    params = []
    for li, (d_in, d_out) in enumerate(zip(DIMS[:-1], DIMS[1:])):
        kw, kb, key = jax.random.split(jax.random.fold_in(key, li), 3)
        bound = 1.0 / jnp.sqrt(d_in)
        w = jax.random.uniform(kw, (d_in, d_out), jnp.float32, -bound, bound)
        b = jax.random.uniform(kb, (1, d_out), jnp.float32, -bound, bound)
        params.append((w, b))
    return params


def reference(x, params, *, matmul_dtype=jnp.float32):
    """Pure-JAX reference; matmul_dtype=bf16 mirrors the kernel's MXU casts."""
    h = x
    for i, (w, b) in enumerate(params):
        h = jnp.dot(h.astype(matmul_dtype), w.astype(matmul_dtype),
                    preferred_element_type=jnp.float32) + b
        if i < len(params) - 1:
            h = jnp.maximum(h, 0.0)
    return jax.nn.softmax(h, axis=1)


if __name__ == "__main__":
    key = jax.random.PRNGKey(0)
    kx, kp = jax.random.split(key)
    params = init_params(kp)

    # Main check: batch large enough to exercise a 256-row tile and 2 grid steps.
    B = 512
    x = jax.random.normal(kx, (B, INPUT_DIM), jnp.float32)
    out = jax.block_until_ready(imagebind_mlp(x, params))
    assert out.shape == (B, 2)
    assert bool(jnp.all(jnp.isfinite(out)))

    ref_bf16 = reference(x, params, matmul_dtype=jnp.bfloat16)  # matched precision
    ref_f32 = reference(x, params, matmul_dtype=jnp.float32)    # module semantics
    assert jnp.allclose(out, ref_bf16, atol=5e-3, rtol=0.0), "mismatch vs bf16 reference"
    assert jnp.allclose(out, ref_f32, atol=3e-2, rtol=0.0), "mismatch vs f32 reference"
    assert jnp.allclose(jnp.sum(out, axis=1), 1.0, atol=1e-5)

    # Ragged-batch path (padding + small-tile fallback).
    B2 = 20
    x2 = jax.random.normal(jax.random.fold_in(kx, 1), (B2, INPUT_DIM), jnp.float32)
    out2 = jax.block_until_ready(imagebind_mlp(x2, params))
    assert out2.shape == (B2, 2)
    assert jnp.allclose(out2, reference(x2, params, matmul_dtype=jnp.bfloat16),
                        atol=5e-3, rtol=0.0), "mismatch vs bf16 reference (padded batch)"

    print("KERNEL_OK")
</pallas_src>

<mosaic_0001>
module attributes {stable_mosaic.version = 11 : i64} {
  func.func @mlp_kernel(%arg0: i32, %arg1: memref<256x1024xbf16, #tpu.memory_space<vmem>>, %arg2: memref<1024x128xbf16, #tpu.memory_space<vmem>>, %arg3: memref<1x128xf32, #tpu.memory_space<vmem>>, %arg4: memref<128x64xbf16, #tpu.memory_space<vmem>>, %arg5: memref<1x64xf32, #tpu.memory_space<vmem>>, %arg6: memref<64x32xbf16, #tpu.memory_space<vmem>>, %arg7: memref<1x32xf32, #tpu.memory_space<vmem>>, %arg8: memref<32x16xbf16, #tpu.memory_space<vmem>>, %arg9: memref<1x16xf32, #tpu.memory_space<vmem>>, %arg10: memref<16x2xbf16, #tpu.memory_space<vmem>>, %arg11: memref<1x2xf32, #tpu.memory_space<vmem>>, %arg12: memref<256x2xf32, #tpu.memory_space<vmem>>) attributes {dimension_semantics = [#tpu.dimension_semantics<parallel>], iteration_bounds = array<i64: 2>, scalar_prefetch = 0 : i64, scratch_operands = 0 : i64, tpu.core_type = #tpu.core_type<tc>, window_params = [{transform_indices = @transform_0, window_bounds = array<i64: 256, 1024>}, {pipeline_mode = #tpu.pipeline_mode<synchronous>, transform_indices = @transform_1, window_bounds = array<i64: 1024, 128>}, {pipeline_mode = #tpu.pipeline_mode<synchronous>, transform_indices = @transform_2, window_bounds = array<i64: 1, 128>}, {pipeline_mode = #tpu.pipeline_mode<synchronous>, transform_indices = @transform_3, window_bounds = array<i64: 128, 64>}, {pipeline_mode = #tpu.pipeline_mode<synchronous>, transform_indices = @transform_4, window_bounds = array<i64: 1, 64>}, {pipeline_mode = #tpu.pipeline_mode<synchronous>, transform_indices = @transform_5, window_bounds = array<i64: 64, 32>}, {pipeline_mode = #tpu.pipeline_mode<synchronous>, transform_indices = @transform_6, window_bounds = array<i64: 1, 32>}, {pipeline_mode = #tpu.pipeline_mode<synchronous>, transform_indices = @transform_7, window_bounds = array<i64: 32, 16>}, {pipeline_mode = #tpu.pipeline_mode<synchronous>, transform_indices = @transform_8, window_bounds = array<i64: 1, 16>}, {pipeline_mode = #tpu.pipeline_mode<synchronous>, transform_indices = @transform_9, window_bounds = array<i64: 16, 2>}, {pipeline_mode = #tpu.pipeline_mode<synchronous>, transform_indices = @transform_10, window_bounds = array<i64: 1, 2>}, {transform_indices = @transform_11, window_bounds = array<i64: 256, 2>}]} {
    %c0 = arith.constant 0 : index
    %c0_0 = arith.constant 0 : index
    %0 = vector.load %arg1[%c0, %c0_0] : memref<256x1024xbf16, #tpu.memory_space<vmem>>, vector<256x1024xbf16>
    %c0_1 = arith.constant 0 : index
    %c0_2 = arith.constant 0 : index
    %1 = vector.load %arg2[%c0_1, %c0_2] : memref<1024x128xbf16, #tpu.memory_space<vmem>>, vector<1024x128xbf16>
    %cst = arith.constant dense<0.000000e+00> : vector<256x128xf32>
    %2 = tpu.matmul %0, %1, %cst {dimension_numbers = #tpu.dot_dimension_numbers<[1], [0], [0], [1], [0, 0, 1, 1], [], []>} : vector<256x1024xbf16>, vector<1024x128xbf16>, vector<256x128xf32> -> vector<256x128xf32>
    %c0_3 = arith.constant 0 : index
    %c0_4 = arith.constant 0 : index
    %3 = vector.load %arg3[%c0_3, %c0_4] : memref<1x128xf32, #tpu.memory_space<vmem>>, vector<1x128xf32>
    %4 = vector.broadcast %3 : vector<1x128xf32> to vector<256x128xf32>
    %5 = arith.addf %2, %4 : vector<256x128xf32>
    %cst_5 = arith.constant 0.000000e+00 : f32
    %6 = vector.broadcast %cst_5 : f32 to vector<256x128xf32>
    %7 = arith.maximumf %5, %6 : vector<256x128xf32>
    %8 = arith.truncf %7 : vector<256x128xf32> to vector<256x128xbf16>
    %c0_6 = arith.constant 0 : index
    %c0_7 = arith.constant 0 : index
    %9 = vector.load %arg4[%c0_6, %c0_7] : memref<128x64xbf16, #tpu.memory_space<vmem>>, vector<128x64xbf16>
    %cst_8 = arith.constant dense<0.000000e+00> : vector<256x64xf32>
    %10 = tpu.matmul %8, %9, %cst_8 {dimension_numbers = #tpu.dot_dimension_numbers<[1], [0], [0], [1], [0, 0, 1, 1], [], []>} : vector<256x128xbf16>, vector<128x64xbf16>, vector<256x64xf32> -> vector<256x64xf32>
    %c0_9 = arith.constant 0 : index
    %c0_10 = arith.constant 0 : index
    %11 = vector.load %arg5[%c0_9, %c0_10] : memref<1x64xf32, #tpu.memory_space<vmem>>, vector<1x64xf32>
    %12 = vector.broadcast %11 : vector<1x64xf32> to vector<256x64xf32>
    %13 = arith.addf %10, %12 : vector<256x64xf32>
    %cst_11 = arith.constant 0.000000e+00 : f32
    %14 = vector.broadcast %cst_11 : f32 to vector<256x64xf32>
    %15 = arith.maximumf %13, %14 : vector<256x64xf32>
    %16 = arith.truncf %15 : vector<256x64xf32> to vector<256x64xbf16>
    %c0_12 = arith.constant 0 : index
    %c0_13 = arith.constant 0 : index
    %17 = vector.load %arg6[%c0_12, %c0_13] : memref<64x32xbf16, #tpu.memory_space<vmem>>, vector<64x32xbf16>
    %cst_14 = arith.constant dense<0.000000e+00> : vector<256x32xf32>
    %18 = tpu.matmul %16, %17, %cst_14 {dimension_numbers = #tpu.dot_dimension_numbers<[1], [0], [0], [1], [0, 0, 1, 1], [], []>} : vector<256x64xbf16>, vector<64x32xbf16>, vector<256x32xf32> -> vector<256x32xf32>
    %c0_15 = arith.constant 0 : index
    %c0_16 = arith.constant 0 : index
    %19 = vector.load %arg7[%c0_15, %c0_16] : memref<1x32xf32, #tpu.memory_space<vmem>>, vector<1x32xf32>
    %20 = vector.broadcast %19 : vector<1x32xf32> to vector<256x32xf32>
    %21 = arith.addf %18, %20 : vector<256x32xf32>
    %cst_17 = arith.constant 0.000000e+00 : f32
    %22 = vector.broadcast %cst_17 : f32 to vector<256x32xf32>
    %23 = arith.maximumf %21, %22 : vector<256x32xf32>
    %24 = arith.truncf %23 : vector<256x32xf32> to vector<256x32xbf16>
    %c0_18 = arith.constant 0 : index
    %c0_19 = arith.constant 0 : index
    %25 = vector.load %arg8[%c0_18, %c0_19] : memref<32x16xbf16, #tpu.memory_space<vmem>>, vector<32x16xbf16>
    %cst_20 = arith.constant dense<0.000000e+00> : vector<256x16xf32>
    %26 = tpu.matmul %24, %25, %cst_20 {dimension_numbers = #tpu.dot_dimension_numbers<[1], [0], [0], [1], [0, 0, 1, 1], [], []>} : vector<256x32xbf16>, vector<32x16xbf16>, vector<256x16xf32> -> vector<256x16xf32>
    %c0_21 = arith.constant 0 : index
    %c0_22 = arith.constant 0 : index
    %27 = vector.load %arg9[%c0_21, %c0_22] : memref<1x16xf32, #tpu.memory_space<vmem>>, vector<1x16xf32>
    %28 = vector.broadcast %27 : vector<1x16xf32> to vector<256x16xf32>
    %29 = arith.addf %26, %28 : vector<256x16xf32>
    %cst_23 = arith.constant 0.000000e+00 : f32
    %30 = vector.broadcast %cst_23 : f32 to vector<256x16xf32>
    %31 = arith.maximumf %29, %30 : vector<256x16xf32>
    %32 = arith.truncf %31 : vector<256x16xf32> to vector<256x16xbf16>
    %c0_24 = arith.constant 0 : index
    %c0_25 = arith.constant 0 : index
    %33 = vector.load %arg10[%c0_24, %c0_25] : memref<16x2xbf16, #tpu.memory_space<vmem>>, vector<16x2xbf16>
    %cst_26 = arith.constant dense<0.000000e+00> : vector<256x2xf32>
    %34 = tpu.matmul %32, %33, %cst_26 {dimension_numbers = #tpu.dot_dimension_numbers<[1], [0], [0], [1], [0, 0, 1, 1], [], []>} : vector<256x16xbf16>, vector<16x2xbf16>, vector<256x2xf32> -> vector<256x2xf32>
    %c0_27 = arith.constant 0 : index
    %c0_28 = arith.constant 0 : index
    %35 = vector.load %arg11[%c0_27, %c0_28] : memref<1x2xf32, #tpu.memory_space<vmem>>, vector<1x2xf32>
    %36 = vector.broadcast %35 : vector<1x2xf32> to vector<256x2xf32>
    %37 = arith.addf %34, %36 : vector<256x2xf32>
    %38 = vector.extract_strided_slice %37 {offsets = [0, 0], sizes = [256, 1], strides = [1, 1]} : vector<256x2xf32> to vector<256x1xf32>
    %39 = vector.extract_strided_slice %37 {offsets = [0, 1], sizes = [256, 1], strides = [1, 1]} : vector<256x2xf32> to vector<256x1xf32>
    %40 = arith.subf %38, %39 : vector<256x1xf32>
    %cst_29 = arith.constant -3.000000e+01 : f32
    %cst_30 = arith.constant 3.000000e+01 : f32
    %41 = vector.broadcast %cst_29 : f32 to vector<256x1xf32>
    %42 = arith.maximumf %41, %40 : vector<256x1xf32>
    %43 = vector.broadcast %cst_30 : f32 to vector<256x1xf32>
    %44 = arith.minimumf %43, %42 : vector<256x1xf32>
    %45 = math.exp %44 : vector<256x1xf32>
    %cst_31 = arith.constant 1.000000e+00 : f32
    %46 = vector.broadcast %cst_31 : f32 to vector<256x1xf32>
    %47 = arith.addf %46, %45 : vector<256x1xf32>
    %48 = tpu.reciprocal %47 {approx = true} : vector<256x1xf32> -> vector<256x1xf32>
    %49 = tpu.iota {dimensions = array<i32: 1>} : vector<256x2xi32>
    %c0_i32 = arith.constant 0 : i32
    %50 = vector.broadcast %c0_i32 : i32 to vector<256x2xi32>
    %51 = arith.cmpi eq, %49, %50 : vector<256x2xi32>
    %cst_32 = arith.constant 1.000000e+00 : f32
    %52 = vector.broadcast %cst_32 : f32 to vector<256x1xf32>
    %53 = arith.subf %52, %48 : vector<256x1xf32>
    %54 = vector.shape_cast %53 : vector<256x1xf32> to vector<256x1xf32>
    %55 = vector.broadcast %54 : vector<256x1xf32> to vector<256x2xf32>
    %56 = vector.shape_cast %48 : vector<256x1xf32> to vector<256x1xf32>
    %57 = vector.broadcast %56 : vector<256x1xf32> to vector<256x2xf32>
    %58 = arith.select %51, %55, %57 : vector<256x2xi1>, vector<256x2xf32>
    %c0_33 = arith.constant 0 : index
    %c0_34 = arith.constant 0 : index
    %59 = vector.load %arg12[%c0_33, %c0_34] : memref<256x2xf32, #tpu.memory_space<vmem>>, vector<256x2xf32>
    tpu.vector_store %arg12[%c0_33, %c0_34], %58 {strides = array<i32>} : memref<256x2xf32, #tpu.memory_space<vmem>>, vector<256x2xf32>,
    return
  }
  func.func @transform_0(%arg0: i32) -> (i32, i32) {
    %c0_i32 = arith.constant 0 : i32
    %c0_i32_0 = arith.constant 0 : i32
    return %arg0, %c0_i32 : i32, i32
  }
  func.func @transform_1(%arg0: i32) -> (i32, i32) {
    %c0_i32 = arith.constant 0 : i32
    %c0_i32_0 = arith.constant 0 : i32
    %c0_i32_1 = arith.constant 0 : i32
    return %c0_i32, %c0_i32_0 : i32, i32
  }
  func.func @transform_2(%arg0: i32) -> (i32, i32) {
    %c0_i32 = arith.constant 0 : i32
    %c0_i32_0 = arith.constant 0 : i32
    %c0_i32_1 = arith.constant 0 : i32
    return %c0_i32, %c0_i32_0 : i32, i32
  }
  func.func @transform_3(%arg0: i32) -> (i32, i32) {
    %c0_i32 = arith.constant 0 : i32
    %c0_i32_0 = arith.constant 0 : i32
    %c0_i32_1 = arith.constant 0 : i32
    return %c0_i32, %c0_i32_0 : i32, i32
  }
  func.func @transform_4(%arg0: i32) -> (i32, i32) {
    %c0_i32 = arith.constant 0 : i32
    %c0_i32_0 = arith.constant 0 : i32
    %c0_i32_1 = arith.constant 0 : i32
    return %c0_i32, %c0_i32_0 : i32, i32
  }
  func.func @transform_5(%arg0: i32) -> (i32, i32) {
    %c0_i32 = arith.constant 0 : i32
    %c0_i32_0 = arith.constant 0 : i32
    %c0_i32_1 = arith.constant 0 : i32
    return %c0_i32, %c0_i32_0 : i32, i32
  }
  func.func @transform_6(%arg0: i32) -> (i32, i32) {
    %c0_i32 = arith.constant 0 : i32
    %c0_i32_0 = arith.constant 0 : i32
    %c0_i32_1 = arith.constant 0 : i32
    return %c0_i32, %c0_i32_0 : i32, i32
  }
  func.func @transform_7(%arg0: i32) -> (i32, i32) {
    %c0_i32 = arith.constant 0 : i32
    %c0_i32_0 = arith.constant 0 : i32
    %c0_i32_1 = arith.constant 0 : i32
    return %c0_i32, %c0_i32_0 : i32, i32
  }
  func.func @transform_8(%arg0: i32) -> (i32, i32) {
    %c0_i32 = arith.constant 0 : i32
    %c0_i32_0 = arith.constant 0 : i32
    %c0_i32_1 = arith.constant 0 : i32
    return %c0_i32, %c0_i32_0 : i32, i32
  }
  func.func @transform_9(%arg0: i32) -> (i32, i32) {
    %c0_i32 = arith.constant 0 : i32
    %c0_i32_0 = arith.constant 0 : i32
    %c0_i32_1 = arith.constant 0 : i32
    return %c0_i32, %c0_i32_0 : i32, i32
  }
  func.func @transform_10(%arg0: i32) -> (i32, i32) {
    %c0_i32 = arith.constant 0 : i32
    %c0_i32_0 = arith.constant 0 : i32
    %c0_i32_1 = arith.constant 0 : i32
    return %c0_i32, %c0_i32_0 : i32, i32
  }
  func.func @transform_11(%arg0: i32) -> (i32, i32) {
    %c0_i32 = arith.constant 0 : i32
    %c0_i32_0 = arith.constant 0 : i32
    return %arg0, %c0_i32 : i32, i32
  }
}

</mosaic_0001>

<bundles_post_ra>
// kernel: tpu_custom_call.1
= control target key start
LH: loop header
LB: loop body
LE: loop exit
PB: predicated region body
PF: predicated region fallthrough
CT: control target
= control target key end

     0   :  { %s6685_s0 = inlined_call_operand.hbm [shape: bf16[512,1024], index: 0, kind: input, shape index: {}]   ;;  %s6686_s1 = inlined_call_operand.hbm [shape: bf16[1024,128], index: 1, kind: input, shape index: {}]   ;;  %s6687_s2 = inlined_call_operand.vmem [shape: f32[1,128], index: 2, kind: input, shape index: {}]   ;;  %s6688_s3 = inlined_call_operand.vmem [shape: bf16[128,64], index: 3, kind: input, shape index: {}]   ;;  %s6689_s4 = inlined_call_operand.vmem [shape: f32[1,64], index: 4, kind: input, shape index: {}]   ;;  %s6690_s5 = inlined_call_operand.vmem [shape: bf16[64,32], index: 5, kind: input, shape index: {}]   ;;  %s6691_s6 = inlined_call_operand.vmem [shape: f32[1,32], index: 6, kind: input, shape index: {}]   ;;  %s6692_s7 = inlined_call_operand.vmem [shape: bf16[32,16], index: 7, kind: input, shape index: {}]   ;;  %s6693_s8 = inlined_call_operand.vmem [shape: f32[1,16], index: 8, kind: input, shape index: {}]   ;;  %s6694_s9 = inlined_call_operand.vmem [shape: bf16[16,2], index: 9, kind: input, shape index: {}]   ;;  %s6695_s10 = inlined_call_operand.vmem [shape: f32[1,2], index: 10, kind: input, shape index: {}]   ;;  %s6696_s11 = inlined_call_operand.vmem [shape: f32[512,2], index: 11, kind: output, shape index: {}]  }
   0x1   :  { %6704 = sst [smem:[#allocation9_spill]] %s6695_s10 }
   0x2   :  { %6705 = sst [smem:[#allocation10_spill]] %s6696_s11 }
   0x3   :  { %16 = vsyncpa [#allocation3], 0 }
   0x4   :  { %18 = vsyncpa [#allocation3 + $0x1], 0 }
   0x5   :  { %19 = vsyncpa [#allocation5], 0  ;;  %s5759_s17 = smov 0   ;;  %s5761_s18 = smov 0  }
   0x6   :  { %s5763_s19 = smov 0   ;;  %s5765_s20 = smov 0  }
   0x7 LB: > { %s6697_s21 = sadd.s32 4294967295, %s5689_s20   ;;  %p45_p0 = scmp.ne.s32.totalorder %s5681_s18, %s5677_s17  ;;  %s5689_s20 = sphi %s5765_s20, %s6718_s20   ;;  %s5685_s19 = sphi %s5763_s19, %s6722_s19   ;;  %s5681_s18 = sphi %s5761_s18, %s6721_s18   ;;  %s5677_s17 = sphi %s5759_s17, %s6720_s17  }
   0x8   : > { %p5781_p1 = scmp.eq.s32.totalorder %s6697_s21, 0  ;;  %p4339_p2 = scmp.ge.s32.totalorder %s5689_s20, 1 }
   0x9   : > { %p292_p3 = scmp.lt.s32.totalorder %s5689_s20, 3  ;;  %s5691_s25 = smov [#allocation4]  }
   0xa   : > { %s6706_s22 = scalar_select %p5781_p1, 1, 0 }
   0xb   : > { %p5789_p4 = por %p5781_p1, %p45_p0  ;;  %p5793_p5 = pnand %p4339_p2, %p292_p3 }
   0xc   : > { %s304_s26 = sshll.u32 %s5691_s25, 4  ;;  %s5806_s28 = sadd.s32 1, %s5689_s20   ;;  %s305_s26 = int_to_ptr.vmem [resolvable:$true] %s304_s26 }
   0xd   : > { %s6707_s23 = scalar_select %p5789_p4, 1, 0 }
   0xe   : > { %s6708_s24 = scalar_select %p5793_p5, 1, 0 }
   0xf   : > { %p5338_p6 = pneg %p5793_p5  ;;  %6710 = sst [smem:[#allocation8_spill]] %s5806_s28 }
  0x10   : > { %s32_s29 = sadd.s32 1, %s5685_s19  ;;  %s29_s30 = ssub.s32 %s5689_s20, %s5806_s28 }
  0x11   : > { %p5801_p7 = pnand %p5338_p6, %p5781_p1  ;;  %s5608_s12 = scalar_lea.vmem %s305_s26, 8192 }
  0x12   : > { %p5609_p9 = scmp.ne.s32.totalorder %s305_s26, %s5608_s12  ;;  %p5616_p12 = scmp.lt.s32.totalorder %s305_s26, %s305_s26 }
  0x13   : > { %p5599_p8 = pneg %p5801_p7  ;;  %p5617_p13 = scmp.lt.s32.totalorder %s5608_s12, %s5608_s12 }
  0x15   : > { %p5611_p10 = pnand %p5609_p9, %p5599_p8  ;;  %p5618_p0 = por %p5617_p13, %p5616_p12 }
  0x17   : > { %p5612_p11 = pneg %p5611_p10 }
  0x19   : > { %p5619_p2 = pnand %p5618_p0, %p5612_p11 }
  0x1b   : > { %5622 = shalt.err (!%p5619_p2)
}
  0x1c   : > { %s5692_s13 = smov 64   ;;  %s5693_s14 = smov 4  }
  0x1d   : > { %5341 = dma.hbm_to_vmem [thread:$0]  (!%p5801_p7), %s6686_s1, 8192, %s305_s26, [#allocation5], %s5692_s13, %s5692_s13, %s5693_s14  }
  0x1e   : > { %p30_p3 = scmp.eq.s32.totalorder %s29_s30, 0  ;;  %p39_p6 = scmp.ne.s32.totalorder %s5685_s19, %s5681_s18 }
  0x1f   : > { %p40_p8 = scmp.eq.s32.totalorder %s5689_s20, 0  ;;  %p5347_p9 = scmp.lt.s32.totalorder %s5689_s20, 2 }
  0x20   : > { %s5823_s17 = scalar_select %p30_p3, %s5685_s19, %s32_s29  }
  0x21   : > { %p41_p10 = por %p40_p8, %p39_p6  ;;  %s345_s25 = sand.u32 1, %s5685_s19  }
  0x22   : > { %s4342_s12 = sshll.u32 %s345_s25, 10  ;;  %s4646_s21 = sshll.u32 %s5689_s20, 14 }
  0x23   : > { %s5830_s10 = scalar_lea.hbm %s6685_s0, %s4646_s21  ;;  %s349_s27 = scalar_lea.vmem [#allocation2], %s4342_s12 }
  0x24   : > { %s357_s26 = sshll.u32 %s349_s27, 4  ;;  %p5834_p7 = pnand %p5347_p9, %p41_p10  ;;  %s5832_s26 = int_to_ptr.vmem [resolvable:$true] %s357_s26 }
  0x25   : > { %s5838_s29 = scalar_lea.sflag [#allocation3], %s345_s25  ;;  %s5623_s13 = scalar_lea.hbm %s5830_s10, 16384 }
  0x26   : > { %p5624_p11 = scmp.ne.s32.totalorder %s5830_s10, %s5623_s13  ;;  %p5625_p12 = pneg %p5834_p7 }
  0x27   : > { %s5628_s28 = scalar_lea.hbm %s6685_s0, 32768  ;;  %p5629_p2 = scmp.lt.s32.totalorder %s5830_s10, %s6685_s0 }
  0x28   : > { %p5626_p13 = pnand %p5625_p12, %p5624_p11  ;;  %p5630_p3 = scmp.lt.s32.totalorder %s5628_s28, %s5623_s13 }
  0x2a   : > { %p5627_p0 = pneg %p5626_p13  ;;  %p5631_p6 = por %p5630_p3, %p5629_p2 }
  0x2c   : > { %p5632_p8 = pnand %p5631_p6, %p5627_p0 }
  0x2e   : > { %5635 = shalt.err (!%p5632_p8)
}
  0x2f   : > { %s5636_s16 = scalar_lea.vmem %s5832_s26, 16384  ;;  %s5694_s25 = smov [#allocation2]  }
  0x30   : > { %p5637_p9 = scmp.ne.s32.totalorder %s5832_s26, %s5636_s16  ;;  %s5641_s12 = sshll.u32 %s5694_s25, 4  ;;  %s5642_s12 = int_to_ptr.vmem [resolvable:$false] %s5641_s12 }
  0x31   : > { %s5643_s27 = scalar_lea.vmem %s5642_s12, 32768  ;;  %p5644_p13 = scmp.lt.s32.totalorder %s5832_s26, %s5642_s12 }
  0x32   : > { %p5639_p10 = pnand %p5637_p9, %p5625_p12  ;;  %p5645_p1 = scmp.lt.s32.totalorder %s5643_s27, %s5636_s16 }
  0x34   : > { %p5640_p11 = pneg %p5639_p10  ;;  %p5646_p4 = por %p5645_p1, %p5644_p13 }
  0x36   : > { %p5647_p5 = pnand %p5646_p4, %p5640_p11 }
  0x38   : > { %5650 = shalt.err (!%p5647_p5)
}
  0x39   : > { %s5695_s13 = smov 512   ;;  %s5696_s11 = smov 32  }
  0x3a   : > { %5345 = dma.hbm_to_vmem [thread:$0]  (!%p5834_p7), %s5830_s10, 16384, %s5832_s26, %s5838_s29, %s5695_s13, %s5695_s13, %s5696_s11  }
  0x3b   : > { %p6712_p12 = scmp.ne.s32.totalorder %s6708_s24, 0 }
  0x3c   : > { %s371_s21 = sand.u32 (!%p6712_p12), 1, %s5681_s18   ;;  %p6713_p1 = scmp.ne.s32.totalorder (!%p6712_p12), %s6707_s23, 0 }
  0x3d   : > { %369 = sbr.rel (%p6712_p12) target bundleno = 1670 (0x686), region = 64  ;;  %s4347_s28 = sshll.u32 (!%p6712_p12), %s371_s21, 10 }
  0x3e   : > { %s372_s14 = scalar_lea.sflag (!%p6712_p12), [#allocation3], %s371_s21  ;;  %s5862_s15 = scalar_lea.vmem (!%p6712_p12), [#allocation2], %s4347_s28 }
  0x42   : > { %5668 = dma.done.wait (%p6713_p1), %s372_s14, 16384  }
  0x43   : > { %5670 = vsyncadd (%p6713_p1), %s372_s14, 4294950912  ;;  %p6714_p4 = scmp.ne.s32.totalorder %s6706_s22, 0 }
  0x45   : > { %5672 = dma.done.wait (%p6714_p4), [#allocation5], 8192  }
  0x46   : > { %5674 = vsyncadd (%p6714_p4), [#allocation5], 4294959104  ;;  %v5390_v0 = vld [vmem:[#allocation4 + $0x78] sm:$0xff]   ;;  %v5394_v4 = vld [vmem:[#allocation4 + $0x70] sm:$0xff]   ;;  %vm2724_vm0 = vcmask 523264   ;;  %vm3005_vm1 = vcmask 261120  }
  0x47   : > { %v5391_v1 = vld [vmem:[#allocation4 + $0xf8] sm:$0xff]   ;;  %4647 = vmatprep.subr.bf16.mxu0 %v5390_v0  ;;  %v5395_v5 = vld [vmem:[#allocation4 + $0xf0] sm:$0xff]   ;;  %v5398_v8 = vld [vmem:[#allocation4 + $0x68] sm:$0xff]   ;;  %vm3278_vm2 = vcmask 130048   ;;  %s6715_s29 = sld [smem:[#allocation9_spill]]  ;;  %s5697_s16 = smov 127  }
  0x48   : > { %v5392_v2 = vld [vmem:[#allocation4 + $0x38] sm:$0xff]   ;;  %4759 = vmatprep.subr.bf16.mxu1 %v5391_v1  ;;  %v5396_v6 = vld [vmem:[#allocation4 + $0x30] sm:$0xff]   ;;  %v5399_v9 = vld [vmem:[#allocation4 + $0xe8] sm:$0xff]   ;;  %s6716_s25 = sadd.s32 4294967295, %s5689_s20   ;;  %s6717_s11 = sld [smem:[#allocation10_spill]]  ;;  %vm4227_vm4 = vcmask 15360  }
  0x49   : > { %v5393_v3 = vld [vmem:[#allocation4 + $0xb8] sm:$0xff]   ;;  %4648 = vmatpush3.bf16.msra.mxu0 %v5392_v2  ;;  %v5397_v7 = vld [vmem:[#allocation4 + $0xb0] sm:$0xff]   ;;  %v5400_v10 = vld [vmem:[#allocation4 + $0x28] sm:$0xff]   ;;  %s4349_s12 = sshll.u32 %s6716_s25, 5 }
  0x4a   : > { %4760 = vmatpush3.bf16.msra.mxu1 %v5393_v3  ;;  %4649 = vmatprep.subr.bf16.mxu0 %v5394_v4  ;;  %v5401_v11 = vld [vmem:[#allocation4 + $0xa8] sm:$0xff]   ;;  %v5402_v12 = vld [vmem:[#allocation4 + $0x60] sm:$0xff]   ;;  %v5406_v16 = vld [vmem:[#allocation4 + $0x58] sm:$0xff]   ;;  %p420_p5 = scmp.lt.s32.totalorder %s4349_s12, 63 }
  0x4b   : > { %4761 = vmatprep.subr.bf16.mxu1 %v5395_v5  ;;  %v5403_v13 = vld [vmem:[#allocation4 + $0xe0] sm:$0xff]   ;;  %v5407_v17 = vld [vmem:[#allocation4 + $0xd8] sm:$0xff]   ;;  %v5410_v20 = vld [vmem:[#allocation4 + $0x50] sm:$0xff]  }
  0x4c   : > { %v5404_v14 = vld [vmem:[#allocation4 + $0x20] sm:$0xff]   ;;  %v5408_v18 = vld [vmem:[#allocation4 + $0x18] sm:$0xff]   ;;  %v5411_v21 = vld [vmem:[#allocation4 + $0xd0] sm:$0xff]   ;;  %s6724_s12 = smov (!%p420_p5, %s4349_s12), 63 }
  0x4d   : > { %4650 = vmatpush3.bf16.msra.mxu0 %v5396_v6  ;;  %v5405_v15 = vld [vmem:[#allocation4 + $0xa0] sm:$0xff]   ;;  %v5409_v19 = vld [vmem:[#allocation4 + $0x98] sm:$0xff]   ;;  %v5412_v22 = vld [vmem:[#allocation4 + $0x10] sm:$0xff]   ;;  %s4350_s20 = sshll.u32 %s6724_s12, 3 }
  0x4e   : > { %4762 = vmatpush3.bf16.msra.mxu1 %v5397_v7  ;;  %4651 = vmatprep.subr.bf16.mxu0 %v5398_v8  ;;  %v5413_v23 = vld [vmem:[#allocation4 + $0x90] sm:$0xff]   ;;  %v5414_v24 = vld [vmem:[#allocation4 + $0x48] sm:$0xff]   ;;  %v5418_v28 = vld [vmem:[#allocation4 + $0x40] sm:$0xff]   ;;  %s6542_s21 = scalar_lea.vmem %s6717_s11, %s4350_s20 }
  0x4f   : > { %4763 = vmatprep.subr.bf16.mxu1 %v5399_v9  ;;  %v5415_v25 = vld [vmem:[#allocation4 + $0xc8] sm:$0xff]   ;;  %v5419_v29 = vld [vmem:[#allocation4 + $0xc0] sm:$0xff]   ;;  %v5422_v40 = vld [vmem:[#allocation4 + $0x178] sm:$0xff]  }
  0x50   : > { %v5416_v26 = vld [vmem:[#allocation4 + $0x8] sm:$0xff]   ;;  %v5420_v30 = vld [vmem:[#allocation4] sm:$0xff]   ;;  %v5423_v41 = vld [vmem:[#allocation4 + $0x138] sm:$0xff]  }
  0x51   : > { %4652 = vmatpush3.bf16.msra.mxu0 %v5400_v10  ;;  %v5417_v27 = vld [vmem:[#allocation4 + $0x88] sm:$0xff]   ;;  %v5421_v31 = vld [vmem:[#allocation4 + $0x80] sm:$0xff]   ;;  %v5424_v42 = vld [vmem:[#allocation4 + $0x1f8] sm:$0xff]  }
  0x52   : > { %4764 = vmatpush3.bf16.msra.mxu1 %v5401_v11  ;;  %4653 = vmatprep.subr.bf16.mxu0 %v5402_v12  ;;  %v426_v32 = vld [vmem:[%s5862_s15] sm:$0xff]  ;;  %v427_v34 = vld [vmem:[%s5862_s15 + $0x8] sm:$0xff]  ;;  %v5425_v43 = vld [vmem:[#allocation4 + $0x1b8] sm:$0xff]  }
  0x53   : > { %4765 = vmatprep.subr.bf16.mxu1 %v5403_v13  ;;  %v430_v33 = vld [vmem:[%s5862_s15 + $0x20] sm:$0xff]  ;;  %v431_v37 = vld [vmem:[%s5862_s15 + $0x28] sm:$0xff]  ;;  %v5426_v55 = vld [vmem:[#allocation4 + $0x170] sm:$0xff]  }
  0x54   : > { %v4352_v35 = vcombine.low %v426_v32, %v430_v33  ;;  %v4353_v36 = vcombine.high %v426_v32, %v430_v33  ;;  %v4354_v38 = vcombine.low %v427_v34, %v431_v37  ;;  %v4355_v39 = vcombine.high %v427_v34, %v431_v37  ;;  %v434_v44 = vld [vmem:[%s5862_s15 + $0x40] sm:$0xff]  ;;  %v435_v47 = vld [vmem:[%s5862_s15 + $0x48] sm:$0xff]  ;;  %v5427_v58 = vld [vmem:[#allocation4 + $0x130] sm:$0xff]  }
  0x55   : > { %4654 = vmatpush3.bf16.msra.mxu0 %v5404_v14  ;;  %v438_v45 = vld [vmem:[%s5862_s15 + $0x60] sm:$0xff]  ;;  %v439_v48 = vld [vmem:[%s5862_s15 + $0x68] sm:$0xff]  ;;  %v5428_v60 = vld [vmem:[#allocation4 + $0x1f0] sm:$0xff]  }
  0x56   : > { %4766 = vmatpush3.bf16.msra.mxu1 %v5405_v15  ;;  %4655 = vmatprep.subr.bf16.mxu0 %v5406_v16  ;;  %v4361_v46 = vcombine.high %v434_v44, %v438_v45  ;;  %v442_v49 = vld [vmem:[%s5862_s15 + $0x80] sm:$0xff]  ;;  %v4363_v50 = vcombine.high %v435_v47, %v439_v48  ;;  %v443_v52 = vld [vmem:[%s5862_s15 + $0x88] sm:$0xff]  ;;  %v4360_v54 = vcombine.low %v434_v44, %v438_v45  ;;  %v5429_v61 = vld [vmem:[#allocation4 + $0x1b0] sm:$0xff]  }
  0x57   : > { %4767 = vmatprep.subr.bf16.mxu1 %v5407_v17  ;;  %1745 = vmatprep.mubr.bf16.mxu0 %v4353_v36  ;;  %v446_v51 = vld [vmem:[%s5862_s15 + $0xa0] sm:$0xff]  ;;  %v447_v53 = vld [vmem:[%s5862_s15 + $0xa8] sm:$0xff]  ;;  %v4362_v56 = vcombine.low %v435_v47, %v439_v48  ;;  %v5442_v34 = vld [vmem:[#allocation4 + $0x150] sm:$0xff]  }
  0x58   : > { %1906 = vmatprep.mubr.bf16.mxu1 %v4355_v39  ;;  %v4369_v57 = vcombine.high %v442_v49, %v446_v51  ;;  %v4371_v59 = vcombine.high %v443_v52, %v447_v53  ;;  %v450_v62 = vld [vmem:[%s5862_s15 + $0xc0] sm:$0xff]  ;;  %v451_v0 = vld [vmem:[%s5862_s15 + $0xc8] sm:$0xff]  ;;  %v4368_v3 = vcombine.low %v442_v49, %v446_v51  ;;  %v4370_v5 = vcombine.low %v443_v52, %v447_v53  ;;  %v5443_v36 = vld [vmem:[#allocation4 + $0x110] sm:$0xff]  }
  0x59   : > { %4656 = vmatpush3.bf16.msra.mxu0 %v5408_v18  ;;  %v454_v63 = vld [vmem:[%s5862_s15 + $0xe0] sm:$0xff]  ;;  %v455_v1 = vld [vmem:[%s5862_s15 + $0xe8] sm:$0xff]  ;;  %v5444_v37 = vld [vmem:[#allocation4 + $0x1d0] sm:$0xff]  }
  0x5a   : > { %4768 = vmatpush3.bf16.msra.mxu1 %v5409_v19  ;;  %4657 = vmatprep.subr.bf16.mxu0 %v5410_v20  ;;  %v5430_v2 = vld [vmem:[#allocation4 + $0x168] sm:$0xff]   ;;  %v4377_v6 = vcombine.high %v450_v62, %v454_v63  ;;  %v4379_v8 = vcombine.high %v451_v0, %v455_v1  ;;  %v458_v10 = vld [vmem:[%s5862_s15 + $0x100] sm:$0xff]  ;;  %v4376_v16 = vcombine.low %v450_v62, %v454_v63  ;;  %v5445_v39 = vld [vmem:[#allocation4 + $0x190] sm:$0xff]  }
  0x5b   : > { %4769 = vmatprep.subr.bf16.mxu1 %v5411_v21  ;;  %v5431_v4 = vld [vmem:[#allocation4 + $0x128] sm:$0xff]   ;;  %v462_v11 = vld [vmem:[%s5862_s15 + $0x120] sm:$0xff]  ;;  %v4378_v18 = vcombine.low %v451_v0, %v455_v1 }
  0x5c   : > { %v5432_v7 = vld [vmem:[#allocation4 + $0x1e8] sm:$0xff]   ;;  %v5434_v14 = vld [vmem:[#allocation4 + $0x160] sm:$0xff]   ;;  %v4385_v19 = vcombine.high %v458_v10, %v462_v11 }
  0x5d   : > { %4658 = vmatpush3.bf16.msra.mxu0 %v5412_v22  ;;  %v5433_v9 = vld [vmem:[#allocation4 + $0x1a8] sm:$0xff]   ;;  %v5435_v15 = vld [vmem:[#allocation4 + $0x120] sm:$0xff]  }
  0x5e   : > { %4770 = vmatpush3.bf16.msra.mxu1 %v5413_v23  ;;  %4659 = vmatprep.subr.bf16.mxu0 %v5414_v24  ;;  %v459_v12 = vld [vmem:[%s5862_s15 + $0x108] sm:$0xff]  ;;  %v5436_v17 = vld [vmem:[#allocation4 + $0x1e0] sm:$0xff]   ;;  %v5438_v24 = vld [vmem:[#allocation4 + $0x158] sm:$0xff]  }
  0x5f   : > { %4771 = vmatprep.subr.bf16.mxu1 %v5415_v25  ;;  %v463_v13 = vld [vmem:[%s5862_s15 + $0x128] sm:$0xff]  ;;  %v5437_v20 = vld [vmem:[#allocation4 + $0x1a0] sm:$0xff]  }
  0x60   : > { %v4387_v21 = vcombine.high %v459_v12, %v463_v13  ;;  %v466_v22 = vld [vmem:[%s5862_s15 + $0x140] sm:$0xff]  ;;  %v467_v25 = vld [vmem:[%s5862_s15 + $0x148] sm:$0xff] }
  0x61   : > { %4660 = vmatpush3.bf16.msra.mxu0 %v5416_v26  ;;  %v470_v23 = vld [vmem:[%s5862_s15 + $0x160] sm:$0xff]  ;;  %v471_v26 = vld [vmem:[%s5862_s15 + $0x168] sm:$0xff] }
  0x62   : > { %4772 = vmatpush3.bf16.msra.mxu1 %v5417_v27  ;;  %4661 = vmatprep.subr.bf16.mxu0 %v5418_v28  ;;  %v5439_v27 = vld [vmem:[#allocation4 + $0x118] sm:$0xff]   ;;  %v4393_v32 = vcombine.high %v466_v22, %v470_v23  ;;  %v4395_v33 = vcombine.high %v467_v25, %v471_v26  ;;  %v5447_v47 = vld [vmem:[#allocation4 + $0x108] sm:$0xff]   ;;  %v486_v51 = vld [vmem:[%s5862_s15 + $0x1e0] sm:$0xff] }
  0x63   : > { %4773 = vmatprep.subr.bf16.mxu1 %v5419_v29  ;;  %v5440_v28 = vld [vmem:[#allocation4 + $0x1d8] sm:$0xff]   ;;  %v5448_v48 = vld [vmem:[#allocation4 + $0x1c8] sm:$0xff]   ;;  %v490_v62 = vld [vmem:[%s5862_s15 + $0x200] sm:$0xff] }
  0x64   : > { %v5441_v29 = vld [vmem:[#allocation4 + $0x198] sm:$0xff]   ;;  %v5449_v49 = vld [vmem:[#allocation4 + $0x188] sm:$0xff]   ;;  %v494_v63 = vld [vmem:[%s5862_s15 + $0x220] sm:$0xff] }
  0x65   : > { %4662 = vmatpush3.bf16.msra.mxu0 %v5420_v30  ;;  %v4384_v30 = vcombine.low %v458_v10, %v462_v11  ;;  %v483_v52 = vld [vmem:[%s5862_s15 + $0x1c8] sm:$0xff]  ;;  %v4416_v10 = vcombine.low %v490_v62, %v494_v63 }
  0x66   : > { %4774 = vmatpush3.bf16.msra.mxu1 %v5421_v31  ;;  %4871 = vmatprep.subr.bf16.mxu0 %v5422_v40  ;;  %v4386_v31 = vcombine.low %v459_v12, %v463_v13  ;;  %v475_v40 = vld [vmem:[%s5862_s15 + $0x188] sm:$0xff] }
  0x67   : > { %4983 = vmatprep.subr.bf16.mxu1 %v5424_v42  ;;  %v4392_v42 = vcombine.low %v466_v22, %v470_v23  ;;  %v487_v53 = vld [vmem:[%s5862_s15 + $0x1e8] sm:$0xff]  ;;  %v514_v22 = vld [vmem:[%s5862_s15 + $0x2c0] sm:$0xff] }
  0x68   : > { %1746 = vmatmul.mubr.bf16.vlgmr.msra.gmra.mxu0 %v4352_v35  ;;  %v474_v35 = vld [vmem:[%s5862_s15 + $0x180] sm:$0xff]  ;;  %v491_v0 = vld [vmem:[%s5862_s15 + $0x208] sm:$0xff] }
  0x69   : > { %1907 = vmatmul.mubr.bf16.vlgmr.msra.gmra.mxu1 %v4354_v38  ;;  %4872 = vmatpush3.bf16.msra.mxu0 %v5423_v41  ;;  %v478_v38 = vld [vmem:[%s5862_s15 + $0x1a0] sm:$0xff]  ;;  %v479_v41 = vld [vmem:[%s5862_s15 + $0x1a8] sm:$0xff] }
  0x6a   : > { %4984 = vmatpush3.bf16.msra.mxu1 %v5425_v43  ;;  %1753 = vmatprep.mubr.bf16.mxu0 %v4361_v46  ;;  %v4394_v43 = vcombine.low %v467_v25, %v471_v26  ;;  %v4401_v44 = vcombine.high %v474_v35, %v478_v38  ;;  %v4403_v45 = vcombine.high %v475_v40, %v479_v41  ;;  %v5446_v46 = vld [vmem:[#allocation4 + $0x148] sm:$0xff]   ;;  %v518_v23 = vld [vmem:[%s5862_s15 + $0x2e0] sm:$0xff] }
  0x6b   : > { %1914 = vmatprep.mubr.bf16.mxu1 %v4363_v50  ;;  %4873 = vmatprep.subr.bf16.mxu0 %v5426_v55  ;;  %v482_v50 = vld [vmem:[%s5862_s15 + $0x1c0] sm:$0xff]  ;;  %v495_v1 = vld [vmem:[%s5862_s15 + $0x228] sm:$0xff] }
  0x6c   : > { %4985 = vmatprep.subr.bf16.mxu1 %v5428_v60  ;;  %v5450_v55 = vld [vmem:[#allocation4 + $0x140] sm:$0xff]   ;;  %v4418_v11 = vcombine.low %v491_v0, %v495_v1  ;;  %v519_v25 = vld [vmem:[%s5862_s15 + $0x2e8] sm:$0xff] }
  0x6d   : > { %4874 = vmatpush3.bf16.msra.mxu0 %v5427_v58  ;;  %v5451_v58 = vld [vmem:[#allocation4 + $0x100] sm:$0xff]  }
  0x6e   : > { %4986 = vmatpush3.bf16.msra.mxu1 %v5429_v61  ;;  %4875 = vmatprep.subr.bf16.mxu0 %v5430_v2  ;;  %v5452_v60 = vld [vmem:[#allocation4 + $0x1c0] sm:$0xff]   ;;  %v4408_v2 = vcombine.low %v482_v50, %v486_v51 }
  0x6f   : > { %4987 = vmatprep.subr.bf16.mxu1 %v5432_v7  ;;  %v5453_v61 = vld [vmem:[#allocation4 + $0x180] sm:$0xff]  }
  0x70   : > { %1754 = vmatmul.mubr.bf16.gmra.mxu0 %v4360_v54  ;;  %v4400_v54 = vcombine.low %v474_v35, %v478_v38  ;;  %v502_v7 = vld [vmem:[%s5862_s15 + $0x260] sm:$0xff] }
  0x71   : > { %1915 = vmatmul.mubr.bf16.gmra.mxu1 %v4362_v56  ;;  %1761 = vmatprep.mubr.bf16.mxu0 %v4369_v57  ;;  %v4402_v56 = vcombine.low %v475_v40, %v479_v41  ;;  %v4409_v57 = vcombine.high %v482_v50, %v486_v51  ;;  %v530_v38 = vld [vmem:[%s5862_s15 + $0x340] sm:$0xff]  ;;  %v531_v40 = vld [vmem:[%s5862_s15 + $0x348] sm:$0xff] }
  0x72   : > { %1922 = vmatprep.mubr.bf16.mxu1 %v4371_v59  ;;  %4876 = vmatpush3.bf16.msra.mxu0 %v5431_v4  ;;  %v4411_v59 = vcombine.high %v483_v52, %v487_v53  ;;  %v4417_v4 = vcombine.high %v490_v62, %v494_v63  ;;  %v535_v41 = vld [vmem:[%s5862_s15 + $0x368] sm:$0xff]  ;;  %v428_v63 = vld [vmem:[%s5862_s15 + $0x10] sm:$0xff] }
  0x73   : > { %4988 = vmatpush3.bf16.msra.mxu1 %v5433_v9  ;;  %4877 = vmatprep.subr.bf16.mxu0 %v5434_v14  ;;  %v503_v9 = vld [vmem:[%s5862_s15 + $0x268] sm:$0xff]  ;;  %v506_v14 = vld [vmem:[%s5862_s15 + $0x280] sm:$0xff] }
  0x74   : > { %4989 = vmatprep.subr.bf16.mxu1 %v5436_v17  ;;  %v511_v17 = vld [vmem:[%s5862_s15 + $0x2a8] sm:$0xff] }
  0x75   : > { %v543_v50 = vld [vmem:[%s5862_s15 + $0x3a8] sm:$0xff] }
  0x76   : > { %4878 = vmatpush3.bf16.msra.mxu0 %v5435_v15  ;;  %v510_v15 = vld [vmem:[%s5862_s15 + $0x2a0] sm:$0xff] }
  0x77   : > { %4990 = vmatpush3.bf16.msra.mxu1 %v5437_v20  ;;  %4879 = vmatprep.subr.bf16.mxu0 %v5438_v24  ;;  %v4433_v20 = vcombine.high %v506_v14, %v510_v15  ;;  %v515_v24 = vld [vmem:[%s5862_s15 + $0x2c8] sm:$0xff]  ;;  %v4432_v26 = vcombine.low %v506_v14, %v510_v15  ;;  %v5455_v15 = vld [vmem:[%s6688_s3 + $0x30] sm:$0xff]  }
  0x78   : > { %1762 = vmatmul.mubr.bf16.gmra.mxu0 %v4368_v3  ;;  %4991 = vmatprep.subr.bf16.mxu1 %v5440_v28  ;;  %v4410_v3 = vcombine.low %v483_v52, %v487_v53  ;;  %v4441_v28 = vcombine.high %v514_v22, %v518_v23  ;;  %v4442_v35 = vcombine.low %v515_v24, %v519_v25 }
  0x79   : > { %1923 = vmatmul.mubr.bf16.gmra.mxu1 %v4370_v5  ;;  %1769 = vmatprep.mubr.bf16.mxu0 %v4377_v6  ;;  %v4419_v5 = vcombine.high %v491_v0, %v495_v1  ;;  %v498_v6 = vld [vmem:[%s5862_s15 + $0x240] sm:$0xff]  ;;  %v4458_v52 = vcombine.low %v531_v40, %v535_v41  ;;  %v432_v0 = vld [vmem:[%s5862_s15 + $0x30] sm:$0xff]  ;;  %v429_v1 = vld [vmem:[%s5862_s15 + $0x18] sm:$0xff] }
  0x7a   : > { %1930 = vmatprep.mubr.bf16.mxu1 %v4379_v8  ;;  %4880 = vmatpush3.bf16.msra.mxu0 %v5439_v27  ;;  %v499_v8 = vld [vmem:[%s5862_s15 + $0x248] sm:$0xff]  ;;  %v4425_v12 = vcombine.high %v498_v6, %v502_v7 }
  0x7b   : > { %4992 = vmatpush3.bf16.msra.mxu1 %v5441_v29  ;;  %4881 = vmatprep.subr.bf16.mxu0 %v5442_v34  ;;  %v4427_v13 = vcombine.high %v499_v8, %v503_v9  ;;  %v4443_v29 = vcombine.high %v515_v24, %v519_v25  ;;  %v4440_v34 = vcombine.low %v514_v22, %v518_v23  ;;  %v452_v25 = vld [vmem:[%s5862_s15 + $0xd0] sm:$0xff] }
  0x7c   : > { %4993 = vmatprep.subr.bf16.mxu1 %v5444_v37 }
  0x7e   : > { %4882 = vmatpush3.bf16.msra.mxu0 %v5443_v36 }
  0x7f   : > { %4994 = vmatpush3.bf16.msra.mxu1 %v5445_v39  ;;  %4883 = vmatprep.subr.bf16.mxu0 %v5446_v46  ;;  %v534_v39 = vld [vmem:[%s5862_s15 + $0x360] sm:$0xff]  ;;  %v5454_v46 = vld [vmem:[%s6688_s3 + $0x38] sm:$0xff]  }
  0x80   : > { %1770 = vmatmul.mubr.bf16.gmra.mxu0 %v4376_v16  ;;  %4995 = vmatprep.subr.bf16.mxu1 %v5448_v48  ;;  %v507_v16 = vld [vmem:[%s5862_s15 + $0x288] sm:$0xff]  ;;  %v542_v48 = vld [vmem:[%s5862_s15 + $0x3a0] sm:$0xff]  ;;  %v4456_v51 = vcombine.low %v530_v38, %v534_v39 }
  0x81   : > { %1931 = vmatmul.mubr.bf16.gmra.mxu1 %v4378_v18  ;;  %1777 = vmatprep.mubr.bf16.mxu0 %v4385_v19  ;;  %v4424_v18 = vcombine.low %v498_v6, %v502_v7  ;;  %v4426_v19 = vcombine.low %v499_v8, %v503_v9  ;;  %v4434_v27 = vcombine.low %v507_v16, %v511_v17  ;;  %v436_v7 = vld [vmem:[%s5862_s15 + $0x50] sm:$0xff]  ;;  %v437_v9 = vld [vmem:[%s5862_s15 + $0x58] sm:$0xff] }
  0x82   : > { %1938 = vmatprep.mubr.bf16.mxu1 %v4387_v21  ;;  %4884 = vmatpush3.bf16.msra.mxu0 %v5447_v47  ;;  %v4435_v21 = vcombine.high %v507_v16, %v511_v17  ;;  %v538_v47 = vld [vmem:[%s5862_s15 + $0x380] sm:$0xff]  ;;  %v440_v8 = vld [vmem:[%s5862_s15 + $0x70] sm:$0xff] }
  0x83   : > { %4996 = vmatpush3.bf16.msra.mxu1 %v5449_v49  ;;  %4885 = vmatprep.subr.bf16.mxu0 %v5450_v55  ;;  %v539_v49 = vld [vmem:[%s5862_s15 + $0x388] sm:$0xff]  ;;  %v4465_v53 = vcombine.high %v538_v47, %v542_v48  ;;  %v546_v55 = vld [vmem:[%s5862_s15 + $0x3c0] sm:$0xff]  ;;  %v444_v16 = vld [vmem:[%s5862_s15 + $0x90] sm:$0xff] }
  0x84   : > { %4997 = vmatprep.subr.bf16.mxu1 %v5452_v60  ;;  %v4466_v60 = vcombine.low %v539_v49, %v543_v50  ;;  %v448_v17 = vld [vmem:[%s5862_s15 + $0xb0] sm:$0xff] }
  0x85   : > { %v4373_v23 = vcombine.high %v444_v16, %v448_v17 }
  0x86   : > { %4886 = vmatpush3.bf16.msra.mxu0 %v5451_v58  ;;  %v551_v58 = vld [vmem:[%s5862_s15 + $0x3e8] sm:$0xff] }
  0x87   : > { %4998 = vmatpush3.bf16.msra.mxu1 %v5453_v61  ;;  %5174 = vmatprep.subr.bf16.mxu0 %v5454_v46 }
  0x88   : > { %1778 = vmatmul.mubr.bf16.gmra.mxu0 %v4384_v30  ;;  %v522_v30 = vld [vmem:[%s5862_s15 + $0x300] sm:$0xff] }
  0x89   : > { %1939 = vmatmul.mubr.bf16.gmra.mxu1 %v4386_v31  ;;  %1785 = vmatprep.mubr.bf16.mxu0 %v4393_v32  ;;  %v526_v31 = vld [vmem:[%s5862_s15 + $0x320] sm:$0xff]  ;;  %v523_v32 = vld [vmem:[%s5862_s15 + $0x308] sm:$0xff] }
  0x8a   : > { %1946 = vmatprep.mubr.bf16.mxu1 %v4395_v33  ;;  %v527_v33 = vld [vmem:[%s5862_s15 + $0x328] sm:$0xff]  ;;  %v4449_v36 = vcombine.high %v522_v30, %v526_v31 }
  0x8b   : > { %v4451_v37 = vcombine.high %v523_v32, %v527_v33 }
  0x90   : > { %1786 = vmatmul.mubr.bf16.gmra.mxu0 %v4392_v42  ;;  %v4448_v42 = vcombine.low %v522_v30, %v526_v31 }
  0x91   : > { %1947 = vmatmul.mubr.bf16.gmra.mxu1 %v4394_v43  ;;  %1793 = vmatprep.mubr.bf16.mxu0 %v4401_v44  ;;  %v4450_v43 = vcombine.low %v523_v32, %v527_v33  ;;  %v4457_v44 = vcombine.high %v530_v38, %v534_v39  ;;  %v5457_v33 = vld [vmem:[%s6688_s3 + $0x20] sm:$0xff]  }
  0x92   : > { %1954 = vmatprep.mubr.bf16.mxu1 %v4403_v45  ;;  %v4459_v45 = vcombine.high %v531_v40, %v535_v41 }
  0x98   : > { %1794 = vmatmul.mubr.bf16.gmra.mxu0 %v4400_v54  ;;  %v4467_v54 = vcombine.high %v539_v49, %v543_v50  ;;  %v5458_v50 = vld [vmem:[%s6688_s3 + $0x18] sm:$0xff]  }
  0x99   : > { %1955 = vmatmul.mubr.bf16.gmra.mxu1 %v4402_v56  ;;  %1801 = vmatprep.mubr.bf16.mxu0 %v4409_v57  ;;  %v550_v56 = vld [vmem:[%s5862_s15 + $0x3e0] sm:$0xff]  ;;  %v547_v57 = vld [vmem:[%s5862_s15 + $0x3c8] sm:$0xff] }
  0x9a   : > { %1962 = vmatprep.mubr.bf16.mxu1 %v4411_v59  ;;  %v4464_v59 = vcombine.low %v538_v47, %v542_v48  ;;  %v4473_v61 = vcombine.high %v546_v55, %v550_v56  ;;  %v4475_v62 = vcombine.high %v547_v57, %v551_v58 }
  0xa0   : > { %1802 = vmatmul.mubr.bf16.gmra.mxu0 %v4408_v2  ;;  %v433_v2 = vld [vmem:[%s5862_s15 + $0x38] sm:$0xff] }
  0xa1   : > { %1963 = vmatmul.mubr.bf16.gmra.mxu1 %v4410_v3  ;;  %1809 = vmatprep.mubr.bf16.mxu0 %v4417_v4  ;;  %v4472_v3 = vcombine.low %v546_v55, %v550_v56  ;;  %v4474_v4 = vcombine.low %v547_v57, %v551_v58  ;;  %v4359_v6 = vcombine.high %v429_v1, %v433_v2 }
  0xa2   : > { %1970 = vmatprep.mubr.bf16.mxu1 %v4419_v5  ;;  %v4357_v5 = vcombine.high %v428_v63, %v432_v0 }
  0xa8   : > { %1810 = vmatmul.mubr.bf16.gmra.mxu0 %v4416_v10  ;;  %v441_v10 = vld [vmem:[%s5862_s15 + $0x78] sm:$0xff] }
  0xa9   : > { %1971 = vmatmul.mubr.bf16.gmra.mxu1 %v4418_v11  ;;  %1817 = vmatprep.mubr.bf16.mxu0 %v4425_v12  ;;  %v4356_v11 = vcombine.low %v428_v63, %v432_v0  ;;  %v4358_v12 = vcombine.low %v429_v1, %v433_v2  ;;  %v4367_v14 = vcombine.high %v437_v9, %v441_v10 }
  0xaa   : > { %1978 = vmatprep.mubr.bf16.mxu1 %v4427_v13  ;;  %v4365_v13 = vcombine.high %v436_v7, %v440_v8  ;;  %v4366_v22 = vcombine.low %v437_v9, %v441_v10 }
  0xb0   : > { %1818 = vmatmul.mubr.bf16.gmra.mxu0 %v4424_v18  ;;  %v445_v18 = vld [vmem:[%s5862_s15 + $0x98] sm:$0xff] }
  0xb1   : > { %1979 = vmatmul.mubr.bf16.gmra.mxu1 %v4426_v19  ;;  %1825 = vmatprep.mubr.bf16.mxu0 %v4433_v20  ;;  %v449_v19 = vld [vmem:[%s5862_s15 + $0xb8] sm:$0xff]  ;;  %v5456_v20 = vld [vmem:[%s6688_s3 + $0x28] sm:$0xff]  }
  0xb2   : > { %1986 = vmatprep.mubr.bf16.mxu1 %v4435_v21  ;;  %v4364_v21 = vcombine.low %v436_v7, %v440_v8  ;;  %v4375_v24 = vcombine.high %v445_v18, %v449_v19  ;;  %v4374_v30 = vcombine.low %v445_v18, %v449_v19  ;;  %v497_v7 = vld [vmem:[%s5862_s15 + $0x238] sm:$0xff] }
  0xb8   : > { %1826 = vmatmul.mubr.bf16.gmra.mxu0 %v4432_v26  ;;  %v456_v26 = vld [vmem:[%s5862_s15 + $0xf0] sm:$0xff] }
  0xb9   : > { %1987 = vmatmul.mubr.bf16.gmra.mxu1 %v4434_v27  ;;  %1833 = vmatprep.mubr.bf16.mxu0 %v4441_v28  ;;  %v453_v27 = vld [vmem:[%s5862_s15 + $0xd8] sm:$0xff]  ;;  %v4381_v31 = vcombine.high %v452_v25, %v456_v26  ;;  %v4380_v38 = vcombine.low %v452_v25, %v456_v26  ;;  %v508_v25 = vld [vmem:[%s5862_s15 + $0x290] sm:$0xff] }
  0xba   : > { %1994 = vmatprep.mubr.bf16.mxu1 %v4443_v29  ;;  %v457_v28 = vld [vmem:[%s5862_s15 + $0xf8] sm:$0xff]  ;;  %v4372_v29 = vcombine.low %v444_v16, %v448_v17  ;;  %v512_v26 = vld [vmem:[%s5862_s15 + $0x2b0] sm:$0xff] }
  0xbb   : > { %v4383_v32 = vcombine.high %v453_v27, %v457_v28  ;;  %v4382_v39 = vcombine.low %v453_v27, %v457_v28 }
  0xc0   : > { %1834 = vmatmul.mubr.bf16.gmra.mxu0 %v4440_v34  ;;  %v460_v34 = vld [vmem:[%s5862_s15 + $0x110] sm:$0xff] }
  0xc1   : > { %1995 = vmatmul.mubr.bf16.gmra.mxu1 %v4442_v35  ;;  %1841 = vmatprep.mubr.bf16.mxu0 %v4449_v36  ;;  %v464_v35 = vld [vmem:[%s5862_s15 + $0x130] sm:$0xff]  ;;  %v461_v36 = vld [vmem:[%s5862_s15 + $0x118] sm:$0xff] }
  0xc2   : > { %2002 = vmatprep.mubr.bf16.mxu1 %v4451_v37  ;;  %v465_v37 = vld [vmem:[%s5862_s15 + $0x138] sm:$0xff]  ;;  %v4389_v40 = vcombine.high %v460_v34, %v464_v35 }
  0xc3   : > { %v4391_v41 = vcombine.high %v461_v36, %v465_v37  ;;  %v4390_v47 = vcombine.low %v461_v36, %v465_v37  ;;  %v4437_v37 = vcombine.high %v508_v25, %v512_v26 }
  0xc8   : > { %1842 = vmatmul.mubr.bf16.gmra.mxu0 %v4448_v42  ;;  %v468_v42 = vld [vmem:[%s5862_s15 + $0x150] sm:$0xff] }
  0xc9   : > { %2003 = vmatmul.mubr.bf16.gmra.mxu1 %v4450_v43  ;;  %1849 = vmatprep.mubr.bf16.mxu0 %v4457_v44  ;;  %v472_v43 = vld [vmem:[%s5862_s15 + $0x170] sm:$0xff]  ;;  %v469_v44 = vld [vmem:[%s5862_s15 + $0x158] sm:$0xff] }
  0xca   : > { %2010 = vmatprep.mubr.bf16.mxu1 %v4459_v45  ;;  %v473_v45 = vld [vmem:[%s5862_s15 + $0x178] sm:$0xff]  ;;  %v4397_v48 = vcombine.high %v468_v42, %v472_v43  ;;  %v4396_v55 = vcombine.low %v468_v42, %v472_v43 }
  0xcb   : > { %v4399_v49 = vcombine.high %v469_v44, %v473_v45  ;;  %v4398_v56 = vcombine.low %v469_v44, %v473_v45 }
  0xd0   : > { %1850 = vmatmul.mubr.bf16.gmra.mxu0 %v4456_v51  ;;  %v476_v51 = vld [vmem:[%s5862_s15 + $0x190] sm:$0xff] }
  0xd1   : > { %2011 = vmatmul.mubr.bf16.gmra.mxu1 %v4458_v52  ;;  %1857 = vmatprep.mubr.bf16.mxu0 %v4465_v53  ;;  %v480_v52 = vld [vmem:[%s5862_s15 + $0x1b0] sm:$0xff]  ;;  %v477_v53 = vld [vmem:[%s5862_s15 + $0x198] sm:$0xff] }
  0xd2   : > { %2018 = vmatprep.mubr.bf16.mxu1 %v4467_v54  ;;  %v481_v54 = vld [vmem:[%s5862_s15 + $0x1b8] sm:$0xff]  ;;  %v4405_v57 = vcombine.high %v476_v51, %v480_v52  ;;  %v4404_v63 = vcombine.low %v476_v51, %v480_v52 }
  0xd3   : > { %v4407_v58 = vcombine.high %v477_v53, %v481_v54  ;;  %v4406_v0 = vcombine.low %v477_v53, %v481_v54  ;;  %v517_v53 = vld [vmem:[%s5862_s15 + $0x2d8] sm:$0xff] }
  0xd4   : > { %v521_v54 = vld [vmem:[%s5862_s15 + $0x2f8] sm:$0xff] }
  0xd8   : > { %1858 = vmatmul.mubr.bf16.gmra.mxu0 %v4464_v59  ;;  %v484_v59 = vld [vmem:[%s5862_s15 + $0x1d0] sm:$0xff] }
  0xd9   : > { %2019 = vmatmul.mubr.bf16.gmra.mxu1 %v4466_v60  ;;  %1865 = vmatprep.mubr.bf16.mxu0 %v4473_v61  ;;  %v488_v60 = vld [vmem:[%s5862_s15 + $0x1f0] sm:$0xff]  ;;  %v485_v61 = vld [vmem:[%s5862_s15 + $0x1d8] sm:$0xff] }
  0xda   : > { %2026 = vmatprep.mubr.bf16.mxu1 %v4475_v62  ;;  %v489_v62 = vld [vmem:[%s5862_s15 + $0x1f8] sm:$0xff]  ;;  %v4413_v1 = vcombine.high %v484_v59, %v488_v60  ;;  %v4412_v8 = vcombine.low %v484_v59, %v488_v60 }
  0xdb   : > { %v4415_v2 = vcombine.high %v485_v61, %v489_v62  ;;  %v4414_v9 = vcombine.low %v485_v61, %v489_v62 }
  0xe0   : > { %1866 = vmatmul.mubr.bf16.gmra.mxu0 %v4472_v3  ;;  %v5459_v3 = vld [vmem:[%s6688_s3 + $0x10] sm:$0xff]  }
  0xe1   : > { %2027 = vmatmul.mubr.bf16.gmra.mxu1 %v4474_v4  ;;  %2067 = vmatprep.mubr.bf16.mxu0 %v4357_v5  ;;  %v492_v4 = vld [vmem:[%s5862_s15 + $0x210] sm:$0xff] }
  0xe2   : > { %2228 = vmatprep.mubr.bf16.mxu1 %v4359_v6  ;;  %v496_v5 = vld [vmem:[%s5862_s15 + $0x230] sm:$0xff]  ;;  %v493_v6 = vld [vmem:[%s5862_s15 + $0x218] sm:$0xff] }
  0xe3   : > { %v4421_v10 = vcombine.high %v492_v4, %v496_v5  ;;  %v4420_v16 = vcombine.low %v492_v4, %v496_v5  ;;  %v4422_v17 = vcombine.low %v493_v6, %v497_v7 }
  0xe8   : > { %2068 = vmatmul.mubr.bf16.vlgmr.msra.gmra.mxu0 %v4356_v11  ;;  %v4423_v11 = vcombine.high %v493_v6, %v497_v7  ;;  %v5461_v7 = vld [vmem:[%s6688_s3] sm:$0xff]  }
  0xe9   : > { %2229 = vmatmul.mubr.bf16.vlgmr.msra.gmra.mxu1 %v4358_v12  ;;  %2075 = vmatprep.mubr.bf16.mxu0 %v4365_v13  ;;  %v500_v12 = vld [vmem:[%s5862_s15 + $0x250] sm:$0xff] }
  0xea   : > { %2236 = vmatprep.mubr.bf16.mxu1 %v4367_v14  ;;  %5175 = vmatpush3.bf16.msra.mxu0 %v5454_v46  ;;  %v4388_v46 = vcombine.low %v460_v34, %v464_v35  ;;  %v504_v13 = vld [vmem:[%s5862_s15 + $0x270] sm:$0xff]  ;;  %v501_v14 = vld [vmem:[%s5862_s15 + $0x258] sm:$0xff] }
  0xeb   : > { %5176 = vmatprep.subr.bf16.mxu0 %v5455_v15  ;;  %v4429_v18 = vcombine.high %v500_v12, %v504_v13 }
  0xee   : > { %5177 = vmatpush3.bf16.msra.mxu0 %v5455_v15  ;;  %v505_v15 = vld [vmem:[%s5862_s15 + $0x278] sm:$0xff] }
  0xef   : > { %5178 = vmatprep.subr.bf16.mxu0 %v5456_v20  ;;  %v4431_v19 = vcombine.high %v501_v14, %v505_v15  ;;  %v4430_v36 = vcombine.low %v501_v14, %v505_v15  ;;  %v525_v14 = vld [vmem:[%s5862_s15 + $0x318] sm:$0xff] }
  0xf0   : > { %2076 = vmatmul.mubr.bf16.gmra.mxu0 %v4364_v21  ;;  %v529_v15 = vld [vmem:[%s5862_s15 + $0x338] sm:$0xff] }
  0xf1   : > { %2237 = vmatmul.mubr.bf16.gmra.mxu1 %v4366_v22  ;;  %2083 = vmatprep.mubr.bf16.mxu0 %v4373_v23  ;;  %v6000_v23 = vld [vmem:[%s6687_s2] ss:$0 sm:$0xff] }
  0xf2   : > { %2244 = vmatprep.mubr.bf16.mxu1 %v4375_v24  ;;  %5179 = vmatpush3.bf16.msra.mxu0 %v5456_v20  ;;  %v5460_v20 = vld [vmem:[%s6688_s3 + $0x8] sm:$0xff]  }
  0xf3   : > { %5180 = vmatprep.subr.bf16.mxu0 %v5457_v33 }
  0xf6   : > { %5181 = vmatpush3.bf16.msra.mxu0 %v5457_v33  ;;  %v4428_v33 = vcombine.low %v500_v12, %v504_v13 }
  0xf7   : > { %5182 = vmatprep.subr.bf16.mxu0 %v5458_v50 }
  0xf8   : > { %2084 = vmatmul.mubr.bf16.gmra.mxu0 %v4372_v29  ;;  %v509_v29 = vld [vmem:[%s5862_s15 + $0x298] sm:$0xff] }
  0xf9   : > { %2245 = vmatmul.mubr.bf16.gmra.mxu1 %v4374_v30  ;;  %2091 = vmatprep.mubr.bf16.mxu0 %v4381_v31  ;;  %v513_v30 = vld [vmem:[%s5862_s15 + $0x2b8] sm:$0xff] }
  0xfa   : > { %2252 = vmatprep.mubr.bf16.mxu1 %v4383_v32  ;;  %5183 = vmatpush3.bf16.msra.mxu0 %v5458_v50  ;;  %v4438_v60 = vcombine.low %v509_v29, %v513_v30 }
  0xfb   : > { %5184 = vmatprep.subr.bf16.mxu0 %v5459_v3 }
  0xfe   : > { %5185 = vmatpush3.bf16.msra.mxu0 %v5459_v3 }
  0xff   : > { %5186 = vmatprep.subr.bf16.mxu0 %v5460_v20 }
 0x100   : > { %2092 = vmatmul.mubr.bf16.gmra.mxu0 %v4380_v38 }
 0x101   : > { %2253 = vmatmul.mubr.bf16.gmra.mxu1 %v4382_v39  ;;  %2099 = vmatprep.mubr.bf16.mxu0 %v4389_v40  ;;  %v4439_v39 = vcombine.high %v509_v29, %v513_v30 }
 0x102   : > { %2260 = vmatprep.mubr.bf16.mxu1 %v4391_v41  ;;  %5187 = vmatpush3.bf16.msra.mxu0 %v5460_v20 }
 0x103   : > { %5188 = vmatprep.subr.bf16.mxu0 %v5461_v7 }
 0x106   : > { %5189 = vmatpush3.bf16.msra.mxu0 %v5461_v7 }
 0x108   : > { %2100 = vmatmul.mubr.bf16.gmra.mxu0 %v4388_v46 }
 0x109   : > { %2261 = vmatmul.mubr.bf16.gmra.mxu1 %v4390_v47  ;;  %2107 = vmatprep.mubr.bf16.mxu0 %v4397_v48  ;;  %v516_v48 = vld [vmem:[%s5862_s15 + $0x2d0] sm:$0xff] }
 0x10a   : > { %2268 = vmatprep.mubr.bf16.mxu1 %v4399_v49  ;;  %v520_v49 = vld [vmem:[%s5862_s15 + $0x2f0] sm:$0xff] }
 0x10b   : > { %v4445_v61 = vcombine.high %v516_v48, %v520_v49 }
 0x110   : > { %2108 = vmatmul.mubr.bf16.gmra.mxu0 %v4396_v55 }
 0x111   : > { %2269 = vmatmul.mubr.bf16.gmra.mxu1 %v4398_v56  ;;  %2115 = vmatprep.mubr.bf16.mxu0 %v4405_v57  ;;  %v4436_v57 = vcombine.low %v508_v25, %v512_v26  ;;  %v4455_v25 = vcombine.high %v525_v14, %v529_v15 }
 0x112   : > { %2276 = vmatprep.mubr.bf16.mxu1 %v4407_v58 }
 0x118   : > { %2116 = vmatmul.mubr.bf16.gmra.mxu0 %v4404_v63  ;;  %v4447_v63 = vcombine.high %v517_v53, %v521_v54 }
 0x119   : > { %2277 = vmatmul.mubr.bf16.gmra.mxu1 %v4406_v0  ;;  %2123 = vmatprep.mubr.bf16.mxu0 %v4413_v1 }
 0x11a   : > { %2284 = vmatprep.mubr.bf16.mxu1 %v4415_v2 }
 0x120   : > { %2124 = vmatmul.mubr.bf16.gmra.mxu0 %v4412_v8 }
 0x121   : > { %2285 = vmatmul.mubr.bf16.gmra.mxu1 %v4414_v9  ;;  %2131 = vmatprep.mubr.bf16.mxu0 %v4421_v10  ;;  %v524_v9 = vld [vmem:[%s5862_s15 + $0x310] sm:$0xff] }
 0x122   : > { %2292 = vmatprep.mubr.bf16.mxu1 %v4423_v11  ;;  %v528_v10 = vld [vmem:[%s5862_s15 + $0x330] sm:$0xff] }
 0x128   : > { %v4663_v21 = vpop.f32.mrf.mxu0  ;;  %2132 = vmatmul.mubr.bf16.gmra.mxu0 %v4420_v16 }
 0x129   : > { %v4775_v22 = vpop.f32.mrf.mxu1  ;;  %2293 = vmatmul.mubr.bf16.gmra.mxu1 %v4422_v17  ;;  %2139 = vmatprep.mubr.bf16.mxu0 %v4429_v18  ;;  %v4444_v18 = vcombine.low %v516_v48, %v520_v49 }
 0x12a   : > { %v4664_v24 = vpop.f32.mrf.mxu0  ;;  %2300 = vmatprep.mubr.bf16.mxu1 %v4431_v19 }
 0x12b   : > { %v4665_v27 = vadd.f32 %v4664_v24, %v4663_v21  ;;  %v4776_v28 = vpop.f32.mrf.mxu1  ;;  %v4446_v21 = vcombine.low %v517_v53, %v521_v54 }
 0x12c   : > { %v4777_v31 = vadd.f32 %v4776_v28, %v4775_v22  ;;  %v4666_v32 = vpop.f32.mrf.mxu0  ;;  %v4453_v22 = vcombine.high %v524_v9, %v528_v10 }
 0x12d   : > { %v1748_v34 = vadd.f32 %v4665_v27, %v6000_v23  ;;  %v4778_v35 = vpop.f32.mrf.mxu1 }
 0x12e   : > { %v4667_v38 = vpop.f32.mrf.mxu0 }
 0x12f   : > { %v6007_v40 = vadd.f32 %v4777_v31, %v1748_v34  ;;  %v4668_v41 = vadd.f32 %v4667_v38, %v4666_v32  ;;  %v4779_v42 = vpop.f32.mrf.mxu1  ;;  %v532_v34 = vld [vmem:[%s5862_s15 + $0x350] sm:$0xff] }
 0x130   : > { %v4780_v43 = vadd.f32 %v4779_v42, %v4778_v35  ;;  %v4669_v44 = vpop.f32.mrf.mxu0  ;;  %2140 = vmatmul.mubr.bf16.gmra.mxu0 %v4428_v33  ;;  %v536_v35 = vld [vmem:[%s5862_s15 + $0x370] sm:$0xff] }
 0x131   : > { %v1751_v45 = vadd.f32 %v4668_v41, %v6000_v23  ;;  %v4781_v46 = vpop.f32.mrf.mxu1  ;;  %2301 = vmatmul.mubr.bf16.gmra.mxu1 %v4430_v36  ;;  %2147 = vmatprep.mubr.bf16.mxu0 %v4437_v37  ;;  %v537_v41 = vld [vmem:[%s5862_s15 + $0x378] sm:$0xff]  ;;  %v4461_v48 = vcombine.high %v532_v34, %v536_v35 }
 0x132   : > { %v4670_v47 = vpop.f32.mrf.mxu0  ;;  %2308 = vmatprep.mubr.bf16.mxu1 %v4439_v39  ;;  %v533_v39 = vld [vmem:[%s5862_s15 + $0x358] sm:$0xff] }
 0x133   : > { %v6012_v50 = vadd.f32 %v4780_v43, %v1751_v45  ;;  %v4671_v51 = vadd.f32 %v4670_v47, %v4669_v44  ;;  %v4782_v52 = vpop.f32.mrf.mxu1  ;;  %v4452_v44 = vcombine.low %v524_v9, %v528_v10  ;;  %v4454_v47 = vcombine.low %v525_v14, %v529_v15 }
 0x134   : > { %v4783_v55 = vadd.f32 %v4782_v52, %v4781_v46  ;;  %v4672_v56 = vpop.f32.mrf.mxu0  ;;  %v4462_v9 = vcombine.low %v533_v39, %v537_v41 }
 0x135   : > { %v1756_v58 = vadd.f32 %v4671_v51, %v6000_v23  ;;  %v4784_v59 = vpop.f32.mrf.mxu1  ;;  %v4463_v51 = vcombine.high %v533_v39, %v537_v41 }
 0x136   : > { %v4673_v62 = vpop.f32.mrf.mxu0 }
 0x137   : > { %v6017_v0 = vadd.f32 %v4783_v55, %v1756_v58  ;;  %v4674_v1 = vadd.f32 %v4673_v62, %v4672_v56  ;;  %v4785_v2 = vpop.f32.mrf.mxu1 }
 0x138   : > { %v4786_v3 = vadd.f32 %v4785_v2, %v4784_v59  ;;  %v4675_v4 = vpop.f32.mrf.mxu0  ;;  %2148 = vmatmul.mubr.bf16.gmra.mxu0 %v4436_v57  ;;  %v541_v2 = vld [vmem:[%s5862_s15 + $0x398] sm:$0xff] }
 0x139   : > { %v1759_v5 = vadd.f32 %v4674_v1, %v6000_v23  ;;  %v4787_v6 = vpop.f32.mrf.mxu1  ;;  %2309 = vmatmul.mubr.bf16.gmra.mxu1 %v4438_v60  ;;  %2155 = vmatprep.mubr.bf16.mxu0 %v4445_v61  ;;  %v540_v60 = vld [vmem:[%s5862_s15 + $0x390] sm:$0xff] }
 0x13a   : > { %v4676_v8 = vpop.f32.mrf.mxu0  ;;  %2316 = vmatprep.mubr.bf16.mxu1 %v4447_v63  ;;  %v544_v61 = vld [vmem:[%s5862_s15 + $0x3b0] sm:$0xff] }
 0x13b   : > { %v6025_v11 = vadd.f32 %v4786_v3, %v1759_v5  ;;  %v4677_v12 = vadd.f32 %v4676_v8, %v4675_v4  ;;  %v4788_v13 = vpop.f32.mrf.mxu1  ;;  %v545_v3 = vld [vmem:[%s5862_s15 + $0x3b8] sm:$0xff]  ;;  %v4469_v10 = vcombine.high %v540_v60, %v544_v61 }
 0x13c   : > { %v4789_v16 = vadd.f32 %v4788_v13, %v4787_v6  ;;  %v4678_v17 = vpop.f32.mrf.mxu0  ;;  %v4460_v6 = vcombine.low %v532_v34, %v536_v35  ;;  %v4471_v13 = vcombine.high %v541_v2, %v545_v3 }
 0x13d   : > { %v1764_v19 = vadd.f32 %v4677_v12, %v6000_v23  ;;  %v4790_v20 = vpop.f32.mrf.mxu1 }
 0x13e   : > { %v4679_v24 = vpop.f32.mrf.mxu0 }
 0x13f   : > { %v6030_v26 = vadd.f32 %v4789_v16, %v1764_v19  ;;  %v4680_v27 = vadd.f32 %v4679_v24, %v4678_v17  ;;  %v4791_v28 = vpop.f32.mrf.mxu1  ;;  %v552_v24 = vld [vmem:[%s5862_s15 + $0x3f0] sm:$0xff] }
 0x140   : > { %v4792_v29 = vadd.f32 %v4791_v28, %v4790_v20  ;;  %v4681_v30 = vpop.f32.mrf.mxu0  ;;  %2156 = vmatmul.mubr.bf16.gmra.mxu0 %v4444_v18 }
 0x141   : > { %v1767_v31 = vadd.f32 %v4680_v27, %v6000_v23  ;;  %v4793_v32 = vpop.f32.mrf.mxu1  ;;  %2317 = vmatmul.mubr.bf16.gmra.mxu1 %v4446_v21  ;;  %2163 = vmatprep.mubr.bf16.mxu0 %v4453_v22  ;;  %v548_v22 = vld [vmem:[%s5862_s15 + $0x3d0] sm:$0xff] }
 0x142   : > { %v4682_v33 = vpop.f32.mrf.mxu0  ;;  %2324 = vmatprep.mubr.bf16.mxu1 %v4455_v25 }
 0x143   : > { %v6035_v36 = vadd.f32 %v4792_v29, %v1767_v31  ;;  %v4683_v37 = vadd.f32 %v4682_v33, %v4681_v30  ;;  %v4794_v38 = vpop.f32.mrf.mxu1  ;;  %v549_v29 = vld [vmem:[%s5862_s15 + $0x3d8] sm:$0xff]  ;;  %v4468_v33 = vcombine.low %v540_v60, %v544_v61 }
 0x144   : > { %v4795_v42 = vadd.f32 %v4794_v38, %v4793_v32  ;;  %v4684_v43 = vpop.f32.mrf.mxu0  ;;  %v553_v30 = vld [vmem:[%s5862_s15 + $0x3f8] sm:$0xff]  ;;  %v4477_v38 = vcombine.high %v548_v22, %v552_v24 }
 0x145   : > { %v1772_v45 = vadd.f32 %v4683_v37, %v6000_v23  ;;  %v4796_v46 = vpop.f32.mrf.mxu1  ;;  %v4470_v37 = vcombine.low %v541_v2, %v545_v3  ;;  %v4479_v41 = vcombine.high %v549_v29, %v553_v30  ;;  %v4478_v60 = vcombine.low %v549_v29, %v553_v30 }
 0x146   : > { %v4685_v49 = vpop.f32.mrf.mxu0 }
 0x147   : > { %v6040_v52 = vadd.f32 %v4795_v42, %v1772_v45  ;;  %v4686_v53 = vadd.f32 %v4685_v49, %v4684_v43  ;;  %v4797_v54 = vpop.f32.mrf.mxu1 }
 0x148   : > { %v4798_v55 = vadd.f32 %v4797_v54, %v4796_v46  ;;  %v4687_v56 = vpop.f32.mrf.mxu0  ;;  %2164 = vmatmul.mubr.bf16.gmra.mxu0 %v4452_v44 }
 0x149   : > { %v1775_v57 = vadd.f32 %v4686_v53, %v6000_v23  ;;  %v4799_v58 = vpop.f32.mrf.mxu1  ;;  %2325 = vmatmul.mubr.bf16.gmra.mxu1 %v4454_v47  ;;  %2171 = vmatprep.mubr.bf16.mxu0 %v4461_v48 }
 0x14a   : > { %v4688_v59 = vpop.f32.mrf.mxu0  ;;  %2332 = vmatprep.mubr.bf16.mxu1 %v4463_v51 }
 0x14b   : > { %v6045_v62 = vadd.f32 %v4798_v55, %v1775_v57  ;;  %v4689_v63 = vadd.f32 %v4688_v59, %v4687_v56  ;;  %v4800_v1 = vpop.f32.mrf.mxu1  ;;  %v4476_v57 = vcombine.low %v548_v22, %v552_v24 }
 0x14c   : > { %v4801_v4 = vadd.f32 %v4800_v1, %v4799_v58  ;;  %v4690_v5 = vpop.f32.mrf.mxu0 }
 0x14d   : > { %v1780_v7 = vadd.f32 %v4689_v63, %v6000_v23  ;;  %v4802_v8 = vpop.f32.mrf.mxu1 }
 0x14e   : > { %v4691_v12 = vpop.f32.mrf.mxu0 }
 0x14f   : > { %v6050_v14 = vadd.f32 %v4801_v4, %v1780_v7  ;;  %v4692_v15 = vadd.f32 %v4691_v12, %v4690_v5  ;;  %v4803_v16 = vpop.f32.mrf.mxu1 }
 0x150   : > { %v4693_v17 = vpop.f32.mrf.mxu0  ;;  %2172 = vmatmul.mubr.bf16.gmra.mxu0 %v4460_v6  ;;  %v4804_v19 = vadd.f32 %v4803_v16, %v4802_v8 }
 0x151   : > { %v1783_v18 = vadd.f32 %v4692_v15, %v6000_v23  ;;  %v4805_v20 = vpop.f32.mrf.mxu1  ;;  %2333 = vmatmul.mubr.bf16.gmra.mxu1 %v4462_v9  ;;  %2179 = vmatprep.mubr.bf16.mxu0 %v4469_v10 }
 0x152   : > { %v4694_v21 = vpop.f32.mrf.mxu0  ;;  %2340 = vmatprep.mubr.bf16.mxu1 %v4471_v13 }
 0x153   : > { %v6055_v25 = vadd.f32 %v4804_v19, %v1783_v18  ;;  %v4695_v27 = vadd.f32 %v4694_v21, %v4693_v17  ;;  %v4806_v28 = vpop.f32.mrf.mxu1 }
 0x154   : > { %v4807_v31 = vadd.f32 %v4806_v28, %v4805_v20  ;;  %v4696_v32 = vpop.f32.mrf.mxu0 }
 0x155   : > { %v1788_v34 = vadd.f32 %v4695_v27, %v6000_v23  ;;  %v4808_v35 = vpop.f32.mrf.mxu1 }
 0x156   : > { %v4697_v39 = vpop.f32.mrf.mxu0 }
 0x157   : > { %v6060_v42 = vadd.f32 %v4807_v31, %v1788_v34  ;;  %v4698_v43 = vadd.f32 %v4697_v39, %v4696_v32  ;;  %v4809_v44 = vpop.f32.mrf.mxu1 }
 0x158   : > { %v4699_v45 = vpop.f32.mrf.mxu0  ;;  %2180 = vmatmul.mubr.bf16.gmra.mxu0 %v4468_v33  ;;  %v4810_v47 = vadd.f32 %v4809_v44, %v4808_v35 }
 0x159   : > { %v1791_v46 = vadd.f32 %v4698_v43, %v6000_v23  ;;  %v4811_v48 = vpop.f32.mrf.mxu1  ;;  %2341 = vmatmul.mubr.bf16.gmra.mxu1 %v4470_v37  ;;  %2187 = vmatprep.mubr.bf16.mxu0 %v4477_v38 }
 0x15a   : > { %v4700_v49 = vpop.f32.mrf.mxu0  ;;  %2348 = vmatprep.mubr.bf16.mxu1 %v4479_v41 }
 0x15b   : > { %v6063_v51 = vadd.f32 %v4810_v47, %v1791_v46  ;;  %v4701_v53 = vadd.f32 %v4700_v49, %v4699_v45  ;;  %v4812_v54 = vpop.f32.mrf.mxu1 }
 0x15c   : > { %v4813_v55 = vadd.f32 %v4812_v54, %v4811_v48  ;;  %v4702_v56 = vpop.f32.mrf.mxu0 }
 0x15d   : > { %v1796_v58 = vadd.f32 %v4701_v53, %v6000_v23  ;;  %v4814_v59 = vpop.f32.mrf.mxu1 }
 0x15e   : > { %v4703_v61 = vpop.f32.mrf.mxu0 }
 0x15f   : > { %v6066_v63 = vadd.f32 %v4813_v55, %v1796_v58  ;;  %v4704_v1 = vadd.f32 %v4703_v61, %v4702_v56  ;;  %v4815_v2 = vpop.f32.mrf.mxu1 }
 0x160   : > { %v4705_v3 = vpop.f32.mrf.mxu0  ;;  %2188 = vmatmul.mubr.bf16.gmra.mxu0 %v4476_v57  ;;  %v4816_v5 = vadd.f32 %v4815_v2, %v4814_v59 }
 0x161   : > { %v1799_v4 = vadd.f32 %v4704_v1, %v6000_v23  ;;  %v4817_v6 = vpop.f32.mrf.mxu1  ;;  %2349 = vmatmul.mubr.bf16.gmra.mxu1 %v4478_v60 }
 0x162   : > { %v4706_v7 = vpop.f32.mrf.mxu0 }
 0x163   : > { %v6069_v8 = vadd.f32 %v4816_v5, %v1799_v4  ;;  %v4707_v9 = vadd.f32 %v4706_v7, %v4705_v3  ;;  %v4818_v10 = vpop.f32.mrf.mxu1 }
 0x164   : > { %v4819_v12 = vadd.f32 %v4818_v10, %v4817_v6  ;;  %v4708_v13 = vpop.f32.mrf.mxu0 }
 0x165   : > { %v1804_v15 = vadd.f32 %v4707_v9, %v6000_v23  ;;  %v4820_v16 = vpop.f32.mrf.mxu1 }
 0x166   : > { %v4709_v17 = vpop.f32.mrf.mxu0 }
 0x167   : > { %v6072_v18 = vadd.f32 %v4819_v12, %v1804_v15  ;;  %v4710_v19 = vadd.f32 %v4709_v17, %v4708_v13  ;;  %v4821_v20 = vpop.f32.mrf.mxu1 }
 0x168   : > { %v4711_v21 = vpop.f32.mrf.mxu0  ;;  %v4822_v24 = vadd.f32 %v4821_v20, %v4820_v16 }
 0x169   : > { %v1807_v22 = vadd.f32 %v4710_v19, %v6000_v23  ;;  %v4823_v27 = vpop.f32.mrf.mxu1 }
 0x16a   : > { %v4712_v28 = vpop.f32.mrf.mxu0 }
 0x16b   : > { %v6075_v29 = vadd.f32 %v4822_v24, %v1807_v22  ;;  %v4713_v30 = vadd.f32 %v4712_v28, %v4711_v21  ;;  %v4824_v31 = vpop.f32.mrf.mxu1 }
 0x16c   : > { %v4825_v32 = vadd.f32 %v4824_v31, %v4823_v27  ;;  %v4714_v33 = vpop.f32.mrf.mxu0 }
 0x16d   : > { %v1812_v34 = vadd.f32 %v4713_v30, %v6000_v23  ;;  %v4826_v35 = vpop.f32.mrf.mxu1 }
 0x16e   : > { %v4715_v37 = vpop.f32.mrf.mxu0 }
 0x16f   : > { %v6078_v38 = vadd.f32 %v4825_v32, %v1812_v34  ;;  %v4716_v39 = vadd.f32 %v4715_v37, %v4714_v33  ;;  %v4827_v41 = vpop.f32.mrf.mxu1 }
 0x170   : > { %v4717_v43 = vpop.f32.mrf.mxu0  ;;  %v4828_v45 = vadd.f32 %v4827_v41, %v4826_v35 }
 0x171   : > { %v1815_v44 = vadd.f32 %v4716_v39, %v6000_v23  ;;  %v4829_v46 = vpop.f32.mrf.mxu1 }
 0x172   : > { %v4718_v47 = vpop.f32.mrf.mxu0 }
 0x173   : > { %v6081_v48 = vadd.f32 %v4828_v45, %v1815_v44  ;;  %v4719_v49 = vadd.f32 %v4718_v47, %v4717_v43  ;;  %v4830_v53 = vpop.f32.mrf.mxu1 }
 0x174   : > { %v4831_v54 = vadd.f32 %v4830_v53, %v4829_v46  ;;  %v4720_v55 = vpop.f32.mrf.mxu0 }
 0x175   : > { %v1820_v56 = vadd.f32 %v4719_v49, %v6000_v23  ;;  %v4832_v57 = vpop.f32.mrf.mxu1 }
 0x176   : > { %v4721_v58 = vpop.f32.mrf.mxu0 }
 0x177   : > { %v6084_v59 = vadd.f32 %v4831_v54, %v1820_v56  ;;  %v4722_v60 = vadd.f32 %v4721_v58, %v4720_v55  ;;  %v4833_v61 = vpop.f32.mrf.mxu1 }
 0x178   : > { %v4723_v1 = vpop.f32.mrf.mxu0  ;;  %v4834_v3 = vadd.f32 %v4833_v61, %v4832_v57 }
 0x179   : > { %v1823_v2 = vadd.f32 %v4722_v60, %v6000_v23  ;;  %v4835_v4 = vpop.f32.mrf.mxu1 }
 0x17a   : > { %v4724_v5 = vpop.f32.mrf.mxu0 }
 0x17b   : > { %v6087_v6 = vadd.f32 %v4834_v3, %v1823_v2  ;;  %v4725_v7 = vadd.f32 %v4724_v5, %v4723_v1  ;;  %v4836_v9 = vpop.f32.mrf.mxu1 }
 0x17c   : > { %v4837_v10 = vadd.f32 %v4836_v9, %v4835_v4  ;;  %v4726_v12 = vpop.f32.mrf.mxu0 }
 0x17d   : > { %v1828_v13 = vadd.f32 %v4725_v7, %v6000_v23  ;;  %v4838_v15 = vpop.f32.mrf.mxu1 }
 0x17e   : > { %v4727_v16 = vpop.f32.mrf.mxu0 }
 0x17f   : > { %v6090_v17 = vadd.f32 %v4837_v10, %v1828_v13  ;;  %v4728_v19 = vadd.f32 %v4727_v16, %v4726_v12  ;;  %v4839_v20 = vpop.f32.mrf.mxu1 }
 0x180   : > { %v4729_v21 = vpop.f32.mrf.mxu0  ;;  %v4840_v24 = vadd.f32 %v4839_v20, %v4838_v15 }
 0x181   : > { %v1831_v22 = vadd.f32 %v4728_v19, %v6000_v23  ;;  %v4841_v27 = vpop.f32.mrf.mxu1 }
 0x182   : > { %v4730_v28 = vpop.f32.mrf.mxu0 }
 0x183   : > { %v6093_v30 = vadd.f32 %v4840_v24, %v1831_v22  ;;  %v4731_v31 = vadd.f32 %v4730_v28, %v4729_v21  ;;  %v4842_v32 = vpop.f32.mrf.mxu1  ;;  %v5462_v24 = vld [vmem:[%s6690_s5 + $0x18] sm:$0xff]  }
 0x184   : > { %v4843_v33 = vadd.f32 %v4842_v32, %v4841_v27  ;;  %v4732_v34 = vpop.f32.mrf.mxu0  ;;  %5222 = vmatprep.subr.bf16.mxu1 %v5462_v24 }
 0x185   : > { %v1836_v35 = vadd.f32 %v4731_v31, %v6000_v23  ;;  %v4844_v37 = vpop.f32.mrf.mxu1  ;;  %5223 = vmatpush3.bf16.msra.mxu1 %v5462_v24 }
 0x186   : > { %v4733_v39 = vpop.f32.mrf.mxu0 }
 0x187   : > { %v6096_v41 = vadd.f32 %v4843_v33, %v1836_v35  ;;  %v4734_v43 = vadd.f32 %v4733_v39, %v4732_v34  ;;  %v4845_v44 = vpop.f32.mrf.mxu1 }
 0x188   : > { %v4735_v45 = vpop.f32.mrf.mxu0  ;;  %v4846_v47 = vadd.f32 %v4845_v44, %v4844_v37 }
 0x189   : > { %v1839_v46 = vadd.f32 %v4734_v43, %v6000_v23  ;;  %v4847_v49 = vpop.f32.mrf.mxu1 }
 0x18a   : > { %v4736_v53 = vpop.f32.mrf.mxu0 }
 0x18b   : > { %v6099_v54 = vadd.f32 %v4846_v47, %v1839_v46  ;;  %v4737_v55 = vadd.f32 %v4736_v53, %v4735_v45  ;;  %v4848_v56 = vpop.f32.mrf.mxu1 }
 0x18c   : > { %v4849_v57 = vadd.f32 %v4848_v56, %v4847_v49  ;;  %v4738_v58 = vpop.f32.mrf.mxu0 }
 0x18d   : > { %v1844_v60 = vadd.f32 %v4737_v55, %v6000_v23  ;;  %v4850_v61 = vpop.f32.mrf.mxu1 }
 0x18e   : > { %v4739_v1 = vpop.f32.mrf.mxu0 }
 0x18f   : > { %v6102_v2 = vadd.f32 %v4849_v57, %v1844_v60  ;;  %v4740_v3 = vadd.f32 %v4739_v1, %v4738_v58  ;;  %v4851_v4 = vpop.f32.mrf.mxu1 }
 0x190   : > { %v4741_v5 = vpop.f32.mrf.mxu0  ;;  %v4852_v9 = vadd.f32 %v4851_v4, %v4850_v61 }
 0x191   : > { %v1847_v7 = vadd.f32 %v4740_v3, %v6000_v23  ;;  %v4853_v10 = vpop.f32.mrf.mxu1 }
 0x192   : > { %v4742_v12 = vpop.f32.mrf.mxu0 }
 0x193   : > { %v6105_v13 = vadd.f32 %v4852_v9, %v1847_v7  ;;  %v4743_v15 = vadd.f32 %v4742_v12, %v4741_v5  ;;  %v4854_v16 = vpop.f32.mrf.mxu1 }
 0x194   : > { %v4855_v19 = vadd.f32 %v4854_v16, %v4853_v10  ;;  %v4744_v20 = vpop.f32.mrf.mxu0 }
 0x195   : > { %v1852_v21 = vadd.f32 %v4743_v15, %v6000_v23  ;;  %v4856_v22 = vpop.f32.mrf.mxu1 }
 0x196   : > { %v4745_v27 = vpop.f32.mrf.mxu0 }
 0x197   : > { %v6111_v28 = vadd.f32 %v4855_v19, %v1852_v21  ;;  %v4746_v31 = vadd.f32 %v4745_v27, %v4744_v20  ;;  %v4857_v32 = vpop.f32.mrf.mxu1 }
 0x198   : > { %v4747_v33 = vpop.f32.mrf.mxu0  ;;  %v4858_v35 = vadd.f32 %v4857_v32, %v4856_v22 }
 0x199   : > { %v1855_v34 = vadd.f32 %v4746_v31, %v6000_v23  ;;  %v4859_v37 = vpop.f32.mrf.mxu1 }
 0x19a   : > { %v4748_v39 = vpop.f32.mrf.mxu0 }
 0x19b   : > { %v6114_v43 = vadd.f32 %v4858_v35, %v1855_v34  ;;  %v4749_v44 = vadd.f32 %v4748_v39, %v4747_v33  ;;  %v4860_v45 = vpop.f32.mrf.mxu1 }
 0x19c   : > { %v4861_v46 = vadd.f32 %v4860_v45, %v4859_v37  ;;  %v4750_v47 = vpop.f32.mrf.mxu0 }
 0x19d   : > { %v1860_v49 = vadd.f32 %v4749_v44, %v6000_v23  ;;  %v4862_v53 = vpop.f32.mrf.mxu1 }
 0x19e   : > { %v4751_v55 = vpop.f32.mrf.mxu0 }
 0x19f   : > { %v6117_v56 = vadd.f32 %v4861_v46, %v1860_v49  ;;  %v4752_v57 = vadd.f32 %v4751_v55, %v4750_v47  ;;  %v4863_v58 = vpop.f32.mrf.mxu1 }
 0x1a0   : > { %v4753_v60 = vpop.f32.mrf.mxu0  ;;  %v4864_v1 = vadd.f32 %v4863_v58, %v4862_v53 }
 0x1a1   : > { %v1863_v61 = vadd.f32 %v4752_v57, %v6000_v23  ;;  %v4865_v3 = vpop.f32.mrf.mxu1 }
 0x1a2   : > { %v4754_v4 = vpop.f32.mrf.mxu0 }
 0x1a3   : > { %v6120_v5 = vadd.f32 %v4864_v1, %v1863_v61  ;;  %v4755_v7 = vadd.f32 %v4754_v4, %v4753_v60  ;;  %v4866_v9 = vpop.f32.mrf.mxu1  ;;  %v5463_v61 = vld [vmem:[%s6690_s5 + $0x10] sm:$0xff]   ;;  %v5464_v1 = vld [vmem:[%s6690_s5 + $0x8] sm:$0xff]  }
 0x1a4   : > { %v4867_v10 = vadd.f32 %v4866_v9, %v4865_v3  ;;  %v4756_v12 = vpop.f32.mrf.mxu0  ;;  %5224 = vmatprep.subr.bf16.mxu1 %v5463_v61 }
 0x1a5   : > { %v1868_v15 = vadd.f32 %v4755_v7, %v6000_v23  ;;  %v4868_v16 = vpop.f32.mrf.mxu1  ;;  %5225 = vmatpush3.bf16.msra.mxu1 %v5463_v61 }
 0x1a6   : > { %v4757_v19 = vpop.f32.mrf.mxu0  ;;  %5226 = vmatprep.subr.bf16.mxu1 %v5464_v1 }
 0x1a7   : > { %v6123_v20 = vadd.f32 %v4867_v10, %v1868_v15  ;;  %v4758_v21 = vadd.f32 %v4757_v19, %v4756_v12  ;;  %v4869_v22 = vpop.f32.mrf.mxu1 }
 0x1a8   : > { %v4887_v24 = vpop.f32.mrf.mxu0  ;;  %v4870_v31 = vadd.f32 %v4869_v22, %v4868_v16  ;;  %v5465_v16 = vld [vmem:[%s6690_s5] sm:$0xff]  }
 0x1a9   : > { %v1871_v27 = vadd.f32 %v4758_v21, %v6000_v23  ;;  %v4999_v32 = vpop.f32.mrf.mxu1  ;;  %5227 = vmatpush3.bf16.msra.mxu1 %v5464_v1 }
 0x1aa   : > { %v4888_v33 = vpop.f32.mrf.mxu0  ;;  %5228 = vmatprep.subr.bf16.mxu1 %v5465_v16 }
 0x1ab   : > { %v6126_v34 = vadd.f32 %v4870_v31, %v1871_v27  ;;  %v4889_v35 = vadd.f32 %v4888_v33, %v4887_v24  ;;  %v5000_v37 = vpop.f32.mrf.mxu1 }
 0x1ac   : > { %v4890_v39 = vpop.f32.mrf.mxu0  ;;  %v5001_v47 = vadd.f32 %v5000_v37, %v4999_v32 }
 0x1ad   : > { %v2070_v44 = vadd.f32 %v4889_v35, %v6007_v40  ;;  %v5002_v45 = vpop.f32.mrf.mxu1  ;;  %5229 = vmatpush3.bf16.msra.mxu1 %v5465_v16 }
 0x1ae   : > { %v4891_v46 = vpop.f32.mrf.mxu0 }
 0x1af   : > { %v4892_v49 = vadd.f32 %v4891_v46, %v4890_v39  ;;  %v5003_v53 = vpop.f32.mrf.mxu1  ;;  %v2231_v57 = vadd.f32 %v5001_v47, %v2070_v44 }
 0x1b0   : > { %v4893_v55 = vpop.f32.mrf.mxu0  ;;  %v5004_v23 = vadd.f32 %v5003_v53, %v5002_v45 }
 0x1b1   : > { %v2073_v58 = vadd.f32 %v4892_v49, %v6012_v50  ;;  %v5005_v60 = vpop.f32.mrf.mxu1  ;;  %v2357_v10 = vmax.f32 %v2231_v57, 0.0 }
 0x1b2   : > { %v4894_v40 = vpop.f32.mrf.mxu0 }
 0x1b3   : > { %v2234_v3 = vadd.f32 %v5004_v23, %v2073_v58  ;;  %v4895_v4 = vadd.f32 %v4894_v40, %v4893_v55  ;;  %v5006_v7 = vpop.f32.mrf.mxu1 }
 0x1b4   : > { %v4896_v9 = vpop.f32.mrf.mxu0  ;;  %v5007_v21 = vadd.f32 %v5006_v7, %v5005_v60 }
 0x1b5   : > { %v2358_v12 = vmax.f32 %v2234_v3, 0.0  ;;  %v2078_v50 = vadd.f32 %v4895_v4, %v6017_v0  ;;  %v5008_v15 = vpop.f32.mrf.mxu1 }
 0x1b6   : > { %v4897_v19 = vpop.f32.mrf.mxu0 }
 0x1b7   : > { %v4898_v22 = vadd.f32 %v4897_v19, %v4896_v9  ;;  %v5009_v24 = vpop.f32.mrf.mxu1  ;;  %v2389_v27 = vpack.c.bf16 %v2358_v12, %v2357_v10  ;;  %v2239_v32 = vadd.f32 %v5007_v21, %v2078_v50 }
 0x1b8   : > { %v4899_v31 = vpop.f32.mrf.mxu0  ;;  %v5010_v35 = vadd.f32 %v5009_v24, %v5008_v15 }
 0x1b9   : > { %v2081_v33 = vadd.f32 %v4898_v22, %v6025_v11  ;;  %v5011_v37 = vpop.f32.mrf.mxu1  ;;  %5190 = vmatprep.mubr.bf16.mxu0 %v2389_v27  ;;  %v2359_v47 = vmax.f32 %v2239_v32, 0.0 }
 0x1ba   : > { %v4900_v0 = vpop.f32.mrf.mxu0 }
 0x1bb   : > { %v2242_v39 = vadd.f32 %v5010_v35, %v2081_v33  ;;  %v4901_v44 = vadd.f32 %v4900_v0, %v4899_v31  ;;  %v5012_v45 = vpop.f32.mrf.mxu1 }
 0x1bc   : > { %v4902_v46 = vpop.f32.mrf.mxu0  ;;  %v5013_v23 = vadd.f32 %v5012_v45, %v5011_v37 }
 0x1bd   : > { %v2360_v49 = vmax.f32 %v2242_v39, 0.0  ;;  %v2086_v53 = vadd.f32 %v4901_v44, %v6030_v26  ;;  %v5014_v55 = vpop.f32.mrf.mxu1 }
 0x1be   : > { %v4903_v57 = vpop.f32.mrf.mxu0 }
 0x1bf   : > { %v2390_v58 = vpack.c.bf16 %v2360_v49, %v2359_v47  ;;  %v4904_v60 = vadd.f32 %v4903_v57, %v4902_v46  ;;  %v5015_v11 = vpop.f32.mrf.mxu1  ;;  %v2247_v1 = vadd.f32 %v5013_v23, %v2086_v53 }
 0x1c0   : > { %v4905_v61 = vpop.f32.mrf.mxu0  ;;  %v5016_v3 = vadd.f32 %v5015_v11, %v5014_v55 }
 0x1c1   : > { %v2089_v40 = vadd.f32 %v4904_v60, %v6035_v36  ;;  %v5017_v4 = vpop.f32.mrf.mxu1  ;;  %5191 = vmatmul.mubr.bf16.vlgmr.msra.gmra.mxu0 %v2390_v58  ;;  %v2361_v15 = vmax.f32 %v2247_v1, 0.0 }
 0x1c2   : > { %v4906_v7 = vpop.f32.mrf.mxu0 }
 0x1c3   : > { %v2250_v9 = vadd.f32 %v5016_v3, %v2089_v40  ;;  %v4907_v10 = vadd.f32 %v4906_v7, %v4905_v61  ;;  %v5018_v12 = vpop.f32.mrf.mxu1 }
 0x1c4   : > { %v4908_v50 = vpop.f32.mrf.mxu0  ;;  %v5019_v22 = vadd.f32 %v5018_v12, %v5017_v4 }
 0x1c5   : > { %v2362_v26 = vmax.f32 %v2250_v9, 0.0  ;;  %v2094_v16 = vadd.f32 %v4907_v10, %v6040_v52  ;;  %v5020_v19 = vpop.f32.mrf.mxu1 }
 0x1c6   : > { %v4909_v21 = vpop.f32.mrf.mxu0 }
 0x1c7   : > { %v4910_v24 = vadd.f32 %v4909_v21, %v4908_v50  ;;  %v5021_v27 = vpop.f32.mrf.mxu1  ;;  %v2391_v31 = vpack.c.bf16 %v2362_v26, %v2361_v15  ;;  %v2255_v36 = vadd.f32 %v5019_v22, %v2094_v16 }
 0x1c8   : > { %v4911_v32 = vpop.f32.mrf.mxu0  ;;  %v5022_v35 = vadd.f32 %v5021_v27, %v5020_v19 }
 0x1c9   : > { %v2097_v33 = vadd.f32 %v4910_v24, %v6045_v62  ;;  %v5023_v37 = vpop.f32.mrf.mxu1  ;;  %5194 = vmatprep.mubr.bf16.mxu0 %v2391_v31  ;;  %v2363_v47 = vmax.f32 %v2255_v36, 0.0 }
 0x1ca   : > { %v4912_v0 = vpop.f32.mrf.mxu0 }
 0x1cb   : > { %v2258_v39 = vadd.f32 %v5022_v35, %v2097_v33  ;;  %v4913_v44 = vadd.f32 %v4912_v0, %v4911_v32  ;;  %v5024_v45 = vpop.f32.mrf.mxu1 }
 0x1cc   : > { %v4914_v46 = vpop.f32.mrf.mxu0  ;;  %v5025_v58 = vadd.f32 %v5024_v45, %v5023_v37 }
 0x1cd   : > { %v2364_v52 = vmax.f32 %v2258_v39, 0.0  ;;  %v2102_v49 = vadd.f32 %v4913_v44, %v6050_v14  ;;  %v5026_v53 = vpop.f32.mrf.mxu1 }
 0x1ce   : > { %v4915_v55 = vpop.f32.mrf.mxu0 }
 0x1cf   : > { %v2392_v57 = vpack.c.bf16 %v2364_v52, %v2363_v47  ;;  %v4916_v23 = vadd.f32 %v4915_v55, %v4914_v46  ;;  %v5027_v60 = vpop.f32.mrf.mxu1  ;;  %v2263_v62 = vadd.f32 %v5025_v58, %v2102_v49 }
 0x1d0   : > { %v4917_v11 = vpop.f32.mrf.mxu0  ;;  %v5028_v1 = vadd.f32 %v5027_v60, %v5026_v53 }
 0x1d1   : > { %v2105_v61 = vadd.f32 %v4916_v23, %v6055_v25  ;;  %v5029_v40 = vpop.f32.mrf.mxu1  ;;  %5195 = vmatmul.mubr.bf16.gmra.mxu0 %v2392_v57  ;;  %v2365_v12 = vmax.f32 %v2263_v62, 0.0 }
 0x1d2   : > { %v4918_v3 = vpop.f32.mrf.mxu0 }
 0x1d3   : > { %v2266_v4 = vadd.f32 %v5028_v1, %v2105_v61  ;;  %v4919_v7 = vadd.f32 %v4918_v3, %v4917_v11  ;;  %v5030_v9 = vpop.f32.mrf.mxu1 }
 0x1d4   : > { %v4920_v10 = vpop.f32.mrf.mxu0  ;;  %v5031_v16 = vadd.f32 %v5030_v9, %v5029_v40 }
 0x1d5   : > { %v2366_v14 = vmax.f32 %v2266_v4, 0.0  ;;  %v2110_v50 = vadd.f32 %v4919_v7, %v6060_v42  ;;  %v5032_v15 = vpop.f32.mrf.mxu1 }
 0x1d6   : > { %v4921_v26 = vpop.f32.mrf.mxu0 }
 0x1d7   : > { %v4922_v19 = vadd.f32 %v4921_v26, %v4920_v10  ;;  %v5033_v21 = vpop.f32.mrf.mxu1  ;;  %v2393_v22 = vpack.c.bf16 %v2366_v14, %v2365_v12  ;;  %v2271_v25 = vadd.f32 %v5031_v16, %v2110_v50 }
 0x1d8   : > { %v4923_v24 = vpop.f32.mrf.mxu0  ;;  %v5034_v31 = vadd.f32 %v5033_v21, %v5032_v15 }
 0x1d9   : > { %v2113_v27 = vadd.f32 %v4922_v19, %v6063_v51  ;;  %v5035_v32 = vpop.f32.mrf.mxu1  ;;  %5198 = vmatprep.mubr.bf16.mxu0 %v2393_v22  ;;  %v2367_v39 = vmax.f32 %v2271_v25, 0.0 }
 0x1da   : > { %v4924_v36 = vpop.f32.mrf.mxu0 }
 0x1db   : > { %v2274_v33 = vadd.f32 %v5034_v31, %v2113_v27  ;;  %v4925_v35 = vadd.f32 %v4924_v36, %v4923_v24  ;;  %v5036_v37 = vpop.f32.mrf.mxu1 }
 0x1dc   : > { %v4926_v0 = vpop.f32.mrf.mxu0  ;;  %v5037_v52 = vadd.f32 %v5036_v37, %v5035_v32 }
 0x1dd   : > { %v2368_v42 = vmax.f32 %v2274_v33, 0.0  ;;  %v2118_v44 = vadd.f32 %v4925_v35, %v6066_v63  ;;  %v5038_v45 = vpop.f32.mrf.mxu1 }
 0x1de   : > { %v4927_v46 = vpop.f32.mrf.mxu0 }
 0x1df   : > { %v2394_v47 = vpack.c.bf16 %v2368_v42, %v2367_v39  ;;  %v4928_v49 = vadd.f32 %v4927_v46, %v4926_v0  ;;  %v5039_v53 = vpop.f32.mrf.mxu1  ;;  %v2279_v51 = vadd.f32 %v5037_v52, %v2118_v44 }
 0x1e0   : > { %v4929_v55 = vpop.f32.mrf.mxu0  ;;  %v5040_v58 = vadd.f32 %v5039_v53, %v5038_v45 }
 0x1e1   : > { %v2121_v57 = vadd.f32 %v4928_v49, %v6069_v8  ;;  %v5041_v23 = vpop.f32.mrf.mxu1  ;;  %5199 = vmatmul.mubr.bf16.gmra.mxu0 %v2394_v47  ;;  %v2369_v40 = vmax.f32 %v2279_v51, 0.0 }
 0x1e2   : > { %v4930_v60 = vpop.f32.mrf.mxu0 }
 0x1e3   : > { %v2282_v11 = vadd.f32 %v5040_v58, %v2121_v57  ;;  %v4931_v62 = vadd.f32 %v4930_v60, %v4929_v55  ;;  %v5042_v61 = vpop.f32.mrf.mxu1 }
 0x1e4   : > { %v4932_v1 = vpop.f32.mrf.mxu0  ;;  %v5043_v9 = vadd.f32 %v5042_v61, %v5041_v23 }
 0x1e5   : > { %v2370_v63 = vmax.f32 %v2282_v11, 0.0  ;;  %v2126_v3 = vadd.f32 %v4931_v62, %v6072_v18  ;;  %v5044_v4 = vpop.f32.mrf.mxu1 }
 0x1e6   : > { %v4933_v7 = vpop.f32.mrf.mxu0 }
 0x1e7   : > { %v4934_v10 = vadd.f32 %v4933_v7, %v4932_v1  ;;  %v5045_v12 = vpop.f32.mrf.mxu1  ;;  %v2395_v14 = vpack.c.bf16 %v2370_v63, %v2369_v40  ;;  %v2287_v8 = vadd.f32 %v5043_v9, %v2126_v3 }
 0x1e8   : > { %v4935_v50 = vpop.f32.mrf.mxu0  ;;  %v5046_v26 = vadd.f32 %v5045_v12, %v5044_v4 }
 0x1e9   : > { %v2129_v15 = vadd.f32 %v4934_v10, %v6075_v29  ;;  %v5047_v16 = vpop.f32.mrf.mxu1  ;;  %5202 = vmatprep.mubr.bf16.mxu0 %v2395_v14  ;;  %v2371_v27 = vmax.f32 %v2287_v8, 0.0 }
 0x1ea   : > { %v4936_v19 = vpop.f32.mrf.mxu0 }
 0x1eb   : > { %v2290_v21 = vadd.f32 %v5046_v26, %v2129_v15  ;;  %v4937_v22 = vadd.f32 %v4936_v19, %v4935_v50  ;;  %v5048_v24 = vpop.f32.mrf.mxu1 }
 0x1ec   : > { %v4938_v25 = vpop.f32.mrf.mxu0  ;;  %v5049_v35 = vadd.f32 %v5048_v24, %v5047_v16 }
 0x1ed   : > { %v2372_v18 = vmax.f32 %v2290_v21, 0.0  ;;  %v2134_v31 = vadd.f32 %v4937_v22, %v6078_v38  ;;  %v5050_v32 = vpop.f32.mrf.mxu1 }
 0x1ee   : > { %v4939_v36 = vpop.f32.mrf.mxu0 }
 0x1ef   : > { %v2396_v33 = vpack.c.bf16 %v2372_v18, %v2371_v27  ;;  %v4940_v37 = vadd.f32 %v4939_v36, %v4938_v25  ;;  %v5051_v0 = vpop.f32.mrf.mxu1  ;;  %v2295_v29 = vadd.f32 %v5049_v35, %v2134_v31 }
 0x1f0   : > { %v4941_v39 = vpop.f32.mrf.mxu0  ;;  %v5052_v44 = vadd.f32 %v5051_v0, %v5050_v32 }
 0x1f1   : > { %v2137_v42 = vadd.f32 %v4940_v37, %v6081_v48  ;;  %v5053_v45 = vpop.f32.mrf.mxu1  ;;  %5203 = vmatmul.mubr.bf16.gmra.mxu0 %v2396_v33  ;;  %v2373_v55 = vmax.f32 %v2295_v29, 0.0 }
 0x1f2   : > { %v4942_v46 = vpop.f32.mrf.mxu0 }
 0x1f3   : > { %v2298_v47 = vadd.f32 %v5052_v44, %v2137_v42  ;;  %v4943_v52 = vadd.f32 %v4942_v46, %v4941_v39  ;;  %v5054_v49 = vpop.f32.mrf.mxu1 }
 0x1f4   : > { %v4944_v53 = vpop.f32.mrf.mxu0  ;;  %v5055_v23 = vadd.f32 %v5054_v49, %v5053_v45 }
 0x1f5   : > { %v2374_v38 = vmax.f32 %v2298_v47, 0.0  ;;  %v2142_v51 = vadd.f32 %v4943_v52, %v6084_v59  ;;  %v5056_v57 = vpop.f32.mrf.mxu1 }
 0x1f6   : > { %v4945_v58 = vpop.f32.mrf.mxu0 }
 0x1f7   : > { %v4946_v60 = vadd.f32 %v4945_v58, %v4944_v53  ;;  %v5057_v11 = vpop.f32.mrf.mxu1  ;;  %v2397_v62 = vpack.c.bf16 %v2374_v38, %v2373_v55  ;;  %v2303_v48 = vadd.f32 %v5055_v23, %v2142_v51 }
 0x1f8   : > { %v4947_v61 = vpop.f32.mrf.mxu0  ;;  %v5058_v40 = vadd.f32 %v5057_v11, %v5056_v57 }
 0x1f9   : > { %v2145_v1 = vadd.f32 %v4946_v60, %v6087_v6  ;;  %v5059_v63 = vpop.f32.mrf.mxu1  ;;  %5206 = vmatprep.mubr.bf16.mxu0 %v2397_v62  ;;  %v2375_v12 = vmax.f32 %v2303_v48, 0.0 }
 0x1fa   : > { %v4948_v3 = vpop.f32.mrf.mxu0 }
 0x1fb   : > { %v2306_v4 = vadd.f32 %v5058_v40, %v2145_v1  ;;  %v4949_v7 = vadd.f32 %v4948_v3, %v4947_v61  ;;  %v5060_v9 = vpop.f32.mrf.mxu1 }
 0x1fc   : > { %v4950_v10 = vpop.f32.mrf.mxu0  ;;  %v5061_v26 = vadd.f32 %v5060_v9, %v5059_v63 }
 0x1fd   : > { %v2376_v59 = vmax.f32 %v2306_v4, 0.0  ;;  %v2150_v14 = vadd.f32 %v4949_v7, %v6090_v17  ;;  %v5062_v50 = vpop.f32.mrf.mxu1 }
 0x1fe   : > { %v4951_v8 = vpop.f32.mrf.mxu0 }
 0x1ff   : > { %v2398_v15 = vpack.c.bf16 %v2376_v59, %v2375_v12  ;;  %v4952_v16 = vadd.f32 %v4951_v8, %v4950_v10  ;;  %v5063_v19 = vpop.f32.mrf.mxu1  ;;  %v2311_v6 = vadd.f32 %v5061_v26, %v2150_v14 }
 0x200   : > { %v4953_v21 = vpop.f32.mrf.mxu0  ;;  %v5064_v24 = vadd.f32 %v5063_v19, %v5062_v50 }
 0x201   : > { %v2153_v22 = vadd.f32 %v4952_v16, %v6093_v30  ;;  %v5065_v25 = vpop.f32.mrf.mxu1  ;;  %5207 = vmatmul.mubr.bf16.gmra.mxu0 %v2398_v15  ;;  %v2377_v33 = vmax.f32 %v2311_v6, 0.0 }
 0x202   : > { %v4954_v27 = vpop.f32.mrf.mxu0 }
 0x203   : > { %v2314_v18 = vadd.f32 %v5064_v24, %v2153_v22  ;;  %v4955_v31 = vadd.f32 %v4954_v27, %v4953_v21  ;;  %v5066_v32 = vpop.f32.mrf.mxu1 }
 0x204   : > { %v4956_v36 = vpop.f32.mrf.mxu0  ;;  %v5067_v39 = vadd.f32 %v5066_v32, %v5065_v25 }
 0x205   : > { %v2378_v17 = vmax.f32 %v2314_v18, 0.0  ;;  %v2158_v35 = vadd.f32 %v4955_v31, %v6096_v41  ;;  %v5068_v37 = vpop.f32.mrf.mxu1 }
 0x206   : > { %v4957_v0 = vpop.f32.mrf.mxu0 }
 0x207   : > { %v4958_v29 = vadd.f32 %v4957_v0, %v4956_v36  ;;  %v5069_v42 = vpop.f32.mrf.mxu1  ;;  %v2399_v44 = vpack.c.bf16 %v2378_v17, %v2377_v33  ;;  %v2319_v30 = vadd.f32 %v5067_v39, %v2158_v35 }
 0x208   : > { %v4959_v45 = vpop.f32.mrf.mxu0  ;;  %v5070_v47 = vadd.f32 %v5069_v42, %v5068_v37 }
 0x209   : > { %v2161_v46 = vadd.f32 %v4958_v29, %v6099_v54  ;;  %v5071_v52 = vpop.f32.mrf.mxu1  ;;  %5210 = vmatprep.mubr.bf16.mxu0 %v2399_v44  ;;  %v2379_v57 = vmax.f32 %v2319_v30, 0.0 }
 0x20a   : > { %v4960_v49 = vpop.f32.mrf.mxu0 }
 0x20b   : > { %v2322_v53 = vadd.f32 %v5070_v47, %v2161_v46  ;;  %v4961_v55 = vadd.f32 %v4960_v49, %v4959_v45  ;;  %v5072_v38 = vpop.f32.mrf.mxu1 }
 0x20c   : > { %v4962_v51 = vpop.f32.mrf.mxu0  ;;  %v5073_v62 = vadd.f32 %v5072_v38, %v5071_v52 }
 0x20d   : > { %v2380_v41 = vmax.f32 %v2322_v53, 0.0  ;;  %v2166_v58 = vadd.f32 %v4961_v55, %v6102_v2  ;;  %v5074_v23 = vpop.f32.mrf.mxu1 }
 0x20e   : > { %v4963_v60 = vpop.f32.mrf.mxu0 }
 0x20f   : > { %v2400_v11 = vpack.c.bf16 %v2380_v41, %v2379_v57  ;;  %v4964_v61 = vadd.f32 %v4963_v60, %v4962_v51  ;;  %v5075_v48 = vpop.f32.mrf.mxu1  ;;  %v2327_v54 = vadd.f32 %v5073_v62, %v2166_v58 }
 0x210   : > { %v4965_v1 = vpop.f32.mrf.mxu0  ;;  %v5076_v63 = vadd.f32 %v5075_v48, %v5074_v23 }
 0x211   : > { %v2169_v40 = vadd.f32 %v4964_v61, %v6105_v13  ;;  %v5077_v3 = vpop.f32.mrf.mxu1  ;;  %5211 = vmatmul.mubr.bf16.gmra.mxu0 %v2400_v11  ;;  %v2381_v59 = vmax.f32 %v2327_v54, 0.0 }
 0x212   : > { %v4966_v4 = vpop.f32.mrf.mxu0 }
 0x213   : > { %v2330_v7 = vadd.f32 %v5076_v63, %v2169_v40  ;;  %v4967_v9 = vadd.f32 %v4966_v4, %v4965_v1  ;;  %v5078_v10 = vpop.f32.mrf.mxu1  ;;  %v5467_v40 = vld [vmem:[%s6692_s7] sm:$0xff]  }
 0x214   : > { %v4968_v12 = vpop.f32.mrf.mxu0  ;;  %v5079_v15 = vadd.f32 %v5078_v10, %v5077_v3 }
 0x215   : > { %v2382_v2 = vmax.f32 %v2330_v7, 0.0  ;;  %v2174_v14 = vadd.f32 %v4967_v9, %v6111_v28  ;;  %v5080_v50 = vpop.f32.mrf.mxu1 }
 0x216   : > { %v4969_v8 = vpop.f32.mrf.mxu0 }
 0x217   : > { %v4970_v26 = vadd.f32 %v4969_v8, %v4968_v12  ;;  %v5081_v16 = vpop.f32.mrf.mxu1  ;;  %v2401_v19 = vpack.c.bf16 %v2382_v2, %v2381_v59  ;;  %v2335_v13 = vadd.f32 %v5079_v15, %v2174_v14 }
 0x218   : > { %v4971_v21 = vpop.f32.mrf.mxu0  ;;  %v5082_v22 = vadd.f32 %v5081_v16, %v5080_v50 }
 0x219   : > { %v2177_v6 = vadd.f32 %v4970_v26, %v6114_v43  ;;  %v5083_v24 = vpop.f32.mrf.mxu1  ;;  %5214 = vmatprep.mubr.bf16.mxu0 %v2401_v19  ;;  %v2383_v36 = vmax.f32 %v2335_v13, 0.0 }
 0x21a   : > { %v4972_v25 = vpop.f32.mrf.mxu0 }
 0x21b   : > { %v2338_v27 = vadd.f32 %v5082_v22, %v2177_v6  ;;  %v4973_v18 = vadd.f32 %v4972_v25, %v4971_v21  ;;  %v5084_v31 = vpop.f32.mrf.mxu1 }
 0x21c   : > { %v4974_v32 = vpop.f32.mrf.mxu0  ;;  %v5085_v0 = vadd.f32 %v5084_v31, %v5083_v24 }
 0x21d   : > { %v2384_v28 = vmax.f32 %v2338_v27, 0.0  ;;  %v2182_v33 = vadd.f32 %v4973_v18, %v6117_v56  ;;  %v5086_v17 = vpop.f32.mrf.mxu1 }
 0x21e   : > { %v4975_v35 = vpop.f32.mrf.mxu0 }
 0x21f   : > { %v2402_v37 = vpack.c.bf16 %v2384_v28, %v2383_v36  ;;  %v4976_v39 = vadd.f32 %v4975_v35, %v4974_v32  ;;  %v5087_v29 = vpop.f32.mrf.mxu1  ;;  %v2343_v43 = vadd.f32 %v5085_v0, %v2182_v33 }
 0x220   : > { %v4977_v42 = vpop.f32.mrf.mxu0  ;;  %v5088_v45 = vadd.f32 %v5087_v29, %v5086_v17 }
 0x221   : > { %v2185_v44 = vadd.f32 %v4976_v39, %v6120_v5  ;;  %v5089_v30 = vpop.f32.mrf.mxu1  ;;  %5215 = vmatmul.mubr.bf16.gmra.mxu0 %v2402_v37  ;;  %v2385_v55 = vmax.f32 %v2343_v43, 0.0 }
 0x222   : > { %v4978_v46 = vpop.f32.mrf.mxu0 }
 0x223   : > { %v2346_v47 = vadd.f32 %v5088_v45, %v2185_v44  ;;  %v4979_v52 = vadd.f32 %v4978_v46, %v4977_v42  ;;  %v5090_v49 = vpop.f32.mrf.mxu1 }
 0x224   : > { %v4980_v53 = vpop.f32.mrf.mxu0  ;;  %v5091_v41 = vadd.f32 %v5090_v49, %v5089_v30 }
 0x225   : > { %v2386_v56 = vmax.f32 %v2346_v47, 0.0  ;;  %v2190_v38 = vadd.f32 %v4979_v52, %v6123_v20  ;;  %v5092_v51 = vpop.f32.mrf.mxu1  ;;  %v5466_v20 = vld [vmem:[%s6692_s7 + $0x8] sm:$0xff]  }
 0x226   : > { %v4981_v57 = vpop.f32.mrf.mxu0  ;;  %5262 = vmatprep.subr.bf16.mxu0 %v5466_v20 }
 0x227   : > { %v4982_v58 = vadd.f32 %v4981_v57, %v4980_v53  ;;  %v5093_v23 = vpop.f32.mrf.mxu1  ;;  %v2403_v60 = vpack.c.bf16 %v2386_v56, %v2385_v55  ;;  %v2351_v11 = vadd.f32 %v5091_v41, %v2190_v38  ;;  %5263 = vmatpush3.bf16.msra.mxu0 %v5466_v20 }
 0x228   : > { %v5094_v62 = vadd.f32 %v5093_v23, %v5092_v51  ;;  %5264 = vmatprep.subr.bf16.mxu0 %v5467_v40 }
 0x229   : > { %v2193_v5 = vadd.f32 %v4982_v58, %v6126_v34  ;;  %5218 = vmatprep.mubr.bf16.mxu0 %v2403_v60  ;;  %v2387_v48 = vmax.f32 %v2351_v11, 0.0  ;;  %v6178_v34 = vld [vmem:[%s6689_s4] ss:$0 sm:$0xff] }
 0x22b   : > { %v2354_v61 = vadd.f32 %v5094_v62, %v2193_v5  ;;  %5265 = vmatpush3.bf16.msra.mxu0 %v5467_v40 }
 0x22d   : > { %v2388_v1 = vmax.f32 %v2354_v61, 0.0 }
 0x22f   : > { %v2404_v54 = vpack.c.bf16 %v2388_v1, %v2387_v48 }
 0x231   : > { %5219 = vmatmul.mubr.bf16.gmra.mxu0 %v2404_v54 }
 0x281   : > { %v5192_v63 = vpop.f32.mrf.mxu0 }
 0x282   : > { %v2519_v10 = vadd.f32 %v5192_v63, %v6178_v34 }
 0x283   : > { %v2510_v3 = vpop.f32.mrf.mxu0 }
 0x284   : > { %v2511_v7 = vadd.f32 %v6178_v34, %v2510_v3  ;;  %v2639_v8 = vmax.f32 %v2519_v10, 0.0 }
 0x285   : > { %v5193_v4 = vpop.f32.mrf.mxu0 }
 0x286   : > { %v2522_v9 = vadd.f32 %v5193_v4, %v6178_v34  ;;  %v2637_v14 = vmax.f32 %v2511_v7, 0.0 }
 0x287   : > { %v2513_v12 = vpop.f32.mrf.mxu0 }
 0x288   : > { %v2514_v59 = vadd.f32 %v6178_v34, %v2513_v12  ;;  %v2640_v2 = vmax.f32 %v2522_v9, 0.0 }
 0x28a   : > { %v2638_v50 = vmax.f32 %v2514_v59, 0.0  ;;  %v2670_v26 = vpack.c.bf16 %v2640_v2, %v2639_v8 }
 0x28c   : > { %v2669_v15 = vpack.c.bf16 %v2638_v50, %v2637_v14 }
 0x28e   : > { %5230 = vmatprep.mubr.msk.bf16.mxu1 %vm2724_vm0, %v2669_v15 }
 0x28f   : > { %5231 = vmatmul.mubr.msk.bf16.vlgmr.msra.gmra.mxu1 %vm2724_vm0, %v2670_v26 }
 0x291   : > { %v5196_v16 = vpop.f32.mrf.mxu0 }
 0x292   : > { %v2535_v22 = vadd.f32 %v5196_v16, %v6178_v34 }
 0x293   : > { %v2526_v19 = vpop.f32.mrf.mxu0 }
 0x294   : > { %v2527_v13 = vadd.f32 %v6178_v34, %v2526_v19  ;;  %v2643_v32 = vmax.f32 %v2535_v22, 0.0 }
 0x295   : > { %v5197_v21 = vpop.f32.mrf.mxu0 }
 0x296   : > { %v2538_v6 = vadd.f32 %v5197_v21, %v6178_v34  ;;  %v2641_v18 = vmax.f32 %v2527_v13, 0.0 }
 0x297   : > { %v2529_v24 = vpop.f32.mrf.mxu0 }
 0x298   : > { %v2530_v25 = vadd.f32 %v6178_v34, %v2529_v24  ;;  %v2644_v27 = vmax.f32 %v2538_v6, 0.0 }
 0x29a   : > { %v2642_v31 = vmax.f32 %v2530_v25, 0.0  ;;  %v2672_v28 = vpack.c.bf16 %v2644_v27, %v2643_v32 }
 0x29c   : > { %v2671_v36 = vpack.c.bf16 %v2642_v31, %v2641_v18 }
 0x29e   : > { %5234 = vmatprep.mubr.msk.bf16.mxu1 %vm2724_vm0, %v2671_v36 }
 0x29f   : > { %5235 = vmatmul.mubr.msk.bf16.gmra.mxu1 %vm2724_vm0, %v2672_v28 }
 0x2a1   : > { %v5200_v33 = vpop.f32.mrf.mxu0 }
 0x2a2   : > { %v2551_v39 = vadd.f32 %v5200_v33, %v6178_v34 }
 0x2a3   : > { %v2542_v17 = vpop.f32.mrf.mxu0 }
 0x2a4   : > { %v2543_v37 = vadd.f32 %v6178_v34, %v2542_v17  ;;  %v2647_v30 = vmax.f32 %v2551_v39, 0.0 }
 0x2a5   : > { %v5201_v35 = vpop.f32.mrf.mxu0 }
 0x2a6   : > { %v2554_v0 = vadd.f32 %v5201_v35, %v6178_v34  ;;  %v2645_v44 = vmax.f32 %v2543_v37, 0.0 }
 0x2a7   : > { %v2545_v29 = vpop.f32.mrf.mxu0 }
 0x2a8   : > { %v2546_v42 = vadd.f32 %v6178_v34, %v2545_v29  ;;  %v2648_v43 = vmax.f32 %v2554_v0, 0.0 }
 0x2aa   : > { %v2646_v45 = vmax.f32 %v2546_v42, 0.0  ;;  %v2674_v47 = vpack.c.bf16 %v2648_v43, %v2647_v30 }
 0x2ac   : > { %v2673_v46 = vpack.c.bf16 %v2646_v45, %v2645_v44 }
 0x2ae   : > { %5238 = vmatprep.mubr.msk.bf16.mxu1 %vm2724_vm0, %v2673_v46 }
 0x2af   : > { %5239 = vmatmul.mubr.msk.bf16.gmra.mxu1 %vm2724_vm0, %v2674_v47 }
 0x2b1   : > { %v5204_v52 = vpop.f32.mrf.mxu0 }
 0x2b2   : > { %v2567_v38 = vadd.f32 %v5204_v52, %v6178_v34 }
 0x2b3   : > { %v2558_v49 = vpop.f32.mrf.mxu0 }
 0x2b4   : > { %v2559_v55 = vadd.f32 %v6178_v34, %v2558_v49  ;;  %v2651_v60 = vmax.f32 %v2567_v38, 0.0 }
 0x2b5   : > { %v5205_v53 = vpop.f32.mrf.mxu0 }
 0x2b6   : > { %v2570_v56 = vadd.f32 %v5205_v53, %v6178_v34  ;;  %v2649_v58 = vmax.f32 %v2559_v55, 0.0 }
 0x2b7   : > { %v2561_v51 = vpop.f32.mrf.mxu0 }
 0x2b8   : > { %v2562_v57 = vadd.f32 %v6178_v34, %v2561_v51  ;;  %v2652_v41 = vmax.f32 %v2570_v56, 0.0 }
 0x2ba   : > { %v2650_v23 = vmax.f32 %v2562_v57, 0.0  ;;  %v2676_v5 = vpack.c.bf16 %v2652_v41, %v2651_v60  ;;  %v5468_v57 = vld [vmem:[%s6694_s9] sm:$0xff]  }
 0x2bb   : > { %5298 = vmatprep.subr.bf16.mxu1 %v5468_v57 }
 0x2bc   : > { %v2675_v11 = vpack.c.bf16 %v2650_v23, %v2649_v58  ;;  %5299 = vmatpush3.bf16.msra.mxu1 %v5468_v57 }
 0x2be   : > { %5242 = vmatprep.mubr.msk.bf16.mxu1 %vm2724_vm0, %v2675_v11 }
 0x2bf   : > { %5243 = vmatmul.mubr.msk.bf16.gmra.mxu1 %vm2724_vm0, %v2676_v5 }
 0x2c1   : > { %v5208_v62 = vpop.f32.mrf.mxu0 }
 0x2c2   : > { %v2583_v20 = vadd.f32 %v5208_v62, %v6178_v34 }
 0x2c3   : > { %v2574_v61 = vpop.f32.mrf.mxu0 }
 0x2c4   : > { %v2575_v1 = vadd.f32 %v6178_v34, %v2574_v61  ;;  %v2655_v9 = vmax.f32 %v2583_v20, 0.0 }
 0x2c5   : > { %v5209_v48 = vpop.f32.mrf.mxu0 }
 0x2c6   : > { %v2586_v54 = vadd.f32 %v5209_v48, %v6178_v34  ;;  %v2653_v4 = vmax.f32 %v2575_v1, 0.0 }
 0x2c7   : > { %v2577_v40 = vpop.f32.mrf.mxu0 }
 0x2c8   : > { %v2578_v63 = vadd.f32 %v6178_v34, %v2577_v40  ;;  %v2656_v3 = vmax.f32 %v2586_v54, 0.0 }
 0x2ca   : > { %v2654_v7 = vmax.f32 %v2578_v63, 0.0  ;;  %v2678_v12 = vpack.c.bf16 %v2656_v3, %v2655_v9 }
 0x2cc   : > { %v2677_v10 = vpack.c.bf16 %v2654_v7, %v2653_v4 }
 0x2ce   : > { %5246 = vmatprep.mubr.msk.bf16.mxu1 %vm2724_vm0, %v2677_v10 }
 0x2cf   : > { %5247 = vmatmul.mubr.msk.bf16.gmra.mxu1 %vm2724_vm0, %v2678_v12 }
 0x2d1   : > { %v5212_v59 = vpop.f32.mrf.mxu0 }
 0x2d2   : > { %v2599_v15 = vadd.f32 %v5212_v59, %v6178_v34 }
 0x2d3   : > { %v2590_v2 = vpop.f32.mrf.mxu0 }
 0x2d4   : > { %v2591_v50 = vadd.f32 %v6178_v34, %v2590_v2  ;;  %v2659_v6 = vmax.f32 %v2599_v15, 0.0 }
 0x2d5   : > { %v5213_v14 = vpop.f32.mrf.mxu0 }
 0x2d6   : > { %v2602_v8 = vadd.f32 %v5213_v14, %v6178_v34  ;;  %v2657_v21 = vmax.f32 %v2591_v50, 0.0 }
 0x2d7   : > { %v2593_v26 = vpop.f32.mrf.mxu0 }
 0x2d8   : > { %v2594_v16 = vadd.f32 %v6178_v34, %v2593_v26  ;;  %v2660_v19 = vmax.f32 %v2602_v8, 0.0 }
 0x2da   : > { %v2658_v13 = vmax.f32 %v2594_v16, 0.0  ;;  %v2680_v24 = vpack.c.bf16 %v2660_v19, %v2659_v6 }
 0x2dc   : > { %v2679_v22 = vpack.c.bf16 %v2658_v13, %v2657_v21 }
 0x2de   : > { %5250 = vmatprep.mubr.msk.bf16.mxu1 %vm2724_vm0, %v2679_v22 }
 0x2df   : > { %5251 = vmatmul.mubr.msk.bf16.gmra.mxu1 %vm2724_vm0, %v2680_v24 }
 0x2e1   : > { %v5216_v25 = vpop.f32.mrf.mxu0 }
 0x2e2   : > { %v2615_v36 = vadd.f32 %v5216_v25, %v6178_v34 }
 0x2e3   : > { %v2606_v27 = vpop.f32.mrf.mxu0 }
 0x2e4   : > { %v2607_v31 = vadd.f32 %v6178_v34, %v2606_v27  ;;  %v2663_v0 = vmax.f32 %v2615_v36, 0.0 }
 0x2e5   : > { %v5217_v18 = vpop.f32.mrf.mxu0 }
 0x2e6   : > { %v2618_v32 = vadd.f32 %v5217_v18, %v6178_v34  ;;  %v2661_v35 = vmax.f32 %v2607_v31, 0.0 }
 0x2e7   : > { %v2609_v28 = vpop.f32.mrf.mxu0 }
 0x2e8   : > { %v2610_v33 = vadd.f32 %v6178_v34, %v2609_v28  ;;  %v2664_v17 = vmax.f32 %v2618_v32, 0.0 }
 0x2ea   : > { %v2662_v37 = vmax.f32 %v2610_v33, 0.0  ;;  %v2682_v29 = vpack.c.bf16 %v2664_v17, %v2663_v0 }
 0x2ec   : > { %v2681_v39 = vpack.c.bf16 %v2662_v37, %v2661_v35 }
 0x2ee   : > { %5254 = vmatprep.mubr.msk.bf16.mxu1 %vm2724_vm0, %v2681_v39 }
 0x2ef   : > { %5255 = vmatmul.mubr.msk.bf16.gmra.mxu1 %vm2724_vm0, %v2682_v29 }
 0x2f1   : > { %v5220_v42 = vpop.f32.mrf.mxu0 }
 0x2f2   : > { %v2631_v46 = vadd.f32 %v5220_v42, %v6178_v34 }
 0x2f3   : > { %v2622_v43 = vpop.f32.mrf.mxu0 }
 0x2f4   : > { %v2623_v45 = vadd.f32 %v6178_v34, %v2622_v43  ;;  %v2667_v56 = vmax.f32 %v2631_v46, 0.0 }
 0x2f5   : > { %v5221_v44 = vpop.f32.mrf.mxu0 }
 0x2f6   : > { %v2634_v30 = vadd.f32 %v5221_v44, %v6178_v34  ;;  %v2665_v53 = vmax.f32 %v2623_v45, 0.0 }
 0x2f7   : > { %v2625_v47 = vpop.f32.mrf.mxu0 }
 0x2f8   : > { %v2626_v52 = vadd.f32 %v6178_v34, %v2625_v47  ;;  %v2668_v49 = vmax.f32 %v2634_v30, 0.0  ;;  %v6234_v34 = vld [vmem:[%s6691_s6] ss:$0 sm:$0xff] }
 0x2fa   : > { %v2666_v55 = vmax.f32 %v2626_v52, 0.0  ;;  %v2684_v51 = vpack.c.bf16 %v2668_v49, %v2667_v56 }
 0x2fc   : > { %v2683_v38 = vpack.c.bf16 %v2666_v55, %v2665_v53 }
 0x2fe   : > { %5258 = vmatprep.mubr.msk.bf16.mxu1 %vm2724_vm0, %v2683_v38 }
 0x2ff   : > { %5259 = vmatmul.mubr.msk.bf16.gmra.mxu1 %vm2724_vm0, %v2684_v51 }
 0x34f   : > { %v5232_v41 = vpop.f32.mrf.mxu1 }
 0x350   : > { %v2816_v5 = vadd.f32 %v5232_v41, %v6234_v34 }
 0x351   : > { %v2807_v58 = vpop.f32.mrf.mxu1 }
 0x352   : > { %v2808_v60 = vadd.f32 %v6234_v34, %v2807_v58  ;;  %v2936_v20 = vmax.f32 %v2816_v5, 0.0 }
 0x353   : > { %v5233_v23 = vpop.f32.mrf.mxu1 }
 0x354   : > { %v2819_v11 = vadd.f32 %v5233_v23, %v6234_v34  ;;  %v2934_v1 = vmax.f32 %v2808_v60, 0.0 }
 0x355   : > { %v2810_v62 = vpop.f32.mrf.mxu1 }
 0x356   : > { %v2811_v61 = vadd.f32 %v6234_v34, %v2810_v62  ;;  %v2937_v48 = vmax.f32 %v2819_v11, 0.0 }
 0x358   : > { %v2935_v54 = vmax.f32 %v2811_v61, 0.0  ;;  %v2967_v63 = vpack.c.bf16 %v2937_v48, %v2936_v20 }
 0x35a   : > { %v2966_v40 = vpack.c.bf16 %v2935_v54, %v2934_v1 }
 0x35c   : > { %5266 = vmatprep.mubr.msk.bf16.mxu0 %vm3005_vm1, %v2966_v40 }
 0x35d   : > { %5267 = vmatmul.mubr.msk.bf16.vlgmr.msra.gmra.mxu0 %vm3005_vm1, %v2967_v63 }
 0x35f   : > { %v5236_v3 = vpop.f32.mrf.mxu1 }
 0x360   : > { %v2832_v12 = vadd.f32 %v5236_v3, %v6234_v34 }
 0x361   : > { %v2823_v4 = vpop.f32.mrf.mxu1 }
 0x362   : > { %v2824_v9 = vadd.f32 %v6234_v34, %v2823_v4  ;;  %v2940_v15 = vmax.f32 %v2832_v12, 0.0 }
 0x363   : > { %v5237_v7 = vpop.f32.mrf.mxu1 }
 0x364   : > { %v2835_v10 = vadd.f32 %v5237_v7, %v6234_v34  ;;  %v2938_v50 = vmax.f32 %v2824_v9, 0.0 }
 0x365   : > { %v2826_v59 = vpop.f32.mrf.mxu1 }
 0x366   : > { %v2827_v2 = vadd.f32 %v6234_v34, %v2826_v59  ;;  %v2941_v14 = vmax.f32 %v2835_v10, 0.0 }
 0x368   : > { %v2939_v8 = vmax.f32 %v2827_v2, 0.0  ;;  %v2969_v16 = vpack.c.bf16 %v2941_v14, %v2940_v15 }
 0x36a   : > { %v2968_v26 = vpack.c.bf16 %v2939_v8, %v2938_v50 }
 0x36c   : > { %5270 = vmatprep.mubr.msk.bf16.mxu0 %vm3005_vm1, %v2968_v26 }
 0x36d   : > { %5271 = vmatmul.mubr.msk.bf16.gmra.mxu0 %vm3005_vm1, %v2969_v16 }
 0x36f   : > { %v5240_v19 = vpop.f32.mrf.mxu1 }
 0x370   : > { %v2848_v24 = vadd.f32 %v5240_v19, %v6234_v34 }
 0x371   : > { %v2839_v21 = vpop.f32.mrf.mxu1 }
 0x372   : > { %v2840_v6 = vadd.f32 %v6234_v34, %v2839_v21  ;;  %v2944_v36 = vmax.f32 %v2848_v24, 0.0 }
 0x373   : > { %v5241_v13 = vpop.f32.mrf.mxu1 }
 0x374   : > { %v2851_v22 = vadd.f32 %v5241_v13, %v6234_v34  ;;  %v2942_v31 = vmax.f32 %v2840_v6, 0.0 }
 0x375   : > { %v2842_v25 = vpop.f32.mrf.mxu1 }
 0x376   : > { %v2843_v27 = vadd.f32 %v6234_v34, %v2842_v25  ;;  %v2945_v18 = vmax.f32 %v2851_v22, 0.0 }
 0x378   : > { %v2943_v32 = vmax.f32 %v2843_v27, 0.0  ;;  %v2971_v33 = vpack.c.bf16 %v2945_v18, %v2944_v36 }
 0x37a   : > { %v2970_v28 = vpack.c.bf16 %v2943_v32, %v2942_v31 }
 0x37c   : > { %5274 = vmatprep.mubr.msk.bf16.mxu0 %vm3005_vm1, %v2970_v28 }
 0x37d   : > { %5275 = vmatmul.mubr.msk.bf16.gmra.mxu0 %vm3005_vm1, %v2971_v33 }
 0x37f   : > { %v5244_v17 = vpop.f32.mrf.mxu1 }
 0x380   : > { %v2864_v29 = vadd.f32 %v5244_v17, %v6234_v34 }
 0x381   : > { %v2855_v35 = vpop.f32.mrf.mxu1 }
 0x382   : > { %v2856_v0 = vadd.f32 %v6234_v34, %v2855_v35  ;;  %v2948_v46 = vmax.f32 %v2864_v29, 0.0 }
 0x383   : > { %v5245_v37 = vpop.f32.mrf.mxu1 }
 0x384   : > { %v2867_v39 = vadd.f32 %v5245_v37, %v6234_v34  ;;  %v2946_v45 = vmax.f32 %v2856_v0, 0.0 }
 0x385   : > { %v2858_v42 = vpop.f32.mrf.mxu1 }
 0x386   : > { %v2859_v43 = vadd.f32 %v6234_v34, %v2858_v42  ;;  %v2949_v44 = vmax.f32 %v2867_v39, 0.0 }
 0x388   : > { %v2947_v30 = vmax.f32 %v2859_v43, 0.0  ;;  %v2973_v52 = vpack.c.bf16 %v2949_v44, %v2948_v46 }
 0x38a   : > { %v2972_v47 = vpack.c.bf16 %v2947_v30, %v2946_v45  ;;  %v6287_v45 = vld [vmem:[%s6693_s8] ss:$0 sm:$0xff] }
 0x38c   : > { %5278 = vmatprep.mubr.msk.bf16.mxu0 %vm3005_vm1, %v2972_v47 }
 0x38d   : > { %5279 = vmatmul.mubr.msk.bf16.gmra.mxu0 %vm3005_vm1, %v2973_v52 }
 0x38f   : > { %v5248_v49 = vpop.f32.mrf.mxu1 }
 0x390   : > { %v2880_v51 = vadd.f32 %v5248_v49, %v6234_v34 }
 0x391   : > { %v2871_v53 = vpop.f32.mrf.mxu1 }
 0x392   : > { %v2872_v56 = vadd.f32 %v6234_v34, %v2871_v53  ;;  %v2952_v11 = vmax.f32 %v2880_v51, 0.0 }
 0x393   : > { %v5249_v55 = vpop.f32.mrf.mxu1 }
 0x394   : > { %v2883_v38 = vadd.f32 %v5249_v55, %v6234_v34  ;;  %v2950_v23 = vmax.f32 %v2872_v56, 0.0 }
 0x395   : > { %v2874_v57 = vpop.f32.mrf.mxu1 }
 0x396   : > { %v2875_v41 = vadd.f32 %v6234_v34, %v2874_v57  ;;  %v2953_v58 = vmax.f32 %v2883_v38, 0.0 }
 0x398   : > { %v2951_v60 = vmax.f32 %v2875_v41, 0.0  ;;  %v2975_v62 = vpack.c.bf16 %v2953_v58, %v2952_v11 }
 0x39a   : > { %v2974_v5 = vpack.c.bf16 %v2951_v60, %v2950_v23 }
 0x39c   : > { %5282 = vmatprep.mubr.msk.bf16.mxu0 %vm3005_vm1, %v2974_v5 }
 0x39d   : > { %5283 = vmatmul.mubr.msk.bf16.gmra.mxu0 %vm3005_vm1, %v2975_v62 }
 0x39f   : > { %v5252_v61 = vpop.f32.mrf.mxu1 }
 0x3a0   : > { %v2896_v40 = vadd.f32 %v5252_v61, %v6234_v34 }
 0x3a1   : > { %v2887_v48 = vpop.f32.mrf.mxu1 }
 0x3a2   : > { %v2888_v54 = vadd.f32 %v6234_v34, %v2887_v48  ;;  %v2956_v10 = vmax.f32 %v2896_v40, 0.0 }
 0x3a3   : > { %v5253_v1 = vpop.f32.mrf.mxu1 }
 0x3a4   : > { %v2899_v20 = vadd.f32 %v5253_v1, %v6234_v34  ;;  %v2954_v7 = vmax.f32 %v2888_v54, 0.0 }
 0x3a5   : > { %v2890_v63 = vpop.f32.mrf.mxu1 }
 0x3a6   : > { %v2891_v3 = vadd.f32 %v6234_v34, %v2890_v63  ;;  %v2957_v4 = vmax.f32 %v2899_v20, 0.0 }
 0x3a8   : > { %v2955_v9 = vmax.f32 %v2891_v3, 0.0  ;;  %v2977_v59 = vpack.c.bf16 %v2957_v4, %v2956_v10 }
 0x3aa   : > { %v2976_v12 = vpack.c.bf16 %v2955_v9, %v2954_v7 }
 0x3ac   : > { %5286 = vmatprep.mubr.msk.bf16.mxu0 %vm3005_vm1, %v2976_v12 }
 0x3ad   : > { %5287 = vmatmul.mubr.msk.bf16.gmra.mxu0 %vm3005_vm1, %v2977_v59 }
 0x3af   : > { %v5256_v2 = vpop.f32.mrf.mxu1 }
 0x3b0   : > { %v2912_v26 = vadd.f32 %v5256_v2, %v6234_v34 }
 0x3b1   : > { %v2903_v14 = vpop.f32.mrf.mxu1 }
 0x3b2   : > { %v2904_v8 = vadd.f32 %v6234_v34, %v2903_v14  ;;  %v2960_v22 = vmax.f32 %v2912_v26, 0.0 }
 0x3b3   : > { %v5257_v50 = vpop.f32.mrf.mxu1 }
 0x3b4   : > { %v2915_v15 = vadd.f32 %v5257_v50, %v6234_v34  ;;  %v2958_v13 = vmax.f32 %v2904_v8, 0.0 }
 0x3b5   : > { %v2906_v16 = vpop.f32.mrf.mxu1 }
 0x3b6   : > { %v2907_v19 = vadd.f32 %v6234_v34, %v2906_v16  ;;  %v2961_v21 = vmax.f32 %v2915_v15, 0.0 }
 0x3b8   : > { %v2959_v6 = vmax.f32 %v2907_v19, 0.0  ;;  %v2979_v25 = vpack.c.bf16 %v2961_v21, %v2960_v22 }
 0x3ba   : > { %v2978_v24 = vpack.c.bf16 %v2959_v6, %v2958_v13 }
 0x3bc   : > { %5290 = vmatprep.mubr.msk.bf16.mxu0 %vm3005_vm1, %v2978_v24 }
 0x3bd   : > { %5291 = vmatmul.mubr.msk.bf16.gmra.mxu0 %vm3005_vm1, %v2979_v25 }
 0x3bf   : > { %v5260_v27 = vpop.f32.mrf.mxu1 }
 0x3c0   : > { %v2928_v28 = vadd.f32 %v5260_v27, %v6234_v34 }
 0x3c1   : > { %v2919_v18 = vpop.f32.mrf.mxu1 }
 0x3c2   : > { %v2920_v32 = vadd.f32 %v6234_v34, %v2919_v18  ;;  %v2964_v39 = vmax.f32 %v2928_v28, 0.0 }
 0x3c3   : > { %v5261_v31 = vpop.f32.mrf.mxu1 }
 0x3c4   : > { %v2931_v36 = vadd.f32 %v5261_v31, %v6234_v34  ;;  %v2962_v37 = vmax.f32 %v2920_v32, 0.0 }
 0x3c5   : > { %v2922_v33 = vpop.f32.mrf.mxu1 }
 0x3c6   : > { %v2923_v17 = vadd.f32 %v6234_v34, %v2922_v33  ;;  %v2965_v35 = vmax.f32 %v2931_v36, 0.0 }
 0x3c8   : > { %v2963_v0 = vmax.f32 %v2923_v17, 0.0  ;;  %v2981_v42 = vpack.c.bf16 %v2965_v35, %v2964_v39 }
 0x3ca   : > { %v2980_v29 = vpack.c.bf16 %v2963_v0, %v2962_v37 }
 0x3cc   : > { %5294 = vmatprep.mubr.msk.bf16.mxu0 %vm3005_vm1, %v2980_v29 }
 0x3cd   : > { %5295 = vmatmul.mubr.msk.bf16.gmra.mxu0 %vm3005_vm1, %v2981_v42 }
 0x41d   : > { %v5268_v43 = vpop.f32.mrf.mxu0 }
 0x41e   : > { %v3097_v47 = vadd.f32 %v5268_v43, %v6287_v45 }
 0x41f   : > { %v3088_v44 = vpop.f32.mrf.mxu0 }
 0x420   : > { %v3089_v34 = vadd.f32 %v6287_v45, %v3088_v44  ;;  %v3217_v38 = vmax.f32 %v3097_v47, 0.0 }
 0x421   : > { %v5269_v30 = vpop.f32.mrf.mxu0 }
 0x422   : > { %v3100_v46 = vadd.f32 %v5269_v30, %v6287_v45  ;;  %v3215_v55 = vmax.f32 %v3089_v34, 0.0 }
 0x423   : > { %v3091_v52 = vpop.f32.mrf.mxu0 }
 0x424   : > { %v3092_v49 = vadd.f32 %v6287_v45, %v3091_v52  ;;  %v3218_v53 = vmax.f32 %v3100_v46, 0.0 }
 0x426   : > { %v3216_v56 = vmax.f32 %v3092_v49, 0.0  ;;  %v3248_v57 = vpack.c.bf16 %v3218_v53, %v3217_v38 }
 0x428   : > { %v3247_v51 = vpack.c.bf16 %v3216_v56, %v3215_v55 }
 0x42a   : > { %5300 = vmatprep.mubr.msk.bf16.mxu1 %vm3278_vm2, %v3247_v51 }
 0x42b   : > { %5301 = vmatmul.mubr.msk.bf16.vlgmr.msra.gmra.mxu1 %vm3278_vm2, %v3248_v57 }
 0x42d   : > { %v5272_v41 = vpop.f32.mrf.mxu0 }
 0x42e   : > { %v3113_v5 = vadd.f32 %v5272_v41, %v6287_v45 }
 0x42f   : > { %v3104_v58 = vpop.f32.mrf.mxu0 }
 0x430   : > { %v3105_v60 = vadd.f32 %v6287_v45, %v3104_v58  ;;  %v3221_v20 = vmax.f32 %v3113_v5, 0.0 }
 0x431   : > { %v5273_v23 = vpop.f32.mrf.mxu0 }
 0x432   : > { %v3116_v11 = vadd.f32 %v5273_v23, %v6287_v45  ;;  %v3219_v1 = vmax.f32 %v3105_v60, 0.0 }
 0x433   : > { %v3107_v62 = vpop.f32.mrf.mxu0 }
 0x434   : > { %v3108_v61 = vadd.f32 %v6287_v45, %v3107_v62  ;;  %v3222_v48 = vmax.f32 %v3116_v11, 0.0 }
 0x436   : > { %v3220_v54 = vmax.f32 %v3108_v61, 0.0  ;;  %v3250_v63 = vpack.c.bf16 %v3222_v48, %v3221_v20 }
 0x438   : > { %v3249_v40 = vpack.c.bf16 %v3220_v54, %v3219_v1 }
 0x43a   : > { %5304 = vmatprep.mubr.msk.bf16.mxu1 %vm3278_vm2, %v3249_v40 }
 0x43b   : > { %5305 = vmatmul.mubr.msk.bf16.gmra.mxu1 %vm3278_vm2, %v3250_v63 }
 0x43d   : > { %v5276_v3 = vpop.f32.mrf.mxu0 }
 0x43e   : > { %v3129_v12 = vadd.f32 %v5276_v3, %v6287_v45 }
 0x43f   : > { %v3120_v4 = vpop.f32.mrf.mxu0 }
 0x440   : > { %v3121_v9 = vadd.f32 %v6287_v45, %v3120_v4  ;;  %v3225_v15 = vmax.f32 %v3129_v12, 0.0 }
 0x441   : > { %v5277_v7 = vpop.f32.mrf.mxu0 }
 0x442   : > { %v3132_v10 = vadd.f32 %v5277_v7, %v6287_v45  ;;  %v3223_v50 = vmax.f32 %v3121_v9, 0.0 }
 0x443   : > { %v3123_v59 = vpop.f32.mrf.mxu0 }
 0x444   : > { %v3124_v2 = vadd.f32 %v6287_v45, %v3123_v59  ;;  %v3226_v14 = vmax.f32 %v3132_v10, 0.0 }
 0x446   : > { %v3224_v8 = vmax.f32 %v3124_v2, 0.0  ;;  %v3252_v16 = vpack.c.bf16 %v3226_v14, %v3225_v15 }
 0x448   : > { %v3251_v26 = vpack.c.bf16 %v3224_v8, %v3223_v50 }
 0x44a   : > { %5308 = vmatprep.mubr.msk.bf16.mxu1 %vm3278_vm2, %v3251_v26 }
 0x44b   : > { %5309 = vmatmul.mubr.msk.bf16.gmra.mxu1 %vm3278_vm2, %v3252_v16 }
 0x44d   : > { %v5280_v19 = vpop.f32.mrf.mxu0 }
 0x44e   : > { %v3145_v24 = vadd.f32 %v5280_v19, %v6287_v45 }
 0x44f   : > { %v3136_v21 = vpop.f32.mrf.mxu0 }
 0x450   : > { %v3137_v6 = vadd.f32 %v6287_v45, %v3136_v21  ;;  %v3229_v36 = vmax.f32 %v3145_v24, 0.0 }
 0x451   : > { %v5281_v13 = vpop.f32.mrf.mxu0 }
 0x452   : > { %v3148_v22 = vadd.f32 %v5281_v13, %v6287_v45  ;;  %v3227_v31 = vmax.f32 %v3137_v6, 0.0 }
 0x453   : > { %v3139_v25 = vpop.f32.mrf.mxu0 }
 0x454   : > { %v3140_v27 = vadd.f32 %v6287_v45, %v3139_v25  ;;  %v3230_v18 = vmax.f32 %v3148_v22, 0.0 }
 0x456   : > { %v3228_v32 = vmax.f32 %v3140_v27, 0.0  ;;  %v3254_v33 = vpack.c.bf16 %v3230_v18, %v3229_v36  ;;  %v6340_v27 = vld [vmem:[%s6715_s29] ss:$0 sm:$0xff] }
 0x458   : > { %v3253_v28 = vpack.c.bf16 %v3228_v32, %v3227_v31 }
 0x45a   : > { %5312 = vmatprep.mubr.msk.bf16.mxu1 %vm3278_vm2, %v3253_v28 }
 0x45b   : > { %5313 = vmatmul.mubr.msk.bf16.gmra.mxu1 %vm3278_vm2, %v3254_v33 }
 0x45d   : > { %v5284_v17 = vpop.f32.mrf.mxu0 }
 0x45e   : > { %v3161_v29 = vadd.f32 %v5284_v17, %v6287_v45 }
 0x45f   : > { %v3152_v35 = vpop.f32.mrf.mxu0 }
 0x460   : > { %v3153_v0 = vadd.f32 %v6287_v45, %v3152_v35  ;;  %v3233_v46 = vmax.f32 %v3161_v29, 0.0 }
 0x461   : > { %v5285_v37 = vpop.f32.mrf.mxu0 }
 0x462   : > { %v3164_v39 = vadd.f32 %v5285_v37, %v6287_v45  ;;  %v3231_v30 = vmax.f32 %v3153_v0, 0.0 }
 0x463   : > { %v3155_v42 = vpop.f32.mrf.mxu0 }
 0x464   : > { %v3156_v43 = vadd.f32 %v6287_v45, %v3155_v42  ;;  %v3234_v44 = vmax.f32 %v3164_v39, 0.0 }
 0x466   : > { %v3232_v34 = vmax.f32 %v3156_v43, 0.0  ;;  %v3256_v52 = vpack.c.bf16 %v3234_v44, %v3233_v46 }
 0x468   : > { %v3255_v47 = vpack.c.bf16 %v3232_v34, %v3231_v30  ;;  %v5698_v30 = vmov 0  }
 0x469   : > { %5388 = vset.pattern.permute.xlu1 %v5698_v30  ;;  %5389 = vset.pattern.permute.xlu0 %v5698_v30 }
 0x46a   : > { %5316 = vmatprep.mubr.msk.bf16.mxu1 %vm3278_vm2, %v3255_v47 }
 0x46b   : > { %5317 = vmatmul.mubr.msk.bf16.gmra.mxu1 %vm3278_vm2, %v3256_v52 }
 0x46d   : > { %v5288_v49 = vpop.f32.mrf.mxu0 }
 0x46e   : > { %v3177_v51 = vadd.f32 %v5288_v49, %v6287_v45 }
 0x46f   : > { %v3168_v53 = vpop.f32.mrf.mxu0 }
 0x470   : > { %v3169_v56 = vadd.f32 %v6287_v45, %v3168_v53  ;;  %v3237_v11 = vmax.f32 %v3177_v51, 0.0 }
 0x471   : > { %v5289_v55 = vpop.f32.mrf.mxu0 }
 0x472   : > { %v3180_v38 = vadd.f32 %v5289_v55, %v6287_v45  ;;  %v3235_v23 = vmax.f32 %v3169_v56, 0.0 }
 0x473   : > { %v3171_v57 = vpop.f32.mrf.mxu0 }
 0x474   : > { %v3172_v41 = vadd.f32 %v6287_v45, %v3171_v57  ;;  %v3238_v58 = vmax.f32 %v3180_v38, 0.0 }
 0x476   : > { %v3236_v60 = vmax.f32 %v3172_v41, 0.0  ;;  %v3258_v62 = vpack.c.bf16 %v3238_v58, %v3237_v11 }
 0x478   : > { %v3257_v5 = vpack.c.bf16 %v3236_v60, %v3235_v23 }
 0x47a   : > { %5320 = vmatprep.mubr.msk.bf16.mxu1 %vm3278_vm2, %v3257_v5 }
 0x47b   : > { %5321 = vmatmul.mubr.msk.bf16.gmra.mxu1 %vm3278_vm2, %v3258_v62 }
 0x47d   : > { %v5292_v61 = vpop.f32.mrf.mxu0 }
 0x47e   : > { %v3193_v40 = vadd.f32 %v5292_v61, %v6287_v45 }
 0x47f   : > { %v3184_v48 = vpop.f32.mrf.mxu0 }
 0x480   : > { %v3185_v54 = vadd.f32 %v6287_v45, %v3184_v48  ;;  %v3241_v10 = vmax.f32 %v3193_v40, 0.0 }
 0x481   : > { %v5293_v1 = vpop.f32.mrf.mxu0 }
 0x482   : > { %v3196_v20 = vadd.f32 %v5293_v1, %v6287_v45  ;;  %v3239_v7 = vmax.f32 %v3185_v54, 0.0 }
 0x483   : > { %v3187_v63 = vpop.f32.mrf.mxu0 }
 0x484   : > { %v3188_v3 = vadd.f32 %v6287_v45, %v3187_v63  ;;  %v3242_v4 = vmax.f32 %v3196_v20, 0.0 }
 0x486   : > { %v3240_v9 = vmax.f32 %v3188_v3, 0.0  ;;  %v3260_v59 = vpack.c.bf16 %v3242_v4, %v3241_v10 }
 0x488   : > { %v3259_v12 = vpack.c.bf16 %v3240_v9, %v3239_v7 }
 0x48a   : > { %5324 = vmatprep.mubr.msk.bf16.mxu1 %vm3278_vm2, %v3259_v12 }
 0x48b   : > { %5325 = vmatmul.mubr.msk.bf16.gmra.mxu1 %vm3278_vm2, %v3260_v59 }
 0x48d   : > { %v5296_v2 = vpop.f32.mrf.mxu0 }
 0x48e   : > { %v3209_v26 = vadd.f32 %v5296_v2, %v6287_v45 }
 0x48f   : > { %v3200_v14 = vpop.f32.mrf.mxu0 }
 0x490   : > { %v3201_v8 = vadd.f32 %v6287_v45, %v3200_v14  ;;  %v3245_v22 = vmax.f32 %v3209_v26, 0.0 }
 0x491   : > { %v5297_v50 = vpop.f32.mrf.mxu0 }
 0x492   : > { %v3212_v15 = vadd.f32 %v5297_v50, %v6287_v45  ;;  %v3243_v13 = vmax.f32 %v3201_v8, 0.0 }
 0x493   : > { %v3203_v16 = vpop.f32.mrf.mxu0 }
 0x494   : > { %v3204_v19 = vadd.f32 %v6287_v45, %v3203_v16  ;;  %v3246_v21 = vmax.f32 %v3212_v15, 0.0 }
 0x496   : > { %v3244_v6 = vmax.f32 %v3204_v19, 0.0  ;;  %v3262_v25 = vpack.c.bf16 %v3246_v21, %v3245_v22 }
 0x498   : > { %v3261_v24 = vpack.c.bf16 %v3244_v6, %v3243_v13 }
 0x49a   : > { %5328 = vmatprep.mubr.msk.bf16.mxu1 %vm3278_vm2, %v3261_v24 }
 0x49b   : > { %5329 = vmatmul.mubr.msk.bf16.gmra.mxu1 %vm3278_vm2, %v3262_v25 }
 0x4eb   : > { %v5302_v18 = vpop.f32.mrf.mxu1 }
 0x4ec   : > { %v6343_v31 = vadd.f32 %v5302_v18, %v6340_v27 }
 0x4ed   : > { %v3361_v45 = vpop.f32.mrf.mxu1 }
 0x4ee   : > { %v6346_v32 = vadd.f32 %v6340_v27, %v3361_v45  ;;  %3524 = vrot.lane.b32.xlu1 %v6343_v31, %s5697_s16 }
 0x4ef   : > { %v5303_v36 = vpop.f32.mrf.mxu1 }
 0x4f0   : > { %v6351_v28 = vadd.f32 %v5303_v36, %v6340_v27  ;;  %3520 = vrot.lane.b32.xlu0 %v6346_v32, %s5697_s16 }
 0x4f1   : > { %v3364_v33 = vpop.f32.mrf.mxu1 }
 0x4f2   : > { %v6356_v17 = vadd.f32 %v6340_v27, %v3364_v33  ;;  %3526 = vrot.lane.b32.xlu1 %v6351_v28, %s5697_s16 }
 0x4f4   : > { %3522 = vrot.lane.b32.xlu0 %v6356_v17, %s5697_s16 }
 0x4fb   : > { %v5306_v35 = vpop.f32.mrf.mxu1 }
 0x4fc   : > { %v6363_v37 = vadd.f32 %v5306_v35, %v6340_v27 }
 0x4fd   : > { %v3377_v0 = vpop.f32.mrf.mxu1 }
 0x4fe   : > { %3532 = vrot.lane.b32.xlu0 %v6363_v37, %s5697_s16  ;;  %v6368_v29 = vadd.f32 %v6340_v27, %v3377_v0 }
 0x4ff   : > { %v5307_v39 = vpop.f32.mrf.mxu1 }
 0x500   : > { %v6371_v42 = vadd.f32 %v5307_v39, %v6340_v27 }
 0x501   : > { %v3380_v43 = vpop.f32.mrf.mxu1 }
 0x502   : > { %3534 = vrot.lane.b32.xlu1 %v6371_v42, %s5697_s16  ;;  %3528 = vrot.lane.b32.xlu0 %v6368_v29, %s5697_s16  ;;  %v6378_v44 = vadd.f32 %v6340_v27, %v3380_v43 }
 0x506   : > { %3530 = vrot.lane.b32.xlu1 %v6378_v44, %s5697_s16 }
 0x50b   : > { %v5310_v34 = vpop.f32.mrf.mxu1 }
 0x50c   : > { %v6383_v46 = vadd.f32 %v5310_v34, %v6340_v27 }
 0x50d   : > { %v3393_v47 = vpop.f32.mrf.mxu1 }
 0x50e   : > { %3540 = vrot.lane.b32.xlu0 %v6383_v46, %s5697_s16  ;;  %v6388_v49 = vadd.f32 %v6340_v27, %v3393_v47 }
 0x50f   : > { %v5311_v52 = vpop.f32.mrf.mxu1 }
 0x510   : > { %v6391_v53 = vadd.f32 %v5311_v52, %v6340_v27 }
 0x511   : > { %v3396_v55 = vpop.f32.mrf.mxu1 }
 0x512   : > { %3542 = vrot.lane.b32.xlu1 %v6391_v53, %s5697_s16  ;;  %3536 = vrot.lane.b32.xlu0 %v6388_v49, %s5697_s16  ;;  %v6398_v56 = vadd.f32 %v6340_v27, %v3396_v55 }
 0x516   : > { %3538 = vrot.lane.b32.xlu1 %v6398_v56, %s5697_s16 }
 0x51b   : > { %v5314_v38 = vpop.f32.mrf.mxu1 }
 0x51c   : > { %v6403_v51 = vadd.f32 %v5314_v38, %v6340_v27 }
 0x51d   : > { %v3409_v57 = vpop.f32.mrf.mxu1 }
 0x51e   : > { %3548 = vrot.lane.b32.xlu0 %v6403_v51, %s5697_s16  ;;  %v6408_v58 = vadd.f32 %v6340_v27, %v3409_v57 }
 0x51f   : > { %v5315_v41 = vpop.f32.mrf.mxu1 }
 0x520   : > { %v6411_v23 = vadd.f32 %v5315_v41, %v6340_v27 }
 0x521   : > { %v3412_v60 = vpop.f32.mrf.mxu1 }
 0x522   : > { %3550 = vrot.lane.b32.xlu1 %v6411_v23, %s5697_s16  ;;  %3544 = vrot.lane.b32.xlu0 %v6408_v58, %s5697_s16  ;;  %v6418_v11 = vadd.f32 %v6340_v27, %v3412_v60 }
 0x526   : > { %3546 = vrot.lane.b32.xlu1 %v6418_v11, %s5697_s16 }
 0x52b   : > { %v5318_v5 = vpop.f32.mrf.mxu1 }
 0x52c   : > { %v6423_v62 = vadd.f32 %v5318_v5, %v6340_v27 }
 0x52d   : > { %v3425_v61 = vpop.f32.mrf.mxu1 }
 0x52e   : > { %3556 = vrot.lane.b32.xlu0 %v6423_v62, %s5697_s16  ;;  %v6428_v1 = vadd.f32 %v6340_v27, %v3425_v61 }
 0x52f   : > { %v5319_v48 = vpop.f32.mrf.mxu1 }
 0x530   : > { %v6431_v54 = vadd.f32 %v5319_v48, %v6340_v27 }
 0x531   : > { %v3428_v20 = vpop.f32.mrf.mxu1 }
 0x532   : > { %3558 = vrot.lane.b32.xlu1 %v6431_v54, %s5697_s16  ;;  %3552 = vrot.lane.b32.xlu0 %v6428_v1, %s5697_s16  ;;  %v6438_v40 = vadd.f32 %v6340_v27, %v3428_v20 }
 0x536   : > { %3554 = vrot.lane.b32.xlu1 %v6438_v40, %s5697_s16 }
 0x53b   : > { %v5322_v63 = vpop.f32.mrf.mxu1 }
 0x53c   : > { %v6443_v3 = vadd.f32 %v5322_v63, %v6340_v27 }
 0x53d   : > { %v3441_v4 = vpop.f32.mrf.mxu1 }
 0x53e   : > { %3564 = vrot.lane.b32.xlu0 %v6443_v3, %s5697_s16  ;;  %v6448_v9 = vadd.f32 %v6340_v27, %v3441_v4 }
 0x53f   : > { %v5323_v7 = vpop.f32.mrf.mxu1 }
 0x540   : > { %v6451_v10 = vadd.f32 %v5323_v7, %v6340_v27 }
 0x541   : > { %v3444_v12 = vpop.f32.mrf.mxu1 }
 0x542   : > { %3566 = vrot.lane.b32.xlu1 %v6451_v10, %s5697_s16  ;;  %3560 = vrot.lane.b32.xlu0 %v6448_v9, %s5697_s16  ;;  %v6458_v59 = vadd.f32 %v6340_v27, %v3444_v12 }
 0x546   : > { %3562 = vrot.lane.b32.xlu1 %v6458_v59, %s5697_s16 }
 0x54b   : > { %v5326_v2 = vpop.f32.mrf.mxu1 }
 0x54c   : > { %v6463_v14 = vadd.f32 %v5326_v2, %v6340_v27 }
 0x54d   : > { %v3457_v50 = vpop.f32.mrf.mxu1 }
 0x54e   : > { %3572 = vrot.lane.b32.xlu0 %v6463_v14, %s5697_s16  ;;  %v6468_v15 = vadd.f32 %v6340_v27, %v3457_v50 }
 0x54f   : > { %v5327_v8 = vpop.f32.mrf.mxu1 }
 0x550   : > { %v6471_v26 = vadd.f32 %v5327_v8, %v6340_v27 }
 0x551   : > { %v3460_v16 = vpop.f32.mrf.mxu1 }
 0x552   : > { %3574 = vrot.lane.b32.xlu1 %v6471_v26, %s5697_s16  ;;  %3568 = vrot.lane.b32.xlu0 %v6468_v15, %s5697_s16  ;;  %v6478_v19 = vadd.f32 %v6340_v27, %v3460_v16 }
 0x556   : > { %3570 = vrot.lane.b32.xlu1 %v6478_v19, %s5697_s16 }
 0x55b   : > { %v5330_v21 = vpop.f32.mrf.mxu1 }
 0x55c   : > { %v6483_v13 = vadd.f32 %v5330_v21, %v6340_v27 }
 0x55d   : > { %v3473_v6 = vpop.f32.mrf.mxu1 }
 0x55e   : > { %3580 = vrot.lane.b32.xlu0 %v6483_v13, %s5697_s16  ;;  %v6488_v24 = vadd.f32 %v6340_v27, %v3473_v6 }
 0x55f   : > { %v5331_v22 = vpop.f32.mrf.mxu1 }
 0x560   : > { %v6491_v25 = vadd.f32 %v5331_v22, %v6340_v27  ;;  %v3525_v18 = vpop.permute.xlu1 %3524 }
 0x561   : > { %v3618_v45 = vsub.f32 %v6343_v31, %v3525_v18  ;;  %v3476_v36 = vpop.f32.mrf.mxu1 }
 0x562   : > { %3582 = vrot.lane.b32.xlu1 %v6491_v25, %s5697_s16  ;;  %3576 = vrot.lane.b32.xlu0 %v6488_v24, %s5697_s16  ;;  %v3521_v33 = vpop.permute.xlu0 %3520  ;;  %v6500_v39 = vadd.f32 %v6340_v27, %v3476_v36 }
 0x563   : > { %v4613_v35 = vclamps-f32 %v3618_v45, 30.0  ;;  %v3616_v0 = vsub.f32 %v6346_v32, %v3521_v33 }
 0x564   : > { %v3527_v43 = vpop.permute.xlu1 %3526 }
 0x565   : > { %v3716_v30 = vmul.f32 1.442695, %v4613_v35  ;;  %v4611_v34 = vclamps-f32 %v3616_v0, 30.0  ;;  %v3619_v47 = vsub.f32 %v6351_v28, %v3527_v43 }
 0x566   : > { %3578 = vrot.lane.b32.xlu1 %v6500_v39, %s5697_s16  ;;  %v3523_v31 = vpop.permute.xlu0 %3522 }
 0x567   : > { %5469 = vpow2.f32 %v3716_v30  ;;  %v3712_v52 = vmul.f32 1.442695, %v4611_v34  ;;  %v4614_v55 = vclamps-f32 %v3619_v47, 30.0  ;;  %v3617_v38 = vsub.f32 %v6356_v17, %v3523_v31 }
 0x569   : > { %5471 = vpow2.f32 %v3712_v52  ;;  %v3718_v57 = vmul.f32 1.442695, %v4614_v55  ;;  %v4612_v32 = vclamps-f32 %v3617_v38, 30.0 }
 0x56b   : > { %5473 = vpow2.f32 %v3718_v57  ;;  %v3714_v27 = vmul.f32 1.442695, %v4612_v32 }
 0x56d   : > { %5475 = vpow2.f32 %v3714_v27 }
 0x570   : > { %v3533_v41 = vpop.permute.xlu0 %3532 }
 0x571   : > { %v3622_v60 = vsub.f32 %v6363_v37, %v3533_v41 }
 0x573   : > { %v4617_v5 = vclamps-f32 %v3622_v60, 30.0 }
 0x574   : > { %v5470_v28 = vpop.eup %5469  ;;  %v3535_v61 = vpop.permute.xlu1 %3534 }
 0x575   : > { %v3529_v48 = vpop.permute.xlu0 %3528  ;;  %v3778_v20 = vadd.f32 1.0, %v5470_v28  ;;  %v3724_v63 = vmul.f32 1.442695, %v4617_v5  ;;  %v3623_v4 = vsub.f32 %v6371_v42, %v3535_v61 }
 0x576   : > { %v3620_v7 = vsub.f32 %v6368_v29, %v3529_v48  ;;  %v5472_v17 = vpop.eup %5471 }
 0x577   : > { %5477 = vrcp.f32 %v3778_v20  ;;  %v3776_v12 = vadd.f32 1.0, %v5472_v17  ;;  %v4618_v2 = vclamps-f32 %v3623_v4, 30.0 }
 0x578   : > { %v4615_v50 = vclamps-f32 %v3620_v7, 30.0  ;;  %v5474_v8 = vpop.eup %5473  ;;  %5479 = vpow2.f32 %v3724_v63  ;;  %v3531_v16 = vpop.permute.xlu1 %3530 }
 0x579   : > { %5481 = vrcp.f32 %v3776_v12  ;;  %v3779_v37 = vadd.f32 1.0, %v5474_v8  ;;  %v3726_v21 = vmul.f32 1.442695, %v4618_v2  ;;  %v3621_v18 = vsub.f32 %v6378_v44, %v3531_v16 }
 0x57a   : > { %v5476_v6 = vpop.eup %5475  ;;  %v3720_v22 = vmul.f32 1.442695, %v4615_v50 }
 0x57b   : > { %v3777_v45 = vadd.f32 1.0, %v5476_v6  ;;  %5483 = vpow2.f32 %v3726_v21  ;;  %v4616_v42 = vclamps-f32 %v3621_v18, 30.0 }
 0x57c   : > { %5485 = vrcp.f32 %v3779_v37 }
 0x57d   : > { %5487 = vpow2.f32 %v3720_v22  ;;  %v3722_v29 = vmul.f32 1.442695, %v4616_v42 }
 0x57e   : > { %5489 = vrcp.f32 %v3777_v45 }
 0x57f   : > { %5491 = vpow2.f32 %v3722_v29 }
 0x580   : > { %v3541_v36 = vpop.permute.xlu0 %3540 }
 0x581   : > { %v3626_v33 = vsub.f32 %v6383_v46, %v3541_v36 }
 0x583   : > { %v4621_v35 = vclamps-f32 %v3626_v33, 30.0 }
 0x584   : > { %v5478_v0 = vpop.eup %5477  ;;  %v3543_v43 = vpop.permute.xlu1 %3542 }
 0x585   : > { %v3537_v30 = vpop.permute.xlu0 %3536  ;;  %v5480_v34 = vpop.eup %5479  ;;  %v3732_v47 = vmul.f32 1.442695, %v4621_v35  ;;  %v3627_v31 = vsub.f32 %v6391_v53, %v3543_v43  ;;  %4047 = vperm.xlu1 %5388, %v5478_v0   ;;  %v3845_v38 = vsub.f32 1.0, %v5478_v0 }
 0x586   : > { %v3624_v44 = vsub.f32 %v6388_v49, %v3537_v30  ;;  %v5482_v52 = vpop.eup %5481  ;;  %v3782_v55 = vadd.f32 1.0, %v5480_v34 }
 0x587   : > { %5493 = vpow2.f32 %v3732_v47  ;;  %v4622_v57 = vclamps-f32 %v3627_v31, 30.0  ;;  %v3843_v27 = vsub.f32 1.0, %v5482_v52 }
 0x588   : > { %v4619_v32 = vclamps-f32 %v3624_v44, 30.0  ;;  %5495 = vrcp.f32 %v3782_v55  ;;  %v3539_v46 = vpop.permute.xlu1 %3538  ;;  %v5484_v41 = vpop.eup %5483 }
 0x589   : > { %v3734_v60 = vmul.f32 1.442695, %v4622_v57  ;;  %v3625_v28 = vsub.f32 %v6398_v56, %v3539_v46  ;;  %3887 = vperm.xlu1 %5388, %v3845_v38   ;;  %3877 = vperm.xlu0 %5389, %v3843_v27   ;;  %v5486_v53 = vpop.eup %5485  ;;  %v3783_v61 = vadd.f32 1.0, %v5484_v41 }
 0x58a   : > { %v3728_v5 = vmul.f32 1.442695, %v4619_v32  ;;  %v5488_v49 = vpop.eup %5487  ;;  %v3846_v17 = vsub.f32 1.0, %v5486_v53 }
 0x58b   : > { %5497 = vpow2.f32 %v3734_v60  ;;  %v4620_v48 = vclamps-f32 %v3625_v28, 30.0  ;;  %v5490_v20 = vpop.eup %5489  ;;  %v3780_v63 = vadd.f32 1.0, %v5488_v49 }
 0x58c   : > { %5499 = vrcp.f32 %v3783_v61  ;;  %v5492_v4 = vpop.eup %5491  ;;  %v3844_v12 = vsub.f32 1.0, %v5490_v20 }
 0x58d   : > { %5501 = vpow2.f32 %v3728_v5  ;;  %v3730_v7 = vmul.f32 1.442695, %v4620_v48  ;;  %4037 = vperm.xlu1 %5388, %v5482_v52   ;;  %4052 = vperm.xlu0 %5389, %v5486_v53   ;;  %v3781_v2 = vadd.f32 1.0, %v5492_v4 }
 0x58e   : > { %5503 = vrcp.f32 %v3780_v63 }
 0x58f   : > { %5505 = vpow2.f32 %v3730_v7 }
 0x590   : > { %v3549_v56 = vpop.permute.xlu0 %3548  ;;  %5507 = vrcp.f32 %v3781_v2 }
 0x591   : > { %v3630_v50 = vsub.f32 %v6403_v51, %v3549_v56  ;;  %3892 = vperm.xlu0 %5389, %v3846_v17   ;;  %3882 = vperm.xlu1 %5388, %v3844_v12  }
 0x593   : > { %v4625_v8 = vclamps-f32 %v3630_v50, 30.0 }
 0x594   : > { %v5494_v16 = vpop.eup %5493  ;;  %v3551_v37 = vpop.permute.xlu1 %3550 }
 0x595   : > { %v3545_v21 = vpop.permute.xlu0 %3544  ;;  %v5496_v6 = vpop.eup %5495  ;;  %v3786_v22 = vadd.f32 1.0, %v5494_v16  ;;  %v3740_v18 = vmul.f32 1.442695, %v4625_v8  ;;  %v3631_v45 = vsub.f32 %v6411_v23, %v3551_v37  ;;  %4042 = vperm.xlu0 %5389, %v5490_v20  }
 0x596   : > { %v3628_v42 = vsub.f32 %v6408_v58, %v3545_v21  ;;  %4067 = vperm.xlu1 %5388, %v5496_v6   ;;  %v3849_v35 = vsub.f32 1.0, %v5496_v6 }
 0x597   : > { %5509 = vrcp.f32 %v3786_v22  ;;  %v4626_v29 = vclamps-f32 %v3631_v45, 30.0 }
 0x598   : > { %v4623_v36 = vclamps-f32 %v3628_v42, 30.0  ;;  %v5498_v51 = vpop.eup %5497  ;;  %5511 = vpow2.f32 %v3740_v18  ;;  %v3547_v33 = vpop.permute.xlu1 %3546 }
 0x599   : > { %v5500_v0 = vpop.eup %5499  ;;  %v3787_v43 = vadd.f32 1.0, %v5498_v51  ;;  %v3742_v30 = vmul.f32 1.442695, %v4626_v29  ;;  %v3629_v34 = vsub.f32 %v6418_v11, %v3547_v33 }
 0x59a   : > { %v5502_v47 = vpop.eup %5501  ;;  %v3736_v31 = vmul.f32 1.442695, %v4623_v36  ;;  %4072 = vperm.xlu0 %5389, %v5500_v0   ;;  %3907 = vperm.xlu1 %5388, %v3849_v35   ;;  %v3850_v52 = vsub.f32 1.0, %v5500_v0 }
 0x59b   : > { %5513 = vrcp.f32 %v3787_v43  ;;  %v3784_v58 = vadd.f32 1.0, %v5502_v47  ;;  %v4624_v23 = vclamps-f32 %v3629_v34, 30.0  ;;  %v5504_v44 = vpop.eup %5503 }
 0x59c   : > { %5515 = vpow2.f32 %v3742_v30  ;;  %v5506_v55 = vpop.eup %5505  ;;  %v3847_v11 = vsub.f32 1.0, %v5504_v44 }
 0x59d   : > { %v3738_v38 = vmul.f32 1.442695, %v4624_v23  ;;  %5517 = vpow2.f32 %v3736_v31  ;;  %v3785_v57 = vadd.f32 1.0, %v5506_v55  ;;  %v5508_v27 = vpop.eup %5507 }
 0x59e   : > { %3912 = vperm.xlu0 %5389, %v3850_v52   ;;  %4057 = vperm.xlu1 %5388, %v5504_v44   ;;  %5519 = vrcp.f32 %v3784_v58  ;;  %v3848_v53 = vsub.f32 1.0, %v5508_v27 }
 0x59f   : > { %5521 = vpow2.f32 %v3738_v38 }
 0x5a0   : > { %v3557_v32 = vpop.permute.xlu0 %3556  ;;  %5523 = vrcp.f32 %v3785_v57 }
 0x5a1   : > { %v3634_v46 = vsub.f32 %v6423_v62, %v3557_v32 }
 0x5a2   : > { %4062 = vperm.xlu0 %5389, %v5508_v27   ;;  %3897 = vperm.xlu1 %5388, %v3847_v11  }
 0x5a3   : > { %v4629_v41 = vclamps-f32 %v3634_v46, 30.0 }
 0x5a4   : > { %v5510_v60 = vpop.eup %5509  ;;  %v3559_v5 = vpop.permute.xlu1 %3558 }
 0x5a5   : > { %v3553_v28 = vpop.permute.xlu0 %3552  ;;  %v5512_v61 = vpop.eup %5511  ;;  %v3748_v49 = vmul.f32 1.442695, %v4629_v41  ;;  %v3635_v48 = vsub.f32 %v6431_v54, %v3559_v5  ;;  %v3853_v12 = vsub.f32 1.0, %v5510_v60 }
 0x5a6   : > { %v3632_v20 = vsub.f32 %v6428_v1, %v3553_v28  ;;  %v3790_v63 = vadd.f32 1.0, %v5512_v61  ;;  %3902 = vperm.xlu0 %5389, %v3848_v53   ;;  %4087 = vperm.xlu1 %5388, %v5510_v60  }
 0x5a7   : > { %5525 = vpow2.f32 %v3748_v49  ;;  %v4630_v4 = vclamps-f32 %v3635_v48, 30.0 }
 0x5a8   : > { %v4627_v62 = vclamps-f32 %v3632_v20, 30.0  ;;  %v5514_v7 = vpop.eup %5513  ;;  %5527 = vrcp.f32 %v3790_v63  ;;  %v3555_v17 = vpop.permute.xlu1 %3554 }
 0x5a9   : > { %v5516_v2 = vpop.eup %5515  ;;  %v3750_v56 = vmul.f32 1.442695, %v4630_v4  ;;  %v3633_v8 = vsub.f32 %v6438_v40, %v3555_v17  ;;  %v3854_v6 = vsub.f32 1.0, %v5514_v7 }
 0x5aa   : > { %v3744_v50 = vmul.f32 1.442695, %v4627_v62  ;;  %v3791_v16 = vadd.f32 1.0, %v5516_v2  ;;  %4092 = vperm.xlu0 %5389, %v5514_v7   ;;  %3927 = vperm.xlu1 %5388, %v3853_v12   ;;  %v5518_v54 = vpop.eup %5517 }
 0x5ab   : > { %5529 = vpow2.f32 %v3750_v56  ;;  %v4628_v1 = vclamps-f32 %v3633_v8, 30.0  ;;  %v5520_v37 = vpop.eup %5519  ;;  %v3788_v21 = vadd.f32 1.0, %v5518_v54 }
 0x5ac   : > { %5531 = vrcp.f32 %v3791_v16  ;;  %v5522_v22 = vpop.eup %5521  ;;  %v3851_v40 = vsub.f32 1.0, %v5520_v37 }
 0x5ad   : > { %5533 = vpow2.f32 %v3744_v50  ;;  %v3746_v18 = vmul.f32 1.442695, %v4628_v1  ;;  %v3789_v45 = vadd.f32 1.0, %v5522_v22  ;;  %v5524_v29 = vpop.eup %5523 }
 0x5ae   : > { %3932 = vperm.xlu0 %5389, %v3854_v6   ;;  %4077 = vperm.xlu1 %5388, %v5520_v37   ;;  %5535 = vrcp.f32 %v3788_v21  ;;  %v3852_v43 = vsub.f32 1.0, %v5524_v29 }
 0x5af   : > { %5537 = vpow2.f32 %v3746_v18 }
 0x5b0   : > { %v3565_v42 = vpop.permute.xlu0 %3564  ;;  %5539 = vrcp.f32 %v3789_v45 }
 0x5b1   : > { %v3638_v36 = vsub.f32 %v6443_v3, %v3565_v42 }
 0x5b2   : > { %4082 = vperm.xlu0 %5389, %v5524_v29   ;;  %3917 = vperm.xlu1 %5388, %v3851_v40  }
 0x5b3   : > { %v4633_v51 = vclamps-f32 %v3638_v36, 30.0 }
 0x5b4   : > { %v5526_v33 = vpop.eup %5525  ;;  %v3567_v35 = vpop.permute.xlu1 %3566 }
 0x5b5   : > { %v3561_v0 = vpop.permute.xlu0 %3560  ;;  %v5528_v30 = vpop.eup %5527  ;;  %v3794_v34 = vadd.f32 1.0, %v5526_v33  ;;  %v3756_v47 = vmul.f32 1.442695, %v4633_v51  ;;  %v3639_v31 = vsub.f32 %v6451_v10, %v3567_v35 }
 0x5b6   : > { %v3636_v58 = vsub.f32 %v6448_v9, %v3561_v0  ;;  %3922 = vperm.xlu0 %5389, %v3852_v43   ;;  %4107 = vperm.xlu1 %5388, %v5528_v30   ;;  %v3857_v55 = vsub.f32 1.0, %v5528_v30 }
 0x5b7   : > { %5541 = vrcp.f32 %v3794_v34  ;;  %v4634_v23 = vclamps-f32 %v3639_v31, 30.0 }
 0x5b8   : > { %v4631_v3 = vclamps-f32 %v3636_v58, 30.0  ;;  %v5530_v44 = vpop.eup %5529  ;;  %5543 = vpow2.f32 %v3756_v47  ;;  %v3563_v52 = vpop.permute.xlu1 %3562 }
 0x5b9   : > { %v5532_v38 = vpop.eup %5531  ;;  %v3795_v57 = vadd.f32 1.0, %v5530_v44  ;;  %v3758_v32 = vmul.f32 1.442695, %v4634_v23  ;;  %v3637_v11 = vsub.f32 %v6458_v59, %v3563_v52 }
 0x5ba   : > { %v5534_v27 = vpop.eup %5533  ;;  %v3752_v46 = vmul.f32 1.442695, %v4631_v3  ;;  %4112 = vperm.xlu0 %5389, %v5532_v38   ;;  %3947 = vperm.xlu1 %5388, %v3857_v55   ;;  %v3858_v60 = vsub.f32 1.0, %v5532_v38 }
 0x5bb   : > { %5545 = vrcp.f32 %v3795_v57  ;;  %v3792_v9 = vadd.f32 1.0, %v5534_v27  ;;  %v4632_v10 = vclamps-f32 %v3637_v11, 30.0  ;;  %v5536_v41 = vpop.eup %5535 }
 0x5bc   : > { %5547 = vpow2.f32 %v3758_v32  ;;  %v5538_v5 = vpop.eup %5537  ;;  %v3855_v59 = vsub.f32 1.0, %v5536_v41 }
 0x5bd   : > { %v3754_v28 = vmul.f32 1.442695, %v4632_v10  ;;  %5549 = vpow2.f32 %v3752_v46  ;;  %v3793_v53 = vadd.f32 1.0, %v5538_v5  ;;  %v5540_v49 = vpop.eup %5539 }
 0x5be   : > { %3952 = vperm.xlu0 %5389, %v3858_v60   ;;  %4097 = vperm.xlu1 %5388, %v5536_v41   ;;  %5551 = vrcp.f32 %v3792_v9  ;;  %v3856_v7 = vsub.f32 1.0, %v5540_v49 }
 0x5bf   : > { %5553 = vpow2.f32 %v3754_v28 }
 0x5c0   : > { %v3573_v61 = vpop.permute.xlu0 %3572  ;;  %5555 = vrcp.f32 %v3793_v53 }
 0x5c1   : > { %v3642_v48 = vsub.f32 %v6463_v14, %v3573_v61 }
 0x5c2   : > { %4102 = vperm.xlu0 %5389, %v5540_v49   ;;  %3937 = vperm.xlu1 %5388, %v3855_v59  }
 0x5c3   : > { %v4637_v20 = vclamps-f32 %v3642_v48, 30.0 }
 0x5c4   : > { %v5542_v63 = vpop.eup %5541  ;;  %v3575_v4 = vpop.permute.xlu1 %3574 }
 0x5c5   : > { %v3569_v62 = vpop.permute.xlu0 %3568  ;;  %v5544_v17 = vpop.eup %5543  ;;  %v3764_v12 = vmul.f32 1.442695, %v4637_v20  ;;  %v3643_v2 = vsub.f32 %v6471_v26, %v3575_v4  ;;  %v3861_v1 = vsub.f32 1.0, %v5542_v63 }
 0x5c6   : > { %v3640_v56 = vsub.f32 %v6468_v15, %v3569_v62  ;;  %v3798_v50 = vadd.f32 1.0, %v5544_v17  ;;  %3942 = vperm.xlu0 %5389, %v3856_v7   ;;  %4127 = vperm.xlu1 %5388, %v5542_v63  }
 0x5c7   : > { %5557 = vpow2.f32 %v3764_v12  ;;  %v4638_v8 = vclamps-f32 %v3643_v2, 30.0 }
 0x5c8   : > { %v4635_v14 = vclamps-f32 %v3640_v56, 30.0  ;;  %v5546_v16 = vpop.eup %5545  ;;  %5559 = vrcp.f32 %v3798_v50  ;;  %v3571_v54 = vpop.permute.xlu1 %3570 }
 0x5c9   : > { %v5548_v37 = vpop.eup %5547  ;;  %v3766_v21 = vmul.f32 1.442695, %v4638_v8  ;;  %v3641_v22 = vsub.f32 %v6478_v19, %v3571_v54  ;;  %v3862_v40 = vsub.f32 1.0, %v5546_v16 }
 0x5ca   : > { %v3760_v6 = vmul.f32 1.442695, %v4635_v14  ;;  %v3799_v18 = vadd.f32 1.0, %v5548_v37  ;;  %4132 = vperm.xlu0 %5389, %v5546_v16   ;;  %3967 = vperm.xlu1 %5388, %v3861_v1   ;;  %v5550_v26 = vpop.eup %5549 }
 0x5cb   : > { %5561 = vpow2.f32 %v3766_v21  ;;  %v4636_v15 = vclamps-f32 %v3641_v22, 30.0  ;;  %v5552_v45 = vpop.eup %5551  ;;  %v3796_v42 = vadd.f32 1.0, %v5550_v26 }
 0x5cc   : > { %5563 = vrcp.f32 %v3799_v18  ;;  %v5554_v29 = vpop.eup %5553  ;;  %v3859_v19 = vsub.f32 1.0, %v5552_v45  ;;  %v3840_v18 = vlaneseq }
 0x5cd   : > { %5565 = vpow2.f32 %v3760_v6  ;;  %v3762_v36 = vmul.f32 1.442695, %v4636_v15  ;;  %v3797_v51 = vadd.f32 1.0, %v5554_v29  ;;  %v5556_v35 = vpop.eup %5555 }
 0x5ce   : > { %3972 = vperm.xlu0 %5389, %v3862_v40   ;;  %4117 = vperm.xlu1 %5388, %v5552_v45   ;;  %5567 = vrcp.f32 %v3796_v42  ;;  %v3860_v31 = vsub.f32 1.0, %v5556_v35  ;;  %v6536_v45 = vand.u32 127, %v3840_v18 }
 0x5cf   : > { %5569 = vpow2.f32 %v3762_v36 }
 0x5d0   : > { %v3581_v33 = vpop.permute.xlu0 %3580  ;;  %5571 = vrcp.f32 %v3797_v51  ;;  %vm3842_vm3 = vcmp.eq.s32.totalorder %v6536_v45, 0 }
 0x5d1   : > { %v3646_v0 = vsub.f32 %v6483_v13, %v3581_v33 }
 0x5d2   : > { %4122 = vperm.xlu0 %5389, %v5556_v35   ;;  %3957 = vperm.xlu1 %5388, %v3859_v19  }
 0x5d3   : > { %v4641_v43 = vclamps-f32 %v3646_v0, 30.0 }
 0x5d4   : > { %v5558_v30 = vpop.eup %5557  ;;  %v3583_v34 = vpop.permute.xlu1 %3582 }
 0x5d5   : > { %v3577_v47 = vpop.permute.xlu0 %3576  ;;  %v5560_v58 = vpop.eup %5559  ;;  %v3802_v23 = vadd.f32 1.0, %v5558_v30  ;;  %v3772_v3 = vmul.f32 1.442695, %v4641_v43  ;;  %v3647_v44 = vsub.f32 %v6491_v25, %v3583_v34 }
 0x5d6   : > { %v3644_v52 = vsub.f32 %v6488_v24, %v3577_v47  ;;  %3962 = vperm.xlu0 %5389, %v3860_v31   ;;  %4147 = vperm.xlu1 %5388, %v5560_v58   ;;  %v3865_v32 = vsub.f32 1.0, %v5560_v58 }
 0x5d7   : > { %5573 = vrcp.f32 %v3802_v23  ;;  %v4642_v55 = vclamps-f32 %v3647_v44, 30.0 }
 0x5d8   : > { %v4639_v13 = vclamps-f32 %v3644_v52, 30.0  ;;  %v5562_v38 = vpop.eup %5561  ;;  %5575 = vpow2.f32 %v3772_v3  ;;  %v3579_v57 = vpop.permute.xlu1 %3578 }
 0x5d9   : > { %v5564_v11 = vpop.eup %5563  ;;  %v3803_v27 = vadd.f32 1.0, %v5562_v38  ;;  %v3774_v46 = vmul.f32 1.442695, %v4642_v55  ;;  %v3645_v9 = vsub.f32 %v6500_v39, %v3579_v57 }
 0x5da   : > { %v5566_v10 = vpop.eup %5565  ;;  %v3768_v41 = vmul.f32 1.442695, %v4639_v13  ;;  %4152 = vperm.xlu0 %5389, %v5564_v11   ;;  %3987 = vperm.xlu1 %5388, %v3865_v32   ;;  %v3866_v5 = vsub.f32 1.0, %v5564_v11 }
 0x5db   : > { %5577 = vrcp.f32 %v3803_v27  ;;  %v3800_v24 = vadd.f32 1.0, %v5566_v10  ;;  %v4640_v25 = vclamps-f32 %v3645_v9, 30.0  ;;  %v5568_v60 = vpop.eup %5567 }
 0x5dc   : > { %5579 = vpow2.f32 %v3774_v46  ;;  %v5570_v28 = vpop.eup %5569  ;;  %v3863_v59 = vsub.f32 1.0, %v5568_v60 }
 0x5dd   : > { %v3770_v53 = vmul.f32 1.442695, %v4640_v25  ;;  %5581 = vpow2.f32 %v3768_v41  ;;  %v3801_v61 = vadd.f32 1.0, %v5570_v28  ;;  %v5572_v39 = vpop.eup %5571 }
 0x5de   : > { %3992 = vperm.xlu0 %5389, %v3866_v5   ;;  %4137 = vperm.xlu1 %5388, %v5568_v60   ;;  %5583 = vrcp.f32 %v3800_v24  ;;  %v3864_v48 = vsub.f32 1.0, %v5572_v39 }
 0x5df   : > { %5585 = vpow2.f32 %v3770_v53 }
 0x5e0   : > { %5587 = vrcp.f32 %v3801_v61 }
 0x5e2   : > { %4142 = vperm.xlu0 %5389, %v5572_v39   ;;  %3977 = vperm.xlu1 %5388, %v3863_v59  }
 0x5e4   : > { %v5574_v49 = vpop.eup %5573 }
 0x5e5   : > { %v5576_v20 = vpop.eup %5575  ;;  %v3869_v62 = vsub.f32 1.0, %v5574_v49 }
 0x5e6   : > { %v3806_v63 = vadd.f32 1.0, %v5576_v20  ;;  %3982 = vperm.xlu0 %5389, %v3864_v48   ;;  %4167 = vperm.xlu1 %5388, %v5574_v49  }
 0x5e8   : > { %v5578_v4 = vpop.eup %5577  ;;  %5589 = vrcp.f32 %v3806_v63 }
 0x5e9   : > { %v5580_v7 = vpop.eup %5579  ;;  %v3870_v50 = vsub.f32 1.0, %v5578_v4 }
 0x5ea   : > { %v3807_v17 = vadd.f32 1.0, %v5580_v7  ;;  %4172 = vperm.xlu0 %5389, %v5578_v4   ;;  %4007 = vperm.xlu1 %5388, %v3869_v62   ;;  %v5582_v12 = vpop.eup %5581 }
 0x5eb   : > { %v5584_v2 = vpop.eup %5583  ;;  %v3804_v56 = vadd.f32 1.0, %v5582_v12 }
 0x5ec   : > { %5591 = vrcp.f32 %v3807_v17  ;;  %v5586_v8 = vpop.eup %5585  ;;  %v3867_v16 = vsub.f32 1.0, %v5584_v2 }
 0x5ed   : > { %5593 = vrcp.f32 %v3804_v56  ;;  %v3805_v14 = vadd.f32 1.0, %v5586_v8  ;;  %v5588_v54 = vpop.eup %5587 }
 0x5ee   : > { %4012 = vperm.xlu0 %5389, %v3870_v50   ;;  %4157 = vperm.xlu1 %5388, %v5584_v2   ;;  %v3868_v1 = vsub.f32 1.0, %v5588_v54 }
 0x5ef   : > { %5595 = vrcp.f32 %v3805_v14 }
 0x5f2   : > { %4162 = vperm.xlu0 %5389, %v5588_v54   ;;  %3997 = vperm.xlu1 %5388, %v3867_v16  }
 0x5f5   : > { %v5590_v37 = vpop.eup %5589 }
 0x5f6   : > { %4002 = vperm.xlu0 %5389, %v3868_v1   ;;  %v3873_v21 = vsub.f32 1.0, %v5590_v37 }
 0x5f8   : > { %4027 = vperm.xlu1 %5388, %v3873_v21  }
 0x5f9   : > { %v5592_v6 = vpop.eup %5591 }
 0x5fa   : > { %v3874_v22 = vsub.f32 1.0, %v5592_v6  ;;  %v5594_v26 = vpop.eup %5593 }
 0x5fb   : > { %v3871_v15 = vsub.f32 1.0, %v5594_v26 }
 0x5fc   : > { %4032 = vperm.xlu0 %5389, %v3874_v22   ;;  %4177 = vperm.xlu1 %5388, %v5594_v26   ;;  %v5596_v42 = vpop.eup %5595 }
 0x5fd   : > { %v3872_v29 = vsub.f32 1.0, %v5596_v42 }
 0x600   : > { %4182 = vperm.xlu0 %5389, %v5596_v42   ;;  %4017 = vperm.xlu1 %5388, %v3871_v15   ;;  %v4048_v40 = vpop.permute.xlu1 %4047 }
 0x604   : > { %4022 = vperm.xlu0 %5389, %v3872_v29   ;;  %4187 = vperm.xlu1 %5388, %v5590_v37   ;;  %v3888_v36 = vpop.permute.xlu1 %3887  ;;  %v3878_v51 = vpop.permute.xlu0 %3877 }
 0x605   : > { %v4197_v33 = vsel %vm3842_vm3, %v3888_v36, %v4048_v40 }
 0x606   : > { %4230 = vst.msk [vmem:[%s6542_s21 + $0x10] sm:$0xff] %vm4227_vm4, %v4197_v33 }
 0x608   : > { %4192 = vperm.xlu0 %5389, %v5592_v6   ;;  %v4038_v19 = vpop.permute.xlu1 %4037  ;;  %v4053_v35 = vpop.permute.xlu0 %4052 }
 0x609   : > { %v4195_v0 = vsel %vm3842_vm3, %v3878_v51, %v4038_v19 }
 0x60a   : > { %4228 = vst.msk [vmem:[%s6542_s21] sm:$0xff] %vm4227_vm4, %v4195_v0 }
 0x60c   : > { %v3883_v43 = vpop.permute.xlu1 %3882  ;;  %v3893_v30 = vpop.permute.xlu0 %3892 }
 0x60d   : > { %v4198_v34 = vsel %vm3842_vm3, %v3893_v30, %v4053_v35 }
 0x60e   : > { %4231 = vst.msk [vmem:[%s6542_s21 + $0x18] sm:$0xff] %vm4227_vm4, %v4198_v34 }
 0x610   : > { %v4043_v47 = vpop.permute.xlu0 %4042 }
 0x611   : > { %v4068_v31 = vpop.permute.xlu1 %4067  ;;  %v4196_v58 = vsel %vm3842_vm3, %v3883_v43, %v4043_v47 }
 0x612   : > { %4229 = vst.msk [vmem:[%s6542_s21 + $0x8] sm:$0xff] %vm4227_vm4, %v4196_v58 }
 0x615   : > { %v3908_v23 = vpop.permute.xlu1 %3907  ;;  %v4073_v3 = vpop.permute.xlu0 %4072 }
 0x616   : > { %v4201_v44 = vsel %vm3842_vm3, %v3908_v23, %v4068_v31 }
 0x617   : > { %4234 = vst.msk [vmem:[%s6542_s21 + $0x30] sm:$0xff] %vm4227_vm4, %v4201_v44 }
 0x619   : > { %v4058_v52 = vpop.permute.xlu1 %4057  ;;  %v3913_v55 = vpop.permute.xlu0 %3912 }
 0x61a   : > { %v4202_v13 = vsel %vm3842_vm3, %v3913_v55, %v4073_v3 }
 0x61b   : > { %4235 = vst.msk [vmem:[%s6542_s21 + $0x38] sm:$0xff] %vm4227_vm4, %v4202_v13 }
 0x61d   : > { %v3898_v38 = vpop.permute.xlu1 %3897  ;;  %v4063_v57 = vpop.permute.xlu0 %4062 }
 0x61e   : > { %v4199_v32 = vsel %vm3842_vm3, %v3898_v38, %v4058_v52 }
 0x61f   : > { %4232 = vst.msk [vmem:[%s6542_s21 + $0x20] sm:$0xff] %vm4227_vm4, %v4199_v32 }
 0x621   : > { %v4088_v11 = vpop.permute.xlu1 %4087  ;;  %v3903_v27 = vpop.permute.xlu0 %3902 }
 0x622   : > { %v4200_v46 = vsel %vm3842_vm3, %v3903_v27, %v4063_v57 }
 0x623   : > { %4233 = vst.msk [vmem:[%s6542_s21 + $0x28] sm:$0xff] %vm4227_vm4, %v4200_v46 }
 0x625   : > { %v3928_v9 = vpop.permute.xlu1 %3927  ;;  %v4093_v10 = vpop.permute.xlu0 %4092 }
 0x626   : > { %v4205_v41 = vsel %vm3842_vm3, %v3928_v9, %v4088_v11 }
 0x627   : > { %4238 = vst.msk [vmem:[%s6542_s21 + $0x50] sm:$0xff] %vm4227_vm4, %v4205_v41 }
 0x629   : > { %v4078_v24 = vpop.permute.xlu1 %4077  ;;  %v3933_v25 = vpop.permute.xlu0 %3932 }
 0x62a   : > { %v4206_v60 = vsel %vm3842_vm3, %v3933_v25, %v4093_v10 }
 0x62b   : > { %4239 = vst.msk [vmem:[%s6542_s21 + $0x58] sm:$0xff] %vm4227_vm4, %v4206_v60 }
 0x62d   : > { %v3918_v5 = vpop.permute.xlu1 %3917  ;;  %v4083_v28 = vpop.permute.xlu0 %4082 }
 0x62e   : > { %v4203_v53 = vsel %vm3842_vm3, %v3918_v5, %v4078_v24 }
 0x62f   : > { %4236 = vst.msk [vmem:[%s6542_s21 + $0x40] sm:$0xff] %vm4227_vm4, %v4203_v53 }
 0x631   : > { %v4108_v61 = vpop.permute.xlu1 %4107  ;;  %v3923_v59 = vpop.permute.xlu0 %3922 }
 0x632   : > { %v4204_v39 = vsel %vm3842_vm3, %v3923_v59, %v4083_v28 }
 0x633   : > { %4237 = vst.msk [vmem:[%s6542_s21 + $0x48] sm:$0xff] %vm4227_vm4, %v4204_v39 }
 0x635   : > { %v3948_v49 = vpop.permute.xlu1 %3947  ;;  %v4113_v48 = vpop.permute.xlu0 %4112 }
 0x636   : > { %v4209_v20 = vsel %vm3842_vm3, %v3948_v49, %v4108_v61 }
 0x637   : > { %4242 = vst.msk [vmem:[%s6542_s21 + $0x70] sm:$0xff] %vm4227_vm4, %v4209_v20 }
 0x639   : > { %v4098_v63 = vpop.permute.xlu1 %4097  ;;  %v3953_v4 = vpop.permute.xlu0 %3952 }
 0x63a   : > { %v4210_v62 = vsel %vm3842_vm3, %v3953_v4, %v4113_v48 }
 0x63b   : > { %4243 = vst.msk [vmem:[%s6542_s21 + $0x78] sm:$0xff] %vm4227_vm4, %v4210_v62 }
 0x63d   : > { %v3938_v7 = vpop.permute.xlu1 %3937  ;;  %v4103_v17 = vpop.permute.xlu0 %4102 }
 0x63e   : > { %v4207_v12 = vsel %vm3842_vm3, %v3938_v7, %v4098_v63 }
 0x63f   : > { %4240 = vst.msk [vmem:[%s6542_s21 + $0x60] sm:$0xff] %vm4227_vm4, %v4207_v12 }
 0x641   : > { %v4128_v2 = vpop.permute.xlu1 %4127  ;;  %v3943_v56 = vpop.permute.xlu0 %3942 }
 0x642   : > { %v4208_v50 = vsel %vm3842_vm3, %v3943_v56, %v4103_v17 }
 0x643   : > { %4241 = vst.msk [vmem:[%s6542_s21 + $0x68] sm:$0xff] %vm4227_vm4, %v4208_v50 }
 0x645   : > { %v3968_v8 = vpop.permute.xlu1 %3967  ;;  %v4133_v14 = vpop.permute.xlu0 %4132 }
 0x646   : > { %v4213_v16 = vsel %vm3842_vm3, %v3968_v8, %v4128_v2 }
 0x647   : > { %4246 = vst.msk [vmem:[%s6542_s21 + $0x90] sm:$0xff] %vm4227_vm4, %v4213_v16 }
 0x649   : > { %v4118_v54 = vpop.permute.xlu1 %4117  ;;  %v3973_v1 = vpop.permute.xlu0 %3972 }
 0x64a   : > { %v4214_v37 = vsel %vm3842_vm3, %v3973_v1, %v4133_v14 }
 0x64b   : > { %4247 = vst.msk [vmem:[%s6542_s21 + $0x98] sm:$0xff] %vm4227_vm4, %v4214_v37 }
 0x64d   : > { %v3958_v21 = vpop.permute.xlu1 %3957  ;;  %v4123_v6 = vpop.permute.xlu0 %4122 }
 0x64e   : > { %v4211_v22 = vsel %vm3842_vm3, %v3958_v21, %v4118_v54 }
 0x64f   : > { %4244 = vst.msk [vmem:[%s6542_s21 + $0x80] sm:$0xff] %vm4227_vm4, %v4211_v22 }
 0x651   : > { %v4148_v18 = vpop.permute.xlu1 %4147  ;;  %v3963_v26 = vpop.permute.xlu0 %3962 }
 0x652   : > { %v4212_v15 = vsel %vm3842_vm3, %v3963_v26, %v4123_v6 }
 0x653   : > { %4245 = vst.msk [vmem:[%s6542_s21 + $0x88] sm:$0xff] %vm4227_vm4, %v4212_v15 }
 0x655   : > { %v3988_v42 = vpop.permute.xlu1 %3987  ;;  %v4153_v40 = vpop.permute.xlu0 %4152 }
 0x656   : > { %v4217_v29 = vsel %vm3842_vm3, %v3988_v42, %v4148_v18 }
 0x657   : > { %4250 = vst.msk [vmem:[%s6542_s21 + $0xb0] sm:$0xff] %vm4227_vm4, %v4217_v29 }
 0x659   : > { %v4138_v36 = vpop.permute.xlu1 %4137  ;;  %v3993_v51 = vpop.permute.xlu0 %3992 }
 0x65a   : > { %v4218_v33 = vsel %vm3842_vm3, %v3993_v51, %v4153_v40 }
 0x65b   : > { %4251 = vst.msk [vmem:[%s6542_s21 + $0xb8] sm:$0xff] %vm4227_vm4, %v4218_v33 }
 0x65d   : > { %v3978_v19 = vpop.permute.xlu1 %3977  ;;  %v4143_v35 = vpop.permute.xlu0 %4142 }
 0x65e   : > { %v4215_v0 = vsel %vm3842_vm3, %v3978_v19, %v4138_v36 }
 0x65f   : > { %4248 = vst.msk [vmem:[%s6542_s21 + $0xa0] sm:$0xff] %vm4227_vm4, %v4215_v0 }
 0x661   : > { %v4168_v43 = vpop.permute.xlu1 %4167  ;;  %v3983_v30 = vpop.permute.xlu0 %3982 }
 0x662   : > { %v4216_v34 = vsel %vm3842_vm3, %v3983_v30, %v4143_v35 }
 0x663   : > { %4249 = vst.msk [vmem:[%s6542_s21 + $0xa8] sm:$0xff] %vm4227_vm4, %v4216_v34 }
 0x665   : > { %v4008_v47 = vpop.permute.xlu1 %4007  ;;  %v4173_v31 = vpop.permute.xlu0 %4172 }
 0x666   : > { %v4221_v58 = vsel %vm3842_vm3, %v4008_v47, %v4168_v43 }
 0x667   : > { %4254 = vst.msk [vmem:[%s6542_s21 + $0xd0] sm:$0xff] %vm4227_vm4, %v4221_v58 }
 0x669   : > { %v4158_v23 = vpop.permute.xlu1 %4157  ;;  %v4013_v3 = vpop.permute.xlu0 %4012 }
 0x66a   : > { %v4222_v44 = vsel %vm3842_vm3, %v4013_v3, %v4173_v31 }
 0x66b   : > { %4255 = vst.msk [vmem:[%s6542_s21 + $0xd8] sm:$0xff] %vm4227_vm4, %v4222_v44 }
 0x66d   : > { %v3998_v52 = vpop.permute.xlu1 %3997  ;;  %v4163_v55 = vpop.permute.xlu0 %4162 }
 0x66e   : > { %v4219_v13 = vsel %vm3842_vm3, %v3998_v52, %v4158_v23 }
 0x66f   : > { %4252 = vst.msk [vmem:[%s6542_s21 + $0xc0] sm:$0xff] %vm4227_vm4, %v4219_v13 }
 0x671   : > { %v4003_v38 = vpop.permute.xlu0 %4002 }
 0x672   : > { %v4220_v57 = vsel %vm3842_vm3, %v4003_v38, %v4163_v55 }
 0x673   : > { %4253 = vst.msk [vmem:[%s6542_s21 + $0xc8] sm:$0xff] %vm4227_vm4, %v4220_v57  ;;  %v4028_v32 = vpop.permute.xlu1 %4027 }
 0x677   : > { %v4178_v11 = vpop.permute.xlu1 %4177  ;;  %v4033_v27 = vpop.permute.xlu0 %4032 }
 0x67b   : > { %v4018_v46 = vpop.permute.xlu1 %4017  ;;  %v4183_v9 = vpop.permute.xlu0 %4182 }
 0x67c   : > { %v4223_v10 = vsel %vm3842_vm3, %v4018_v46, %v4178_v11 }
 0x67d   : > { %4256 = vst.msk [vmem:[%s6542_s21 + $0xe0] sm:$0xff] %vm4227_vm4, %v4223_v10 }
 0x67f   : > { %v4188_v41 = vpop.permute.xlu1 %4187  ;;  %v4023_v24 = vpop.permute.xlu0 %4022 }
 0x680   : > { %v4225_v25 = vsel %vm3842_vm3, %v4028_v32, %v4188_v41  ;;  %v4224_v60 = vsel %vm3842_vm3, %v4023_v24, %v4183_v9 }
 0x681   : > { %4258 = vst.msk [vmem:[%s6542_s21 + $0xf0] sm:$0xff] %vm4227_vm4, %v4225_v25  ;;  %4257 = vst.msk [vmem:[%s6542_s21 + $0xe8] sm:$0xff] %vm4227_vm4, %v4224_v60 }
 0x683   : > { %v4193_v5 = vpop.permute.xlu0 %4192 }
 0x684   : > { %v4226_v28 = vsel %vm3842_vm3, %v4033_v27, %v4193_v5 }
 0x685   : > { %4259 = vst.msk [vmem:[%s6542_s21 + $0xf8] sm:$0xff] %vm4227_vm4, %v4226_v28 }
 0x686 PF: > { %s6718_s20 = sld [smem:[#allocation8_spill]]  ;;  %s6719_s28 = smov %s5823_s17 }
 0x687   : > { %s6720_s17 = smov %s5681_s18  ;;  %s6721_s18 = smov %s5685_s19 }
 0x688   : > { %s6722_s19 = smov %s6719_s28 }
 0x68c   : > { %p22_p7 = scmp.ge.s32.totalorder %s6718_s20, 4  }
 0x68e   :  { %24 = sbr.rel (!%p22_p7) target bundleno = 7 (0x7), region = 108 }
 0x693   :  { %4282 = vsyncpa [#allocation3], 1 }
 0x694   :  { %4284 = vsyncpa [#allocation3 + $0x1], 1 }
 0x695   :  { %4285 = vsyncpa [#allocation5], 1 }

</bundles_post_ra>
